<compile_context>
chip_gen: v7x
topology: tpu7x:2x2x1
jax: 0.10.0
libtpu: 0.0.40
codegen_flags: <defaults>
</compile_context>

<pallas_src>
import functools

import jax
import jax.numpy as jnp
from jax import lax
from jax.experimental import pallas as pl
from jax.experimental.pallas import tpu as pltpu

VMEM = pltpu.MemorySpace.VMEM


# ----------------------------------------------------------------------------
# Kernel 1: fused dense GATConv over (metapath, dst-row tile) grid.
# ----------------------------------------------------------------------------
def gat_kernel(adj_ref, h_ref, w_ref, al_ref, ar_ref, b_ref, o_ref, feat_ref,
               *, num_heads, head_dim, tile_m):
    # adj_ref : (TM, N)   int8 mask for the dst-row tile of the current metapath
    # h_ref   : (N, Fin)  node features of the current metapath
    # w_ref   : (Fin, H*Dh) fc weight (pre-transposed for x @ W)
    # al_ref  : (H, Dh)   attn_l (source term)
    # ar_ref  : (H, Dh)   attn_r (destination term)
    # b_ref   : (1, H*Dh) GATConv bias
    # o_ref   : (TM, H*Dh) output tile
    # feat_ref: (N, H*Dh) f32 scratch, projected features (computed once per metapath)
    r = pl.program_id(1)

    @pl.when(r == 0)
    def _():
        # Feature projection once per metapath; reused by every row tile.
        feat_ref[...] = jnp.dot(h_ref[...].astype(jnp.bfloat16),
                                w_ref[...].astype(jnp.bfloat16),
                                preferred_element_type=jnp.float32)

    mask = adj_ref[...].astype(jnp.int32) > 0                 # (TM, N) bool
    feat = feat_ref[...]                                      # (N, H*Dh) f32 (sources)
    feat_bf = feat.astype(jnp.bfloat16)                       # hoisted MXU operand cast
    row0 = pl.multiple_of(r * tile_m, tile_m)
    feat_dst = feat_ref[pl.ds(row0, tile_m), :]               # (TM, H*Dh) (destinations)
    bias = b_ref[...]                                         # (1, H*Dh)

    for hd in range(num_heads):                               # static unroll over heads
        lo = hd * head_dim
        fh = feat[:, lo:lo + head_dim]                        # (N, Dh)  source features
        fh_bf = feat_bf[:, lo:lo + head_dim]                  # (N, Dh)  bf16 sources
        fh_dst = feat_dst[:, lo:lo + head_dim]                # (TM, Dh) dst features
        al = al_ref[hd:hd + 1, :]                             # (1, Dh)
        ar = ar_ref[hd:hd + 1, :]                             # (1, Dh)

        # dst term (VPU + lane reduce)
        er = jnp.sum(fh_dst * ar, axis=1, keepdims=True)      # (TM, 1)
        # src term laid along lanes via a tiny (1,Dh) x (N,Dh)^T contraction
        # (avoids any N x N matmul / transpose for the source logits).
        el_row = lax.dot_general(al, fh, (((1,), (1,)), ((), ())),
                                 preferred_element_type=jnp.float32)  # (1, N)

        e = er + el_row                                       # e[dst, src]
        e = jnp.where(e >= 0, e, 0.2 * e)                     # LeakyReLU(0.2)
        e = jnp.where(mask, e, -1e30)                         # mask non-edges

        m = jnp.max(e, axis=1, keepdims=True)
        # Non-edges underflow to exactly 0 after exp (self-loops guaranteed upstream).
        p = jnp.exp(e - m)
        denom = jnp.sum(p, axis=1, keepdims=True)
        alpha = p * pl.reciprocal(jnp.maximum(denom, 1e-30), approx=True)

        out_h = jnp.dot(alpha.astype(jnp.bfloat16), fh_bf,
                        preferred_element_type=jnp.float32)   # (TM, Dh)
        out_h = out_h + bias[0:1, lo:lo + head_dim]
        out_h = jnp.where(out_h > 0, out_h,
                          jnp.exp(jnp.minimum(out_h, 0.0)) - 1.0)   # ELU(alpha=1)
        o_ref[:, lo:lo + head_dim] = out_h                    # write head slice directly


def gat_all(adj, h, w, al, ar, bias, *, num_heads, head_dim, row_tile=None):
    m, n, _ = adj.shape
    fin = h.shape[-1]
    d = num_heads * head_dim

    # Row-tile choice: biggest aligned tile that divides N.  On v7x (64 MiB VMEM)
    # stay around <=256 rows for large N; v5e/v6e (128 MiB) can afford 2x that.
    tm = row_tile if row_tile is not None else min(n, 256)
    if n % tm != 0 or (tm != n and tm % 8 != 0):
        tm = n

    flops = int(m * (2 * n * fin * d
                     + num_heads * (2 * n * head_dim + 2 * n * n * head_dim)))
    transcendentals = int(m * num_heads * n * n)
    bytes_accessed = int(m * (n * n * adj.dtype.itemsize + n * fin * 4 + n * d * 4))

    kernel = functools.partial(gat_kernel, num_heads=num_heads,
                               head_dim=head_dim, tile_m=tm)
    return pl.pallas_call(
        kernel,
        out_shape=jax.ShapeDtypeStruct((m, n, d), jnp.float32),
        grid=(m, n // tm),
        in_specs=[
            pl.BlockSpec((None, tm, n), lambda i, r: (i, r, 0)),              # adj (int8)
            pl.BlockSpec((None, n, fin), lambda i, r: (i, 0, 0)),             # h
            pl.BlockSpec((None, fin, d), lambda i, r: (i, 0, 0)),             # fc weight
            pl.BlockSpec((None, num_heads, head_dim), lambda i, r: (i, 0, 0)),  # attn_l
            pl.BlockSpec((None, num_heads, head_dim), lambda i, r: (i, 0, 0)),  # attn_r
            pl.BlockSpec((None, 1, d), lambda i, r: (i, 0, 0)),               # bias
        ],
        out_specs=pl.BlockSpec((None, tm, d), lambda i, r: (i, r, 0)),
        scratch_shapes=[pltpu.VMEM((n, d), jnp.float32)],
        compiler_params=pltpu.CompilerParams(
            dimension_semantics=("parallel", "arbitrary"),
            vmem_limit_bytes=32 * 1024 * 1024),
        cost_estimate=pl.CostEstimate(flops=flops,
                                      transcendentals=transcendentals,
                                      bytes_accessed=bytes_accessed),
    )(adj, h, w, al, ar, bias)


# ----------------------------------------------------------------------------
# Kernel 2: SemanticAttention + predict Linear + per-graph sum + MLPReadout + Softmax.
# ----------------------------------------------------------------------------
def sem_readout_kernel(z_ref, sw1_ref, sb1_ref, sw2_ref, pw_ref, pb_ref,
                       mw1_ref, mb1_ref, mw2_ref, mb2_ref, mw3_ref, mb3_ref,
                       o_ref, *, num_metapath, batch, nodes_per_graph):
    mcount = num_metapath
    n = z_ref.shape[1]
    inv_n = 1.0 / n

    sw1 = sw1_ref[...]
    sb1 = sb1_ref[...]
    sw2 = sw2_ref[...]

    # ---- SemanticAttention: per-metapath projection (no (M*N, D) relayout) ----
    scores = []
    for mm in range(mcount):
        zm = z_ref[mm]                                                   # (N, D)
        t = jnp.tanh(jnp.dot(zm, sw1, preferred_element_type=jnp.float32) + sb1)
        sm = jnp.dot(t, sw2, preferred_element_type=jnp.float32)         # (N, 1)
        scores.append(jnp.sum(sm, axis=0, keepdims=True) * inv_n)        # mean over nodes

    mx = scores[0]
    for mm in range(1, mcount):
        mx = jnp.maximum(mx, scores[mm])
    exps = [jnp.exp(sc - mx) for sc in scores]
    den = exps[0]
    for mm in range(1, mcount):
        den = den + exps[mm]

    h_sem = (exps[0] / den) * z_ref[0]
    for mm in range(1, mcount):
        h_sem = h_sem + (exps[mm] / den) * z_ref[mm]                     # (N, D)

    # ---- predict Linear -> per-graph node sum -> MLPReadout -> Softmax(dim=1) ----
    hp = jnp.dot(h_sem, pw_ref[...],
                 preferred_element_type=jnp.float32) + pb_ref[...]       # (N, 64)
    g = jnp.sum(hp.reshape(batch, nodes_per_graph, hp.shape[1]), axis=1)  # (B, 64)

    x = jnp.maximum(jnp.dot(g, mw1_ref[...],
                            preferred_element_type=jnp.float32) + mb1_ref[...], 0.0)
    x = jnp.maximum(jnp.dot(x, mw2_ref[...],
                            preferred_element_type=jnp.float32) + mb2_ref[...], 0.0)
    logits = jnp.dot(x, mw3_ref[...],
                     preferred_element_type=jnp.float32) + mb3_ref[...]

    mmax = jnp.max(logits, axis=1, keepdims=True)
    p = jnp.exp(logits - mmax)
    o_ref[...] = p / jnp.sum(p, axis=1, keepdims=True)


def semantic_readout(z, sem, pred, mlp, *, batch, nodes_per_graph):
    mcount, _, _ = z.shape
    kernel = functools.partial(sem_readout_kernel, num_metapath=mcount,
                               batch=batch, nodes_per_graph=nodes_per_graph)
    vspec = pl.BlockSpec(memory_space=VMEM)
    return pl.pallas_call(
        kernel,
        out_shape=jax.ShapeDtypeStruct((batch, 2), jnp.float32),
        in_specs=[vspec] * 12,
        out_specs=vspec,
    )(z, sem["w1"], sem["b1"], sem["w2"], pred["w"], pred["b"],
      mlp["w1"], mlp["b1"], mlp["w2"], mlp["b2"], mlp["w3"], mlp["b3"])


# ----------------------------------------------------------------------------
# Model glue: parameters (Linear weights pre-transposed for x @ W) + forward.
# ----------------------------------------------------------------------------
def init_params(key, num_metapath, in_size, hidden_size, heads, out_size,
                sem_hidden=128):
    ks = iter(jax.random.split(key, 32))

    def lin(shape, scale=0.1):
        return jax.random.normal(next(ks), shape, jnp.float32) * scale

    d = heads * hidden_size
    gat = dict(
        w=lin((num_metapath, in_size, d)),            # fc weight
        al=lin((num_metapath, heads, hidden_size)),   # attn_l
        ar=lin((num_metapath, heads, hidden_size)),   # attn_r
        bias=lin((num_metapath, 1, d)),               # GATConv bias
    )
    sem = dict(w1=lin((d, sem_hidden)), b1=lin((1, sem_hidden)),
               w2=lin((sem_hidden, 1)))
    predict = dict(w=lin((d, out_size)), b=lin((1, out_size)))
    mlp = dict(w1=lin((out_size, out_size // 2)), b1=lin((1, out_size // 2)),
               w2=lin((out_size // 2, out_size // 4)), b2=lin((1, out_size // 4)),
               w3=lin((out_size // 4, 2)), b3=lin((1, 2)))
    return dict(gat=gat, sem=sem, predict=predict, mlp=mlp)


def han_forward(params, adj, h, batch, nodes_per_graph,
                *, num_heads, head_dim, row_tile=None):
    g = params["gat"]
    z = gat_all(adj, h, g["w"], g["al"], g["ar"], g["bias"],
                num_heads=num_heads, head_dim=head_dim, row_tile=row_tile)  # (M, N, H*Dh)
    return semantic_readout(z, params["sem"], params["predict"], params["mlp"],
                            batch=batch, nodes_per_graph=nodes_per_graph)   # (B, 2)


if __name__ == "__main__":
    key = jax.random.PRNGKey(0)

    num_metapath = 3
    in_size = 16
    hidden_size = 8
    num_heads = [2]       # single HANLayer, as in HAN(num_heads=[2])
    out_size = 64         # predict Linear -> MLPReadout(64, 2)
    batch = 2
    nodes_per_graph = 64
    n_nodes = batch * nodes_per_graph   # 128

    k_p, k_h, k_a = jax.random.split(key, 3)
    params = init_params(k_p, num_metapath, in_size, hidden_size,
                         num_heads[0], out_size)

    h_keys = jax.random.split(k_h, num_metapath)
    a_keys = jax.random.split(k_a, num_metapath)
    h = jnp.stack([jax.random.normal(h_keys[i], (n_nodes, in_size), jnp.float32)
                   for i in range(num_metapath)], axis=0)                 # (M, N, Fin)
    adjs = []
    for i in range(num_metapath):
        a = jax.random.uniform(a_keys[i], (n_nodes, n_nodes)) < 0.2
        a = jnp.logical_or(a, jnp.eye(n_nodes, dtype=bool))               # forced self loops
        adjs.append(a.astype(jnp.int8))
    adj = jnp.stack(adjs, axis=0)                                         # (M, N, N) int8

    fwd = jax.jit(functools.partial(
        han_forward, batch=batch, nodes_per_graph=nodes_per_graph,
        num_heads=num_heads[0], head_dim=hidden_size, row_tile=64))
    out = fwd(params, adj, h)
    out = jax.block_until_ready(out)

    assert out.shape == (batch, 2)
    assert bool(jnp.all(jnp.isfinite(out)))
    assert bool(jnp.all(jnp.abs(jnp.sum(out, axis=1) - 1.0) < 1e-3))
    print("KERNEL_OK")
</pallas_src>

<mosaic_0001>
module attributes {stable_mosaic.version = 11 : i64} {
  func.func @gat_kernel(%arg0: i32, %arg1: i32, %arg2: memref<1x64x128xi8, #tpu.memory_space<vmem>>, %arg3: memref<1x128x16xf32, #tpu.memory_space<vmem>>, %arg4: memref<1x16x16xf32, #tpu.memory_space<vmem>>, %arg5: memref<1x2x8xf32, #tpu.memory_space<vmem>>, %arg6: memref<1x2x8xf32, #tpu.memory_space<vmem>>, %arg7: memref<1x1x16xf32, #tpu.memory_space<vmem>>, %arg8: memref<1x64x16xf32, #tpu.memory_space<vmem>>, %arg9: memref<128x16xf32, #tpu.memory_space<vmem>>) attributes {dimension_semantics = [#tpu.dimension_semantics<parallel>, #tpu.dimension_semantics<arbitrary>], iteration_bounds = array<i64: 3, 2>, scalar_prefetch = 0 : i64, scratch_operands = 1 : i64, tpu.core_type = #tpu.core_type<tc>, window_params = [{transform_indices = @transform_0, window_bounds = array<i64: 1, 64, 128>}, {transform_indices = @transform_1, window_bounds = array<i64: 1, 128, 16>}, {transform_indices = @transform_2, window_bounds = array<i64: 1, 16, 16>}, {transform_indices = @transform_3, window_bounds = array<i64: 1, 2, 8>}, {transform_indices = @transform_4, window_bounds = array<i64: 1, 2, 8>}, {transform_indices = @transform_5, window_bounds = array<i64: 1, 1, 16>}, {transform_indices = @transform_6, window_bounds = array<i64: 1, 64, 16>}]} {
    %c0_i32 = arith.constant 0 : i32
    %0 = arith.cmpi eq, %arg1, %c0_i32 : i32
    %1 = arith.extui %0 : i1 to i32
    %c0_i32_0 = arith.constant 0 : i32
    %2 = arith.cmpi ne, %1, %c0_i32_0 : i32
    scf.if %2 {
      %c0_49 = arith.constant 0 : index
      %c0_50 = arith.constant 0 : index
      %c0_51 = arith.constant 0 : index
      %116 = vector.load %arg3[%c0_49, %c0_50, %c0_51] : memref<1x128x16xf32, #tpu.memory_space<vmem>>, vector<1x128x16xf32>
      %117 = vector.shape_cast %116 : vector<1x128x16xf32> to vector<128x16xf32>
      %118 = arith.truncf %117 : vector<128x16xf32> to vector<128x16xbf16>
      %c0_52 = arith.constant 0 : index
      %c0_53 = arith.constant 0 : index
      %c0_54 = arith.constant 0 : index
      %119 = vector.load %arg4[%c0_52, %c0_53, %c0_54] : memref<1x16x16xf32, #tpu.memory_space<vmem>>, vector<1x16x16xf32>
      %120 = vector.shape_cast %119 : vector<1x16x16xf32> to vector<16x16xf32>
      %121 = arith.truncf %120 : vector<16x16xf32> to vector<16x16xbf16>
      %cst_55 = arith.constant dense<0.000000e+00> : vector<128x16xf32>
      %122 = tpu.matmul %118, %121, %cst_55 {dimension_numbers = #tpu.dot_dimension_numbers<[1], [0], [0], [1], [0, 0, 1, 1], [], []>} : vector<128x16xbf16>, vector<16x16xbf16>, vector<128x16xf32> -> vector<128x16xf32>
      %c0_56 = arith.constant 0 : index
      %c0_57 = arith.constant 0 : index
      %123 = vector.load %arg9[%c0_56, %c0_57] : memref<128x16xf32, #tpu.memory_space<vmem>>, vector<128x16xf32>
      tpu.vector_store %arg9[%c0_56, %c0_57], %122 {strides = array<i32>} : memref<128x16xf32, #tpu.memory_space<vmem>>, vector<128x16xf32>,
    } else {
    }
    %c0 = arith.constant 0 : index
    %c0_1 = arith.constant 0 : index
    %c0_2 = arith.constant 0 : index
    %3 = vector.load %arg2[%c0, %c0_1, %c0_2] : memref<1x64x128xi8, #tpu.memory_space<vmem>>, vector<1x64x128xi8>
    %4 = vector.shape_cast %3 : vector<1x64x128xi8> to vector<64x128xi8>
    %5 = arith.extsi %4 : vector<64x128xi8> to vector<64x128xi32>
    %c0_i32_3 = arith.constant 0 : i32
    %6 = vector.broadcast %c0_i32_3 : i32 to vector<64x128xi32>
    %7 = arith.cmpi sgt, %5, %6 : vector<64x128xi32>
    %c0_4 = arith.constant 0 : index
    %c0_5 = arith.constant 0 : index
    %8 = vector.load %arg9[%c0_4, %c0_5] : memref<128x16xf32, #tpu.memory_space<vmem>>, vector<128x16xf32>
    %9 = arith.truncf %8 : vector<128x16xf32> to vector<128x16xbf16>
    %c64_i32 = arith.constant 64 : i32
    %10 = arith.muli %arg1, %c64_i32 : i32
    %11 = tpu.assume_multiple %10, 64 : i32
    %12 = arith.index_cast %11 : i32 to index
    %c0_6 = arith.constant 0 : index
    %13 = vector.load %arg9[%12, %c0_6] : memref<128x16xf32, #tpu.memory_space<vmem>>, vector<64x16xf32>
    %c0_7 = arith.constant 0 : index
    %c0_8 = arith.constant 0 : index
    %c0_9 = arith.constant 0 : index
    %14 = vector.load %arg7[%c0_7, %c0_8, %c0_9] : memref<1x1x16xf32, #tpu.memory_space<vmem>>, vector<1x1x16xf32>
    %15 = vector.shape_cast %14 : vector<1x1x16xf32> to vector<1x16xf32>
    %16 = vector.extract_strided_slice %8 {offsets = [0, 0], sizes = [128, 8], strides = [1, 1]} : vector<128x16xf32> to vector<128x8xf32>
    %17 = vector.extract_strided_slice %9 {offsets = [0, 0], sizes = [128, 8], strides = [1, 1]} : vector<128x16xbf16> to vector<128x8xbf16>
    %18 = vector.extract_strided_slice %13 {offsets = [0, 0], sizes = [64, 8], strides = [1, 1]} : vector<64x16xf32> to vector<64x8xf32>
    %c0_10 = arith.constant 0 : index
    %c0_11 = arith.constant 0 : index
    %c0_12 = arith.constant 0 : index
    %19 = vector.load %arg5[%c0_10, %c0_11, %c0_12] : memref<1x2x8xf32, #tpu.memory_space<vmem>>, vector<1x1x8xf32>
    %20 = vector.shape_cast %19 : vector<1x1x8xf32> to vector<1x8xf32>
    %c0_13 = arith.constant 0 : index
    %c0_14 = arith.constant 0 : index
    %c0_15 = arith.constant 0 : index
    %21 = vector.load %arg6[%c0_13, %c0_14, %c0_15] : memref<1x2x8xf32, #tpu.memory_space<vmem>>, vector<1x1x8xf32>
    %22 = vector.shape_cast %21 : vector<1x1x8xf32> to vector<1x8xf32>
    %23 = vector.broadcast %22 : vector<1x8xf32> to vector<64x8xf32>
    %24 = arith.mulf %18, %23 : vector<64x8xf32>
    %cst = arith.constant dense<0.000000e+00> : vector<64xf32>
    %25 = vector.multi_reduction <add>, %24, %cst [1] : vector<64x8xf32> to vector<64xf32>
    %26 = vector.shape_cast %25 : vector<64xf32> to vector<64x1xf32>
    %cst_16 = arith.constant dense<0.000000e+00> : vector<1x128xf32>
    %27 = tpu.matmul %20, %16, %cst_16 {dimension_numbers = #tpu.dot_dimension_numbers<[1], [1], [0], [0], [0, 0, 1, 0], [], []>} : vector<1x8xf32>, vector<128x8xf32>, vector<1x128xf32> -> vector<1x128xf32>
    %28 = vector.broadcast %26 : vector<64x1xf32> to vector<64x128xf32>
    %29 = vector.broadcast %27 : vector<1x128xf32> to vector<64x128xf32>
    %30 = arith.addf %28, %29 : vector<64x128xf32>
    %cst_17 = arith.constant 0.000000e+00 : f32
    %31 = vector.broadcast %cst_17 : f32 to vector<64x128xf32>
    %32 = arith.cmpf oge, %30, %31 : vector<64x128xf32>
    %cst_18 = arith.constant 2.000000e-01 : f32
    %33 = vector.broadcast %cst_18 : f32 to vector<64x128xf32>
    %34 = arith.mulf %33, %30 : vector<64x128xf32>
    %35 = arith.select %32, %30, %34 : vector<64x128xi1>, vector<64x128xf32>
    %cst_19 = arith.constant -1.000000e+30 : f32
    %36 = vector.broadcast %cst_19 : f32 to vector<64x128xf32>
    %37 = arith.select %7, %35, %36 : vector<64x128xi1>, vector<64x128xf32>
    %cst_20 = arith.constant dense<0xFF800000> : vector<64xf32>
    %38 = vector.multi_reduction <maximumf>, %37, %cst_20 [1] : vector<64x128xf32> to vector<64xf32>
    %39 = vector.shape_cast %38 : vector<64xf32> to vector<64x1xf32>
    %40 = vector.broadcast %39 : vector<64x1xf32> to vector<64x128xf32>
    %41 = arith.subf %37, %40 : vector<64x128xf32>
    %42 = math.exp %41 : vector<64x128xf32>
    %cst_21 = arith.constant dense<0.000000e+00> : vector<64xf32>
    %43 = vector.multi_reduction <add>, %42, %cst_21 [1] : vector<64x128xf32> to vector<64xf32>
    %44 = vector.shape_cast %43 : vector<64xf32> to vector<64x1xf32>
    %cst_22 = arith.constant 1.000000e-30 : f32
    %45 = vector.broadcast %cst_22 : f32 to vector<64x1xf32>
    %46 = arith.maximumf %44, %45 : vector<64x1xf32>
    %47 = tpu.reciprocal %46 {approx = true} : vector<64x1xf32> -> vector<64x1xf32>
    %48 = vector.broadcast %47 : vector<64x1xf32> to vector<64x128xf32>
    %49 = arith.mulf %42, %48 : vector<64x128xf32>
    %50 = arith.truncf %49 : vector<64x128xf32> to vector<64x128xbf16>
    %cst_23 = arith.constant dense<0.000000e+00> : vector<64x8xf32>
    %51 = tpu.matmul %50, %17, %cst_23 {dimension_numbers = #tpu.dot_dimension_numbers<[1], [0], [0], [1], [0, 0, 1, 1], [], []>} : vector<64x128xbf16>, vector<128x8xbf16>, vector<64x8xf32> -> vector<64x8xf32>
    %52 = vector.extract_strided_slice %15 {offsets = [0, 0], sizes = [1, 8], strides = [1, 1]} : vector<1x16xf32> to vector<1x8xf32>
    %53 = vector.broadcast %52 : vector<1x8xf32> to vector<64x8xf32>
    %54 = arith.addf %51, %53 : vector<64x8xf32>
    %cst_24 = arith.constant 0.000000e+00 : f32
    %55 = vector.broadcast %cst_24 : f32 to vector<64x8xf32>
    %56 = arith.cmpf ogt, %54, %55 : vector<64x8xf32>
    %cst_25 = arith.constant 0.000000e+00 : f32
    %57 = vector.broadcast %cst_25 : f32 to vector<64x8xf32>
    %58 = arith.minimumf %54, %57 : vector<64x8xf32>
    %59 = math.exp %58 : vector<64x8xf32>
    %cst_26 = arith.constant 1.000000e+00 : f32
    %60 = vector.broadcast %cst_26 : f32 to vector<64x8xf32>
    %61 = arith.subf %59, %60 : vector<64x8xf32>
    %62 = arith.select %56, %54, %61 : vector<64x8xi1>, vector<64x8xf32>
    %c0_27 = arith.constant 0 : index
    %c0_28 = arith.constant 0 : index
    %c0_29 = arith.constant 0 : index
    %63 = vector.load %arg8[%c0_27, %c0_28, %c0_29] : memref<1x64x16xf32, #tpu.memory_space<vmem>>, vector<1x64x8xf32>
    %64 = vector.shape_cast %63 : vector<1x64x8xf32> to vector<64x8xf32>
    %65 = vector.shape_cast %62 : vector<64x8xf32> to vector<1x64x8xf32>
    tpu.vector_store %arg8[%c0_27, %c0_28, %c0_29], %65 {strides = array<i32>} : memref<1x64x16xf32, #tpu.memory_space<vmem>>, vector<1x64x8xf32>,
    %66 = vector.extract_strided_slice %8 {offsets = [0, 8], sizes = [128, 8], strides = [1, 1]} : vector<128x16xf32> to vector<128x8xf32>
    %67 = vector.extract_strided_slice %9 {offsets = [0, 8], sizes = [128, 8], strides = [1, 1]} : vector<128x16xbf16> to vector<128x8xbf16>
    %68 = vector.extract_strided_slice %13 {offsets = [0, 8], sizes = [64, 8], strides = [1, 1]} : vector<64x16xf32> to vector<64x8xf32>
    %c0_30 = arith.constant 0 : index
    %c1 = arith.constant 1 : index
    %c0_31 = arith.constant 0 : index
    %69 = vector.load %arg5[%c0_30, %c1, %c0_31] : memref<1x2x8xf32, #tpu.memory_space<vmem>>, vector<1x1x8xf32>
    %70 = vector.shape_cast %69 : vector<1x1x8xf32> to vector<1x8xf32>
    %c0_32 = arith.constant 0 : index
    %c1_33 = arith.constant 1 : index
    %c0_34 = arith.constant 0 : index
    %71 = vector.load %arg6[%c0_32, %c1_33, %c0_34] : memref<1x2x8xf32, #tpu.memory_space<vmem>>, vector<1x1x8xf32>
    %72 = vector.shape_cast %71 : vector<1x1x8xf32> to vector<1x8xf32>
    %73 = vector.broadcast %72 : vector<1x8xf32> to vector<64x8xf32>
    %74 = arith.mulf %68, %73 : vector<64x8xf32>
    %cst_35 = arith.constant dense<0.000000e+00> : vector<64xf32>
    %75 = vector.multi_reduction <add>, %74, %cst_35 [1] : vector<64x8xf32> to vector<64xf32>
    %76 = vector.shape_cast %75 : vector<64xf32> to vector<64x1xf32>
    %cst_36 = arith.constant dense<0.000000e+00> : vector<1x128xf32>
    %77 = tpu.matmul %70, %66, %cst_36 {dimension_numbers = #tpu.dot_dimension_numbers<[1], [1], [0], [0], [0, 0, 1, 0], [], []>} : vector<1x8xf32>, vector<128x8xf32>, vector<1x128xf32> -> vector<1x128xf32>
    %78 = vector.broadcast %76 : vector<64x1xf32> to vector<64x128xf32>
    %79 = vector.broadcast %77 : vector<1x128xf32> to vector<64x128xf32>
    %80 = arith.addf %78, %79 : vector<64x128xf32>
    %cst_37 = arith.constant 0.000000e+00 : f32
    %81 = vector.broadcast %cst_37 : f32 to vector<64x128xf32>
    %82 = arith.cmpf oge, %80, %81 : vector<64x128xf32>
    %cst_38 = arith.constant 2.000000e-01 : f32
    %83 = vector.broadcast %cst_38 : f32 to vector<64x128xf32>
    %84 = arith.mulf %83, %80 : vector<64x128xf32>
    %85 = arith.select %82, %80, %84 : vector<64x128xi1>, vector<64x128xf32>
    %cst_39 = arith.constant -1.000000e+30 : f32
    %86 = vector.broadcast %cst_39 : f32 to vector<64x128xf32>
    %87 = arith.select %7, %85, %86 : vector<64x128xi1>, vector<64x128xf32>
    %cst_40 = arith.constant dense<0xFF800000> : vector<64xf32>
    %88 = vector.multi_reduction <maximumf>, %87, %cst_40 [1] : vector<64x128xf32> to vector<64xf32>
    %89 = vector.shape_cast %88 : vector<64xf32> to vector<64x1xf32>
    %90 = vector.broadcast %89 : vector<64x1xf32> to vector<64x128xf32>
    %91 = arith.subf %87, %90 : vector<64x128xf32>
    %92 = math.exp %91 : vector<64x128xf32>
    %cst_41 = arith.constant dense<0.000000e+00> : vector<64xf32>
    %93 = vector.multi_reduction <add>, %92, %cst_41 [1] : vector<64x128xf32> to vector<64xf32>
    %94 = vector.shape_cast %93 : vector<64xf32> to vector<64x1xf32>
    %cst_42 = arith.constant 1.000000e-30 : f32
    %95 = vector.broadcast %cst_42 : f32 to vector<64x1xf32>
    %96 = arith.maximumf %94, %95 : vector<64x1xf32>
    %97 = tpu.reciprocal %96 {approx = true} : vector<64x1xf32> -> vector<64x1xf32>
    %98 = vector.broadcast %97 : vector<64x1xf32> to vector<64x128xf32>
    %99 = arith.mulf %92, %98 : vector<64x128xf32>
    %100 = arith.truncf %99 : vector<64x128xf32> to vector<64x128xbf16>
    %cst_43 = arith.constant dense<0.000000e+00> : vector<64x8xf32>
    %101 = tpu.matmul %100, %67, %cst_43 {dimension_numbers = #tpu.dot_dimension_numbers<[1], [0], [0], [1], [0, 0, 1, 1], [], []>} : vector<64x128xbf16>, vector<128x8xbf16>, vector<64x8xf32> -> vector<64x8xf32>
    %102 = vector.extract_strided_slice %15 {offsets = [0, 8], sizes = [1, 8], strides = [1, 1]} : vector<1x16xf32> to vector<1x8xf32>
    %103 = vector.broadcast %102 : vector<1x8xf32> to vector<64x8xf32>
    %104 = arith.addf %101, %103 : vector<64x8xf32>
    %cst_44 = arith.constant 0.000000e+00 : f32
    %105 = vector.broadcast %cst_44 : f32 to vector<64x8xf32>
    %106 = arith.cmpf ogt, %104, %105 : vector<64x8xf32>
    %cst_45 = arith.constant 0.000000e+00 : f32
    %107 = vector.broadcast %cst_45 : f32 to vector<64x8xf32>
    %108 = arith.minimumf %104, %107 : vector<64x8xf32>
    %109 = math.exp %108 : vector<64x8xf32>
    %cst_46 = arith.constant 1.000000e+00 : f32
    %110 = vector.broadcast %cst_46 : f32 to vector<64x8xf32>
    %111 = arith.subf %109, %110 : vector<64x8xf32>
    %112 = arith.select %106, %104, %111 : vector<64x8xi1>, vector<64x8xf32>
    %c0_47 = arith.constant 0 : index
    %c0_48 = arith.constant 0 : index
    %c8 = arith.constant 8 : index
    %113 = vector.load %arg8[%c0_47, %c0_48, %c8] : memref<1x64x16xf32, #tpu.memory_space<vmem>>, vector<1x64x8xf32>
    %114 = vector.shape_cast %113 : vector<1x64x8xf32> to vector<64x8xf32>
    %115 = vector.shape_cast %112 : vector<64x8xf32> to vector<1x64x8xf32>
    tpu.vector_store %arg8[%c0_47, %c0_48, %c8], %115 {strides = array<i32>} : memref<1x64x16xf32, #tpu.memory_space<vmem>>, vector<1x64x8xf32>,
    return
  }
  func.func @transform_0(%arg0: i32, %arg1: i32) -> (i32, i32, i32) {
    %c0_i32 = arith.constant 0 : i32
    %c0_i32_0 = arith.constant 0 : i32
    return %arg0, %arg1, %c0_i32 : i32, i32, i32
  }
  func.func @transform_1(%arg0: i32, %arg1: i32) -> (i32, i32, i32) {
    %c0_i32 = arith.constant 0 : i32
    %c0_i32_0 = arith.constant 0 : i32
    %c0_i32_1 = arith.constant 0 : i32
    return %arg0, %c0_i32, %c0_i32_0 : i32, i32, i32
  }
  func.func @transform_2(%arg0: i32, %arg1: i32) -> (i32, i32, i32) {
    %c0_i32 = arith.constant 0 : i32
    %c0_i32_0 = arith.constant 0 : i32
    %c0_i32_1 = arith.constant 0 : i32
    return %arg0, %c0_i32, %c0_i32_0 : i32, i32, i32
  }
  func.func @transform_3(%arg0: i32, %arg1: i32) -> (i32, i32, i32) {
    %c0_i32 = arith.constant 0 : i32
    %c0_i32_0 = arith.constant 0 : i32
    %c0_i32_1 = arith.constant 0 : i32
    return %arg0, %c0_i32, %c0_i32_0 : i32, i32, i32
  }
  func.func @transform_4(%arg0: i32, %arg1: i32) -> (i32, i32, i32) {
    %c0_i32 = arith.constant 0 : i32
    %c0_i32_0 = arith.constant 0 : i32
    %c0_i32_1 = arith.constant 0 : i32
    return %arg0, %c0_i32, %c0_i32_0 : i32, i32, i32
  }
  func.func @transform_5(%arg0: i32, %arg1: i32) -> (i32, i32, i32) {
    %c0_i32 = arith.constant 0 : i32
    %c0_i32_0 = arith.constant 0 : i32
    %c0_i32_1 = arith.constant 0 : i32
    return %arg0, %c0_i32, %c0_i32_0 : i32, i32, i32
  }
  func.func @transform_6(%arg0: i32, %arg1: i32) -> (i32, i32, i32) {
    %c0_i32 = arith.constant 0 : i32
    %c0_i32_0 = arith.constant 0 : i32
    return %arg0, %arg1, %c0_i32 : i32, i32, i32
  }
}

module attributes {stable_mosaic.version = 11 : i64} {
  func.func @sem_readout_kernel(%arg0: memref<3x128x16xf32, #tpu.memory_space<vmem>>, %arg1: memref<16x128xf32, #tpu.memory_space<vmem>>, %arg2: memref<1x128xf32, #tpu.memory_space<vmem>>, %arg3: memref<128x1xf32, #tpu.memory_space<vmem>>, %arg4: memref<16x64xf32, #tpu.memory_space<vmem>>, %arg5: memref<1x64xf32, #tpu.memory_space<vmem>>, %arg6: memref<64x32xf32, #tpu.memory_space<vmem>>, %arg7: memref<1x32xf32, #tpu.memory_space<vmem>>, %arg8: memref<32x16xf32, #tpu.memory_space<vmem>>, %arg9: memref<1x16xf32, #tpu.memory_space<vmem>>, %arg10: memref<16x2xf32, #tpu.memory_space<vmem>>, %arg11: memref<1x2xf32, #tpu.memory_space<vmem>>, %arg12: memref<2x2xf32, #tpu.memory_space<vmem>>) attributes {dimension_semantics = [], scalar_prefetch = 0 : i64, scratch_operands = 0 : i64, tpu.core_type = #tpu.core_type<tc>} {
    %c0 = arith.constant 0 : index
    %c0_0 = arith.constant 0 : index
    %0 = vector.load %arg1[%c0, %c0_0] : memref<16x128xf32, #tpu.memory_space<vmem>>, vector<16x128xf32>
    %c0_1 = arith.constant 0 : index
    %c0_2 = arith.constant 0 : index
    %1 = vector.load %arg2[%c0_1, %c0_2] : memref<1x128xf32, #tpu.memory_space<vmem>>, vector<1x128xf32>
    %c0_3 = arith.constant 0 : index
    %c0_4 = arith.constant 0 : index
    %2 = vector.load %arg3[%c0_3, %c0_4] : memref<128x1xf32, #tpu.memory_space<vmem>>, vector<128x1xf32>
    %c0_5 = arith.constant 0 : index
    %c0_6 = arith.constant 0 : index
    %c0_7 = arith.constant 0 : index
    %3 = vector.load %arg0[%c0_5, %c0_6, %c0_7] : memref<3x128x16xf32, #tpu.memory_space<vmem>>, vector<1x128x16xf32>
    %4 = vector.shape_cast %3 : vector<1x128x16xf32> to vector<128x16xf32>
    %cst = arith.constant dense<0.000000e+00> : vector<128x128xf32>
    %5 = tpu.matmul %4, %0, %cst {dimension_numbers = #tpu.dot_dimension_numbers<[1], [0], [0], [1], [0, 0, 1, 1], [], []>} : vector<128x16xf32>, vector<16x128xf32>, vector<128x128xf32> -> vector<128x128xf32>
    %6 = vector.broadcast %1 : vector<1x128xf32> to vector<128x128xf32>
    %7 = arith.addf %5, %6 : vector<128x128xf32>
    %8 = math.tanh %7 : vector<128x128xf32>
    %cst_8 = arith.constant dense<0.000000e+00> : vector<128x1xf32>
    %9 = tpu.matmul %8, %2, %cst_8 {dimension_numbers = #tpu.dot_dimension_numbers<[1], [0], [0], [1], [0, 0, 1, 1], [], []>} : vector<128x128xf32>, vector<128x1xf32>, vector<128x1xf32> -> vector<128x1xf32>
    %cst_9 = arith.constant dense<0.000000e+00> : vector<1xf32>
    %10 = vector.multi_reduction <add>, %9, %cst_9 [0] : vector<128x1xf32> to vector<1xf32>
    %11 = vector.shape_cast %10 : vector<1xf32> to vector<1x1xf32>
    %cst_10 = arith.constant 7.812500e-03 : f32
    %12 = vector.broadcast %cst_10 : f32 to vector<1x1xf32>
    %13 = arith.mulf %11, %12 : vector<1x1xf32>
    %c1 = arith.constant 1 : index
    %c0_11 = arith.constant 0 : index
    %c0_12 = arith.constant 0 : index
    %14 = vector.load %arg0[%c1, %c0_11, %c0_12] : memref<3x128x16xf32, #tpu.memory_space<vmem>>, vector<1x128x16xf32>
    %15 = vector.shape_cast %14 : vector<1x128x16xf32> to vector<128x16xf32>
    %cst_13 = arith.constant dense<0.000000e+00> : vector<128x128xf32>
    %16 = tpu.matmul %15, %0, %cst_13 {dimension_numbers = #tpu.dot_dimension_numbers<[1], [0], [0], [1], [0, 0, 1, 1], [], []>} : vector<128x16xf32>, vector<16x128xf32>, vector<128x128xf32> -> vector<128x128xf32>
    %17 = vector.broadcast %1 : vector<1x128xf32> to vector<128x128xf32>
    %18 = arith.addf %16, %17 : vector<128x128xf32>
    %19 = math.tanh %18 : vector<128x128xf32>
    %cst_14 = arith.constant dense<0.000000e+00> : vector<128x1xf32>
    %20 = tpu.matmul %19, %2, %cst_14 {dimension_numbers = #tpu.dot_dimension_numbers<[1], [0], [0], [1], [0, 0, 1, 1], [], []>} : vector<128x128xf32>, vector<128x1xf32>, vector<128x1xf32> -> vector<128x1xf32>
    %cst_15 = arith.constant dense<0.000000e+00> : vector<1xf32>
    %21 = vector.multi_reduction <add>, %20, %cst_15 [0] : vector<128x1xf32> to vector<1xf32>
    %22 = vector.shape_cast %21 : vector<1xf32> to vector<1x1xf32>
    %cst_16 = arith.constant 7.812500e-03 : f32
    %23 = vector.broadcast %cst_16 : f32 to vector<1x1xf32>
    %24 = arith.mulf %22, %23 : vector<1x1xf32>
    %c2 = arith.constant 2 : index
    %c0_17 = arith.constant 0 : index
    %c0_18 = arith.constant 0 : index
    %25 = vector.load %arg0[%c2, %c0_17, %c0_18] : memref<3x128x16xf32, #tpu.memory_space<vmem>>, vector<1x128x16xf32>
    %26 = vector.shape_cast %25 : vector<1x128x16xf32> to vector<128x16xf32>
    %cst_19 = arith.constant dense<0.000000e+00> : vector<128x128xf32>
    %27 = tpu.matmul %26, %0, %cst_19 {dimension_numbers = #tpu.dot_dimension_numbers<[1], [0], [0], [1], [0, 0, 1, 1], [], []>} : vector<128x16xf32>, vector<16x128xf32>, vector<128x128xf32> -> vector<128x128xf32>
    %28 = vector.broadcast %1 : vector<1x128xf32> to vector<128x128xf32>
    %29 = arith.addf %27, %28 : vector<128x128xf32>
    %30 = math.tanh %29 : vector<128x128xf32>
    %cst_20 = arith.constant dense<0.000000e+00> : vector<128x1xf32>
    %31 = tpu.matmul %30, %2, %cst_20 {dimension_numbers = #tpu.dot_dimension_numbers<[1], [0], [0], [1], [0, 0, 1, 1], [], []>} : vector<128x128xf32>, vector<128x1xf32>, vector<128x1xf32> -> vector<128x1xf32>
    %cst_21 = arith.constant dense<0.000000e+00> : vector<1xf32>
    %32 = vector.multi_reduction <add>, %31, %cst_21 [0] : vector<128x1xf32> to vector<1xf32>
    %33 = vector.shape_cast %32 : vector<1xf32> to vector<1x1xf32>
    %cst_22 = arith.constant 7.812500e-03 : f32
    %34 = vector.broadcast %cst_22 : f32 to vector<1x1xf32>
    %35 = arith.mulf %33, %34 : vector<1x1xf32>
    %36 = arith.maximumf %13, %24 : vector<1x1xf32>
    %37 = arith.maximumf %36, %35 : vector<1x1xf32>
    %38 = arith.subf %13, %37 : vector<1x1xf32>
    %39 = math.exp %38 : vector<1x1xf32>
    %40 = arith.subf %24, %37 : vector<1x1xf32>
    %41 = math.exp %40 : vector<1x1xf32>
    %42 = arith.subf %35, %37 : vector<1x1xf32>
    %43 = math.exp %42 : vector<1x1xf32>
    %44 = arith.addf %39, %41 : vector<1x1xf32>
    %45 = arith.addf %44, %43 : vector<1x1xf32>
    %46 = arith.divf %39, %45 : vector<1x1xf32>
    %c0_23 = arith.constant 0 : index
    %c0_24 = arith.constant 0 : index
    %c0_25 = arith.constant 0 : index
    %47 = vector.load %arg0[%c0_23, %c0_24, %c0_25] : memref<3x128x16xf32, #tpu.memory_space<vmem>>, vector<1x128x16xf32>
    %48 = vector.shape_cast %47 : vector<1x128x16xf32> to vector<128x16xf32>
    %49 = vector.broadcast %46 : vector<1x1xf32> to vector<128x16xf32>
    %50 = arith.mulf %49, %48 : vector<128x16xf32>
    %51 = arith.divf %41, %45 : vector<1x1xf32>
    %c1_26 = arith.constant 1 : index
    %c0_27 = arith.constant 0 : index
    %c0_28 = arith.constant 0 : index
    %52 = vector.load %arg0[%c1_26, %c0_27, %c0_28] : memref<3x128x16xf32, #tpu.memory_space<vmem>>, vector<1x128x16xf32>
    %53 = vector.shape_cast %52 : vector<1x128x16xf32> to vector<128x16xf32>
    %54 = vector.broadcast %51 : vector<1x1xf32> to vector<128x16xf32>
    %55 = arith.mulf %54, %53 : vector<128x16xf32>
    %56 = arith.addf %50, %55 : vector<128x16xf32>
    %57 = arith.divf %43, %45 : vector<1x1xf32>
    %c2_29 = arith.constant 2 : index
    %c0_30 = arith.constant 0 : index
    %c0_31 = arith.constant 0 : index
    %58 = vector.load %arg0[%c2_29, %c0_30, %c0_31] : memref<3x128x16xf32, #tpu.memory_space<vmem>>, vector<1x128x16xf32>
    %59 = vector.shape_cast %58 : vector<1x128x16xf32> to vector<128x16xf32>
    %60 = vector.broadcast %57 : vector<1x1xf32> to vector<128x16xf32>
    %61 = arith.mulf %60, %59 : vector<128x16xf32>
    %62 = arith.addf %56, %61 : vector<128x16xf32>
    %c0_32 = arith.constant 0 : index
    %c0_33 = arith.constant 0 : index
    %63 = vector.load %arg4[%c0_32, %c0_33] : memref<16x64xf32, #tpu.memory_space<vmem>>, vector<16x64xf32>
    %cst_34 = arith.constant dense<0.000000e+00> : vector<128x64xf32>
    %64 = tpu.matmul %62, %63, %cst_34 {dimension_numbers = #tpu.dot_dimension_numbers<[1], [0], [0], [1], [0, 0, 1, 1], [], []>} : vector<128x16xf32>, vector<16x64xf32>, vector<128x64xf32> -> vector<128x64xf32>
    %c0_35 = arith.constant 0 : index
    %c0_36 = arith.constant 0 : index
    %65 = vector.load %arg5[%c0_35, %c0_36] : memref<1x64xf32, #tpu.memory_space<vmem>>, vector<1x64xf32>
    %66 = vector.broadcast %65 : vector<1x64xf32> to vector<128x64xf32>
    %67 = arith.addf %64, %66 : vector<128x64xf32>
    %68 = vector.shape_cast %67 : vector<128x64xf32> to vector<2x64x64xf32>
    %cst_37 = arith.constant dense<0.000000e+00> : vector<2x64xf32>
    %69 = vector.multi_reduction <add>, %68, %cst_37 [1] : vector<2x64x64xf32> to vector<2x64xf32>
    %c0_38 = arith.constant 0 : index
    %c0_39 = arith.constant 0 : index
    %70 = vector.load %arg6[%c0_38, %c0_39] : memref<64x32xf32, #tpu.memory_space<vmem>>, vector<64x32xf32>
    %cst_40 = arith.constant dense<0.000000e+00> : vector<2x32xf32>
    %71 = tpu.matmul %69, %70, %cst_40 {dimension_numbers = #tpu.dot_dimension_numbers<[1], [0], [0], [1], [0, 0, 1, 1], [], []>} : vector<2x64xf32>, vector<64x32xf32>, vector<2x32xf32> -> vector<2x32xf32>
    %c0_41 = arith.constant 0 : index
    %c0_42 = arith.constant 0 : index
    %72 = vector.load %arg7[%c0_41, %c0_42] : memref<1x32xf32, #tpu.memory_space<vmem>>, vector<1x32xf32>
    %73 = vector.broadcast %72 : vector<1x32xf32> to vector<2x32xf32>
    %74 = arith.addf %71, %73 : vector<2x32xf32>
    %cst_43 = arith.constant 0.000000e+00 : f32
    %75 = vector.broadcast %cst_43 : f32 to vector<2x32xf32>
    %76 = arith.maximumf %74, %75 : vector<2x32xf32>
    %c0_44 = arith.constant 0 : index
    %c0_45 = arith.constant 0 : index
    %77 = vector.load %arg8[%c0_44, %c0_45] : memref<32x16xf32, #tpu.memory_space<vmem>>, vector<32x16xf32>
    %cst_46 = arith.constant dense<0.000000e+00> : vector<2x16xf32>
    %78 = tpu.matmul %76, %77, %cst_46 {dimension_numbers = #tpu.dot_dimension_numbers<[1], [0], [0], [1], [0, 0, 1, 1], [], []>} : vector<2x32xf32>, vector<32x16xf32>, vector<2x16xf32> -> vector<2x16xf32>
    %c0_47 = arith.constant 0 : index
    %c0_48 = arith.constant 0 : index
    %79 = vector.load %arg9[%c0_47, %c0_48] : memref<1x16xf32, #tpu.memory_space<vmem>>, vector<1x16xf32>
    %80 = vector.broadcast %79 : vector<1x16xf32> to vector<2x16xf32>
    %81 = arith.addf %78, %80 : vector<2x16xf32>
    %cst_49 = arith.constant 0.000000e+00 : f32
    %82 = vector.broadcast %cst_49 : f32 to vector<2x16xf32>
    %83 = arith.maximumf %81, %82 : vector<2x16xf32>
    %c0_50 = arith.constant 0 : index
    %c0_51 = arith.constant 0 : index
    %84 = vector.load %arg10[%c0_50, %c0_51] : memref<16x2xf32, #tpu.memory_space<vmem>>, vector<16x2xf32>
    %cst_52 = arith.constant dense<0.000000e+00> : vector<2x2xf32>
    %85 = tpu.matmul %83, %84, %cst_52 {dimension_numbers = #tpu.dot_dimension_numbers<[1], [0], [0], [1], [0, 0, 1, 1], [], []>} : vector<2x16xf32>, vector<16x2xf32>, vector<2x2xf32> -> vector<2x2xf32>
    %c0_53 = arith.constant 0 : index
    %c0_54 = arith.constant 0 : index
    %86 = vector.load %arg11[%c0_53, %c0_54] : memref<1x2xf32, #tpu.memory_space<vmem>>, vector<1x2xf32>
    %87 = vector.broadcast %86 : vector<1x2xf32> to vector<2x2xf32>
    %88 = arith.addf %85, %87 : vector<2x2xf32>
    %cst_55 = arith.constant dense<0xFF800000> : vector<2xf32>
    %89 = vector.multi_reduction <maximumf>, %88, %cst_55 [1] : vector<2x2xf32> to vector<2xf32>
    %90 = vector.shape_cast %89 : vector<2xf32> to vector<2x1xf32>
    %91 = vector.broadcast %90 : vector<2x1xf32> to vector<2x2xf32>
    %92 = arith.subf %88, %91 : vector<2x2xf32>
    %93 = math.exp %92 : vector<2x2xf32>
    %cst_56 = arith.constant dense<0.000000e+00> : vector<2xf32>
    %94 = vector.multi_reduction <add>, %93, %cst_56 [1] : vector<2x2xf32> to vector<2xf32>
    %95 = vector.shape_cast %94 : vector<2xf32> to vector<2x1xf32>
    %96 = vector.broadcast %95 : vector<2x1xf32> to vector<2x2xf32>
    %97 = arith.divf %93, %96 : vector<2x2xf32>
    %c0_57 = arith.constant 0 : index
    %c0_58 = arith.constant 0 : index
    %98 = vector.load %arg12[%c0_57, %c0_58] : memref<2x2xf32, #tpu.memory_space<vmem>>, vector<2x2xf32>
    tpu.vector_store %arg12[%c0_57, %c0_58], %97 {strides = array<i32>} : memref<2x2xf32, #tpu.memory_space<vmem>>, vector<2x2xf32>,
    return
  }
}

</mosaic_0001>

<bundles_post_ra>
// kernel: han_forward.2
= control target key start
LH: loop header
LB: loop body
LE: loop exit
PB: predicated region body
PF: predicated region fallthrough
CT: control target
= control target key end

     0   :  { %s2308_s21 = smov 0   ;;  %s2310_s22 = smov 0   ;;  %s2888_s0 = inlined_call_operand.vmem [shape: s8[3,128,128], index: 0, kind: input, shape index: {}]   ;;  %s2889_s1 = inlined_call_operand.vmem [shape: f32[3,128,16], index: 1, kind: input, shape index: {}]   ;;  %s2890_s2 = inlined_call_operand.vmem [shape: f32[3,16,16], index: 2, kind: input, shape index: {}]   ;;  %s2891_s3 = inlined_call_operand.vmem [shape: f32[3,2,8], index: 3, kind: input, shape index: {}]   ;;  %s2892_s4 = inlined_call_operand.vmem [shape: f32[3,2,8], index: 4, kind: input, shape index: {}]   ;;  %s2893_s5 = inlined_call_operand.vmem [shape: f32[3,1,16], index: 5, kind: input, shape index: {}]   ;;  %s2894_s6 = inlined_call_operand.vmem [shape: f32[3,128,16], index: 6, kind: output, shape index: {}]  }
   0x1   :  { %2899 = sst [smem:[#allocation5_spill]] %s2888_s0  ;;  %s2312_s23 = smov 0  }
   0x2   :  { %s2314_s24 = smov 0   ;;  %s2316_s25 = smov 0  }
   0x3 LB: > { %s25_s26 = sadd.s32 1, %s2258_s23  ;;  %s28_s27 = sadd.s32 1, %s2262_s24  ;;  %s2266_s25 = sphi %s2316_s25, %s16_s25   ;;  %s2262_s24 = sphi %s2314_s24, %s2929_s24   ;;  %s2258_s23 = sphi %s2312_s23, %s2928_s23   ;;  %s2254_s22 = sphi %s2310_s22, %s2927_s22   ;;  %s2250_s21 = sphi %s2308_s21, %s2926_s21  }
   0x4   : > { %p26_p0 = scmp.ge.s32.totalorder %s25_s26, 2  ;;  %p1698_p1 = scmp.ge.s32.totalorder %s2266_s25, 1 }
   0x5   : > { %p279_p2 = scmp.lt.s32.totalorder %s2266_s25, 7 }
   0x6   : > { %s2931_s26 = smov (%p26_p0, %s25_s26), 0  ;;  %s2933_s27 = smov (!%p26_p0, %s28_s27), %s2262_s24 }
   0x7   : > { %2900 = sst [smem:[#allocation3_spill]] %s2931_s26  ;;  %p280_p3 = pnand %p1698_p1, %p279_p2 }
   0x8   : > { %p30_p4 = scmp.ge.s32.totalorder %s2933_s27, 3  ;;  %s1699_s28 = sshll.u32 (!%p280_p3), %s2250_s21, 1 }
   0x9   : > { %283 = sbr.rel (%p280_p3) target bundleno = 1903 (0x76f), region = 44  ;;  %p339_p5 = scmp.lt.s32.totalorder (!%p280_p3), %s2254_s22, 2 }
   0xa   : > { %s2935_s27 = smov (%p30_p4, %s2933_s27), 0  ;;  %p341_p6 = scmp.lt.s32.totalorder (!%p280_p3), %s1699_s28, 3 }
   0xb   : > { %2901 = sst [smem:[#allocation4_spill]] %s2935_s27  ;;  %s1708_s29 = sshll.u32 (!%p280_p3), %s2250_s21, 3 }
   0xc   : > { %s2902_s0 = sld [smem:[#allocation5_spill]] (!%p280_p3)  ;;  %p372_p7 = scmp.lt.s32.totalorder (!%p280_p3), %s1708_s29, 15 }
   0xd   : > { %p1711_p8 = scmp.ne.s32.totalorder (!%p280_p3), %s2250_s21, 0 }
  0x10   : > { %s2937_s22 = smov (!%p339_p5, %s2254_s22), 2  ;;  %s2939_s28 = smov (!%p341_p6, %s1699_s28), 3 }
  0x11   : > { %s1700_s30 = sshll.u32 %s2937_s22, 2  ;;  %s1776_s7 = sshll.u32 %s2937_s22, 7  ;;  %vm411_vm0 = vcmask (!%p1711_p8), 130048  }
  0x12   : > { %s344_s8 = sadd.s32 %s1700_s30, %s2939_s28  ;;  %s2349_s11 = scalar_lea.vmem %s2889_s1, %s1776_s7 }
  0x13   : > { %s1701_s12 = sshll.u32 %s344_s8, 3  ;;  %s1777_s13 = sshll.u32 %s2937_s22, 4  ;;  %v384_v2 = vld [vmem:[%s2349_s11] sm:$0xff] (!%p1711_p8)  ;;  %v385_v4 = vld [vmem:[%s2349_s11 + $0x8] sm:$0xff] (!%p1711_p8)  ;;  %v386_v9 = vld [vmem:[%s2349_s11 + $0x10] sm:$0xff] (!%p1711_p8) }
  0x14   : > { %s2355_s16 = scalar_lea.vmem %s2902_s0, %s1701_s12  ;;  %s357_s19 = scalar_lea.vmem %s2890_s2, %s1777_s13  ;;  %v392_v5 = vld [vmem:[%s2349_s11 + $0x40] sm:$0xff] (!%p1711_p8)  ;;  %v393_v6 = vld [vmem:[%s2349_s11 + $0x48] sm:$0xff] (!%p1711_p8)  ;;  %v400_v7 = vpack.c.bf16 (!%p1711_p8), %v385_v4, %v384_v2  ;;  %v387_v10 = vld [vmem:[%s2349_s11 + $0x18] sm:$0xff] (!%p1711_p8) }
  0x15   : > { %s1706_s20 = sshll.u32 %s2937_s22, 1  ;;  %s368_s28 = scalar_lea.vmem %s2893_s5, %s2937_s22  ;;  %v408_v0 = vld [vmem:[%s357_s19] sm:$0xff] (!%p1711_p8)  ;;  %v409_v1 = vld [vmem:[%s357_s19 + $0x8] sm:$0xff] (!%p1711_p8)  ;;  %v404_v8 = vpack.c.bf16 (!%p1711_p8), %v393_v6, %v392_v5  ;;  %v394_v11 = vld [vmem:[%s2349_s11 + $0x50] sm:$0xff] (!%p1711_p8)  ;;  %v401_v12 = vpack.c.bf16 (!%p1711_p8), %v387_v10, %v386_v9 }
  0x16   : > { %s2368_s7 = scalar_lea.vmem %s2891_s3, %s1706_s20  ;;  %s2373_s14 = scalar_lea.vmem %s2892_s4, %s1706_s20  ;;  %v410_v3 = vpack.c.bf16 (!%p1711_p8), %v409_v1, %v408_v0  ;;  %v395_v13 = vld [vmem:[%s2349_s11 + $0x58] sm:$0xff] (!%p1711_p8)  ;;  %v388_v14 = vld [vmem:[%s2349_s11 + $0x20] sm:$0xff] (!%p1711_p8)  ;;  %v389_v15 = vld [vmem:[%s2349_s11 + $0x28] sm:$0xff] (!%p1711_p8)  ;;  %1847 = vmatprep.mubr.msk.bf16.mxu0 (!%p1711_p8), %vm411_vm0, %v400_v7 }
  0x17   : > { %s2941_s29 = smov (!%p372_p7, %s1708_s29), 15  ;;  %383 = sbr.rel (%p1711_p8) target bundleno = 252 (0xfc), region = 48 }
  0x18   : > { %s375_s12 = sadd.s32 %s1777_s13, %s2941_s29  ;;  %1845 = vmatprep.subr.bf16.mxu0 (!%p1711_p8), %v410_v3  ;;  %2045 = vmatprep.subr.bf16.mxu1 (!%p1711_p8), %v410_v3  ;;  %v405_v16 = vpack.c.bf16 (!%p1711_p8), %v395_v13, %v394_v11  ;;  %v402_v17 = vpack.c.bf16 (!%p1711_p8), %v389_v15, %v388_v14  ;;  %v396_v18 = vld [vmem:[%s2349_s11 + $0x60] sm:$0xff] (!%p1711_p8)  ;;  %v397_v19 = vld [vmem:[%s2349_s11 + $0x68] sm:$0xff] (!%p1711_p8)  ;;  %v390_v21 = vld [vmem:[%s2349_s11 + $0x30] sm:$0xff] (!%p1711_p8) }
  0x19   : > { %s1710_s15 = sshll.u32 %s375_s12, 3  ;;  %1846 = vmatpush3.bf16.msra.mxu0 (!%p1711_p8), %v410_v3  ;;  %2046 = vmatpush3.bf16.msra.mxu1 (!%p1711_p8), %v410_v3  ;;  %v406_v20 = vpack.c.bf16 (!%p1711_p8), %v397_v19, %v396_v18  ;;  %v391_v22 = vld [vmem:[%s2349_s11 + $0x38] sm:$0xff] (!%p1711_p8)  ;;  %v398_v23 = vld [vmem:[%s2349_s11 + $0x70] sm:$0xff] (!%p1711_p8) }
  0x1a   : > { %s2378_s0 = scalar_lea.vmem %s2894_s6, %s1710_s15  ;;  %1855 = vmatprep.mubr.msk.bf16.mxu1 (!%p1711_p8), %vm411_vm0, %v404_v8  ;;  %v399_v24 = vld [vmem:[%s2349_s11 + $0x78] sm:$0xff] (!%p1711_p8)  ;;  %v403_v25 = vpack.c.bf16 (!%p1711_p8), %v391_v22, %v390_v21 }
  0x1b   : > { %v407_v26 = vpack.c.bf16 (!%p1711_p8), %v399_v24, %v398_v23 }
  0x1c   : > { %1848 = vmatmul.mubr.msk.bf16.vlgmr.msra.gmra.mrb[0].mxu0 (!%p1711_p8), %vm411_vm0, %v401_v12  ;;  %1856 = vmatmul.mubr.msk.bf16.vlgmr.msra.gmra.mrb[0].mxu1 (!%p1711_p8), %vm411_vm0, %v405_v16 }
  0x1d   : > { %1851 = vmatprep.mubr.msk.bf16.mxu0 (!%p1711_p8), %vm411_vm0, %v402_v17  ;;  %1859 = vmatprep.mubr.msk.bf16.mxu1 (!%p1711_p8), %vm411_vm0, %v406_v20 }
  0x24   : > { %1852 = vmatmul.mubr.msk.bf16.gmra.mrb[4].mxu0 %vm411_vm0, %v403_v25  ;;  %1860 = vmatmul.mubr.msk.bf16.gmra.mrb[4].mxu1 %vm411_vm0, %v407_v26 }
  0xef   : > { %v1849_v27 = vpop.f32.mrb[0].mxu0  ;;  %v1857_v28 = vpop.f32.mrb[0].mxu1 }
  0xf0   : > { %535 = vst.msk [vmem:[#allocation2 + $0x10] sm:$0xff] %vm411_vm0, %v1849_v27  ;;  %543 = vst.msk [vmem:[#allocation2 + $0x50] sm:$0xff] %vm411_vm0, %v1857_v28  ;;  %v470_v29 = vpop.f32.mrb[1].mxu0  ;;  %v502_v30 = vpop.f32.mrb[1].mxu1 }
  0xf1   : > { %533 = vst.msk [vmem:[#allocation2] sm:$0xff] %vm411_vm0, %v470_v29  ;;  %541 = vst.msk [vmem:[#allocation2 + $0x40] sm:$0xff] %vm411_vm0, %v502_v30  ;;  %v1850_v31 = vpop.f32.mrb[2].mxu0  ;;  %v1858_v32 = vpop.f32.mrb[2].mxu1 }
  0xf2   : > { %536 = vst.msk [vmem:[#allocation2 + $0x18] sm:$0xff] %vm411_vm0, %v1850_v31  ;;  %544 = vst.msk [vmem:[#allocation2 + $0x58] sm:$0xff] %vm411_vm0, %v1858_v32  ;;  %v473_v33 = vpop.f32.mrb[3].mxu0  ;;  %v505_v34 = vpop.f32.mrb[3].mxu1 }
  0xf3   : > { %534 = vst.msk [vmem:[#allocation2 + $0x8] sm:$0xff] %vm411_vm0, %v473_v33  ;;  %542 = vst.msk [vmem:[#allocation2 + $0x48] sm:$0xff] %vm411_vm0, %v505_v34 }
  0xf7   : > { %v1853_v35 = vpop.f32.mrb[4].mxu0  ;;  %v1861_v36 = vpop.f32.mrb[4].mxu1 }
  0xf8   : > { %539 = vst.msk [vmem:[#allocation2 + $0x30] sm:$0xff] %vm411_vm0, %v1853_v35  ;;  %547 = vst.msk [vmem:[#allocation2 + $0x70] sm:$0xff] %vm411_vm0, %v1861_v36  ;;  %v486_v37 = vpop.f32.mrb[5].mxu0  ;;  %v518_v38 = vpop.f32.mrb[5].mxu1 }
  0xf9   : > { %537 = vst.msk [vmem:[#allocation2 + $0x20] sm:$0xff] %vm411_vm0, %v486_v37  ;;  %545 = vst.msk [vmem:[#allocation2 + $0x60] sm:$0xff] %vm411_vm0, %v518_v38  ;;  %v1854_v39 = vpop.f32.mrb[6].mxu0  ;;  %v1862_v40 = vpop.f32.mrb[6].mxu1 }
  0xfa   : > { %540 = vst.msk [vmem:[#allocation2 + $0x38] sm:$0xff] %vm411_vm0, %v1854_v39  ;;  %548 = vst.msk [vmem:[#allocation2 + $0x78] sm:$0xff] %vm411_vm0, %v1862_v40  ;;  %v489_v41 = vpop.f32.mrb[7].mxu0  ;;  %v521_v42 = vpop.f32.mrb[7].mxu1 }
  0xfb   : > { %538 = vst.msk [vmem:[#allocation2 + $0x28] sm:$0xff] %vm411_vm0, %v489_v41  ;;  %546 = vst.msk [vmem:[#allocation2 + $0x68] sm:$0xff] %vm411_vm0, %v521_v42 }
  0xfc PF: > { %v2421_v43 = vld [vmem:[#allocation2] sm:$0xff]  ;;  %v2423_v44 = vld [vmem:[#allocation2 + $0x8] sm:$0xff]  ;;  %vm616_vm1 = vcmask 64512   ;;  %v2425_v45 = vld [vmem:[#allocation2 + $0x10] sm:$0xff]  ;;  %v2897_v46 = vmov 0.0|0.0   ;;  %s1720_s26 = sshll.u32 %s2250_s21, 6  ;;  %v762_v34 = vlaneseq }
  0xfd   : > { %1981 = vmatprep.subr.bf16.mxu0 %v2897_v46  ;;  %v2430_v47 = vpack.c.bf16 %v2423_v44, %v2421_v43  ;;  %vm2434_vm2 = vmpackc.low %vm616_vm1, %vm616_vm1  ;;  %v2438_v49 = vld [vmem:[#allocation2 + $0x18] sm:$0xff]  ;;  %vm2269_vm3 = vmmov 0   ;;  %v2896_v50 = vmov 0.0   ;;  %s592_s21 = scalar_lea.vmem [#allocation2], %s1720_s26  ;;  %v1721_v56 = vld [vmem:[%s2373_s14] ss:$0 sm:$0xff] }
  0xfe   : > { %1895 = vmatprep.mubr.msk.f32.mxu0 %vm2269_vm3, %v2896_v50  ;;  %v2448_v51 = vpack.c.bf16 %v2438_v49, %v2425_v45  ;;  %v2494_v7 = vld [vmem:[#allocation2 + $0x40] sm:$0xff]  ;;  %v2496_v8 = vld [vmem:[#allocation2 + $0x48] sm:$0xff]  ;;  %v2517_v20 = vld [vmem:[#allocation2 + $0x50] sm:$0xff]  ;;  %v2578_v36 = vshrl.u32 %v762_v34, 7  ;;  %s2271_s27 = smov 120   ;;  %s2272_s29 = smov 8  }
  0xff   : > { %1984 = vmatpush3.bf16.xpose.msk.msra.mxu0 %vm2434_vm2, %v2430_v47  ;;  %1898 = vmatprep.subr.bf16.mxu1 %v2430_v47  ;;  %v2457_v54 = vld [vmem:[#allocation2 + $0x30] sm:$0xff]  ;;  %v2511_v15 = vpack.c.bf16 %v2496_v8, %v2494_v7  ;;  %v2519_v21 = vld [vmem:[#allocation2 + $0x58] sm:$0xff]  ;;  %v602_v31 = vld [vmem:[%s2368_s7] sm:$0x1] }
 0x100   : > { %1985 = vmatprep.subr.bf16.mxu0 %v2897_v46  ;;  %v2452_v52 = vld [vmem:[#allocation2 + $0x20] sm:$0xff]  ;;  %1899 = vmatpush3.bf16.msra.mxu1 %v2430_v47  ;;  %v2528_v22 = vpack.c.bf16 %v2519_v21, %v2517_v20  ;;  %v2543_v28 = vld [vmem:[#allocation2 + $0x70] sm:$0xff]  ;;  %v2895_v39 = vsub.s32 0, %v2578_v36 }
 0x101   : > { %1900 = vmatprep.subr.bf16.mxu1 %v2448_v51  ;;  %v2469_v59 = vld [vmem:[#allocation2 + $0x38] sm:$0xff]  ;;  %v2533_v25 = vld [vmem:[#allocation2 + $0x60] sm:$0xff] }
 0x102   : > { %v2454_v53 = vld [vmem:[#allocation2 + $0x28] sm:$0xff]  ;;  %v2460_v55 = vld [vmem:[%s592_s21 + $0x10] sm:$0xff]  ;;  %v2463_v57 = vld [vmem:[%s592_s21] sm:$0xff]  ;;  %v2489_v6 = vpack.c.bf16 %v2469_v59, %v2457_v54 }
 0x103   : > { %v2467_v58 = vpack.c.bf16 %v2454_v53, %v2452_v52  ;;  %v610_v60 = vmul.f32 %v1721_v56, %v2460_v55  ;;  %v608_v61 = vmul.f32 %v1721_v56, %v2463_v57  ;;  %v2473_v62 = vld [vmem:[%s592_s21 + $0x18] sm:$0xff]  ;;  %v2475_v63 = vld [vmem:[%s592_s21 + $0x8] sm:$0xff]  ;;  %v2481_v3 = vld [vmem:[%s592_s21 + $0x20] sm:$0xff] }
 0x104   : > { %v611_v0 = vmul.f32 %v1721_v56, %v2473_v62  ;;  %v609_v1 = vmul.f32 %v1721_v56, %v2475_v63  ;;  %v2479_v2 = vld [vmem:[%s592_s21 + $0x28] sm:$0xff]  ;;  %1901 = vmatpush3.bf16.msra.mxu1 %v2448_v51  ;;  %v612_v12 = vmul.f32 %v1721_v56, %v2481_v3  ;;  %v2503_v13 = vld [vmem:[%s592_s21 + $0x38] sm:$0xff]  ;;  %v2505_v14 = vld [vmem:[%s592_s21 + $0x30] sm:$0xff] }
 0x105   : > { %v623_v4 = vsel %vm616_vm1, %v610_v60, 0.0  ;;  %v617_v5 = vsel %vm616_vm1, %v608_v61, 0.0  ;;  %1902 = vmatprep.subr.bf16.mxu1 %v2467_v58  ;;  %v613_v11 = vmul.f32 %v1721_v56, %v2479_v2  ;;  %v615_v18 = vmul.f32 %v1721_v56, %v2503_v13  ;;  %v2535_v26 = vld [vmem:[#allocation2 + $0x68] sm:$0xff]  ;;  %v2545_v29 = vld [vmem:[#allocation2 + $0x78] sm:$0xff]  ;;  %v549_v38 = vld [vmem:[%s2355_s16] sm:$0xff] }
 0x106   : > { %624 = vadd.xlane.f32.xlu1 %v623_v4  ;;  %618 = vadd.xlane.f32.xlu0 %v617_v5  ;;  %v626_v9 = vsel %vm616_vm1, %v611_v0, 0.0  ;;  %v620_v10 = vsel %vm616_vm1, %v609_v1, 0.0  ;;  %v629_v17 = vsel %vm616_vm1, %v612_v12, 0.0  ;;  %v614_v19 = vmul.f32 %v1721_v56, %v2505_v14  ;;  %v550_v4 = vld [vmem:[%s2355_s16 + $0x8] sm:$0xff] }
 0x107   : > { %1988 = vmatpush3.bf16.xpose.msk.msra.mxu0 %vm2434_vm2, %v2448_v51  ;;  %v632_v16 = vsel %vm616_vm1, %v613_v11, 0.0  ;;  %v638_v23 = vsel %vm616_vm1, %v615_v18, 0.0  ;;  %v2541_v27 = vpack.c.bf16 %v2535_v26, %v2533_v25  ;;  %v2554_v30 = vpack.c.bf16 %v2545_v29, %v2543_v28 }
 0x108   : > { %1989 = vmatprep.subr.bf16.mxu0 %v2897_v46  ;;  %1903 = vmatpush3.bf16.msra.mxu1 %v2467_v58  ;;  %v635_v24 = vsel %vm616_vm1, %v614_v19, 0.0  ;;  %v552_v41 = vunpack.c.1.s8 %v549_v38  ;;  %v551_v0 = vunpack.c.0.s8 %v549_v38  ;;  %v554_v1 = vunpack.c.3.s8 %v549_v38 }
 0x109   : > { %1904 = vmatprep.subr.bf16.mxu1 %v2489_v6  ;;  %v553_v12 = vunpack.c.2.s8 %v549_v38 }
 0x10a   : > { %627 = vadd.xlane.f32.xlu1 %v626_v9  ;;  %621 = vadd.xlane.f32.xlu0 %v620_v10  ;;  %vm2585_vm4 = vcmp.gt.s32.totalorder %v552_v41, 0  ;;  %vm2589_vm6 = vcmp.gt.s32.totalorder %v551_v0, 0  ;;  %vm2593_vm8 = vcmp.gt.s32.totalorder %v554_v1, 0 }
 0x10b   : > { %vm2597_vm11 = vcmp.gt.s32.totalorder %v553_v12, 0  ;;  %v558_v12 = vunpack.c.3.s8 %v550_v4 }
 0x10c   : > { %1905 = vmatpush3.bf16.msra.mxu1 %v2489_v6 }
 0x10d   : > { %1906 = vmatprep.subr.bf16.mxu1 %v2511_v15 }
 0x10e   : > { %633 = vadd.xlane.f32.xlu1 %v632_v16  ;;  %630 = vadd.xlane.f32.xlu0 %v629_v17  ;;  %v556_v17 = vunpack.c.1.s8 %v550_v4 }
 0x10f   : > { %1992 = vmatpush3.bf16.xpose.msk.msra.mxu0 %vm2434_vm2, %v2467_v58 }
 0x110   : > { %1993 = vmatprep.subr.bf16.mxu0 %v2897_v46  ;;  %1907 = vmatpush3.bf16.msra.mxu1 %v2511_v15  ;;  %vm2605_vm14 = vcmp.gt.s32.totalorder %v556_v17, 0 }
 0x111   : > { %1908 = vmatprep.subr.bf16.mxu1 %v2528_v22 }
 0x112   : > { %639 = vadd.xlane.f32.xlu1 %v638_v23  ;;  %636 = vadd.xlane.f32.xlu0 %v635_v24 }
 0x114   : > { %1909 = vmatpush3.bf16.msra.mxu1 %v2528_v22 }
 0x115   : > { %1910 = vmatprep.subr.bf16.mxu1 %v2541_v27 }
 0x117   : > { %1996 = vmatpush3.bf16.xpose.msk.msra.mxu0 %vm2434_vm2, %v2489_v6 }
 0x118   : > { %1997 = vmatprep.subr.bf16.mxu0 %v2897_v46  ;;  %1911 = vmatpush3.bf16.msra.mxu1 %v2541_v27 }
 0x119   : > { %1912 = vmatprep.subr.bf16.mxu1 %v2554_v30 }
 0x11c   : > { %1913 = vmatpush3.bf16.msra.mxu1 %v2554_v30 }
 0x11d   : > { %2013 = vmatprep.subr.bf16.mxu1 %v2897_v46 }
 0x11f   : > { %2000 = vmatpush3.bf16.xpose.msk.msra.mxu0 %vm2434_vm2, %v2511_v15 }
 0x120   : > { %2001 = vmatprep.subr.bf16.mxu0 %v2897_v46 }
 0x127   : > { %2004 = vmatpush3.bf16.xpose.msk.msra.mxu0 %vm2434_vm2, %v2528_v22 }
 0x128   : > { %2005 = vmatprep.subr.bf16.mxu0 %v2897_v46 }
 0x12f   : > { %2008 = vmatpush3.bf16.xpose.msk.msra.mxu0 %vm2434_vm2, %v2541_v27 }
 0x130   : > { %2009 = vmatprep.subr.bf16.mxu0 %v2897_v46 }
 0x137   : > { %2012 = vmatpush3.bf16.xpose.msk.msra.mxu0 %vm2434_vm2, %v2554_v30 }
 0x13e   : > { %1896 = vmatmul.mubr.msk.f32.vlgmr.msra.gmra.mrb[0].mxu0 %vm616_vm1, %v602_v31 }
 0x193   : > { %v625_v32 = vpop.xlane.xlu1 %624  ;;  %v619_v33 = vpop.xlane.xlu0 %618 }
 0x197   : > { %v628_v35 = vpop.xlane.xlu1 %627  ;;  %v622_v37 = vpop.xlane.xlu0 %621 }
 0x19b   : > { %v634_v40 = vpop.xlane.xlu1 %633  ;;  %v631_v42 = vpop.xlane.xlu0 %630 }
 0x19f   : > { %v640_v23 = vpop.xlane.xlu1 %639  ;;  %v637_v24 = vpop.xlane.xlu0 %636 }
 0x211   : > { %v758_v56 = vpop.f32.mrb[0].mxu0 }
 0x212   : > { %v765_v60 = vrot.slane %v758_v56, %v2895_v39  ;;  %v1897_v61 = vpop.f32.mrb[1].mxu0 }
 0x213   : > { %v555_v61 = vunpack.c.0.s8 %v550_v4 }
 0x214   : > { %v767_v9 = vadd.f32 %v765_v60, %v622_v37  ;;  %v766_v10 = vadd.f32 %v765_v60, %v619_v33  ;;  %v769_v11 = vadd.f32 %v765_v60, %v628_v35  ;;  %v768_v16 = vadd.f32 %v765_v60, %v625_v32 }
 0x215   : > { %v771_v37 = vadd.f32 %v765_v60, %v634_v40  ;;  %v770_v33 = vadd.f32 %v765_v60, %v631_v42  ;;  %v773_v0 = vadd.f32 %v765_v60, %v640_v23  ;;  %v772_v1 = vadd.f32 %v765_v60, %v637_v24 }
 0x216   : > { %vm775_vm5 = vcmp.ge.f32.partialorder %v767_v9, 0.0  ;;  %vm774_vm7 = vcmp.ge.f32.partialorder %v766_v10, 0.0  ;;  %v783_v31 = vmul.f32 0.2, %v767_v9  ;;  %v782_v34 = vmul.f32 0.2, %v766_v10 }
 0x217   : > { %vm777_vm9 = vcmp.ge.f32.partialorder %v769_v11, 0.0  ;;  %v785_v35 = vmul.f32 0.2, %v769_v11  ;;  %vm776_vm10 = vcmp.ge.f32.partialorder %v768_v16, 0.0  ;;  %v784_v32 = vmul.f32 0.2, %v768_v16 }
 0x218   : > { %v791_v38 = vsel %vm775_vm5, %v767_v9, %v783_v31  ;;  %v790_v41 = vsel %vm774_vm7, %v766_v10, %v782_v34  ;;  %v787_v46 = vmul.f32 0.2, %v771_v37  ;;  %v786_v9 = vmul.f32 0.2, %v770_v33 }
 0x219   : > { %v799_v39 = vsel %vm2585_vm4, %v791_v38, -1e+30  ;;  %v798_v40 = vsel %vm2589_vm6, %v790_v41, -1e+30  ;;  %v793_v42 = vsel %vm777_vm9, %v769_v11, %v785_v35  ;;  %v792_v50 = vsel %vm776_vm10, %v768_v16, %v784_v32 }
 0x21a   : > { %808 = vmax.xlane.f32.xlu1 %v799_v39  ;;  %806 = vmax.xlane.f32.xlu0 %v798_v40  ;;  %vm779_vm12 = vcmp.ge.f32.partialorder %v771_v37, 0.0  ;;  %vm778_vm13 = vcmp.ge.f32.partialorder %v770_v33, 0.0  ;;  %v801_v60 = vsel %vm2593_vm8, %v793_v42, -1e+30  ;;  %v800_v23 = vsel %vm2597_vm11, %v792_v50, -1e+30 }
 0x21b   : > { %vm2613_vm15 = vcmp.gt.s32.totalorder %v555_v61, 0  ;;  %v557_v11 = vunpack.c.2.s8 %v550_v4  ;;  %v789_v16 = vmul.f32 0.2, %v773_v0  ;;  %v788_v31 = vmul.f32 0.2, %v772_v1 }
 0x21c   : > { %v795_v17 = vsel %vm779_vm12, %v771_v37, %v787_v46  ;;  %v794_v34 = vsel %vm778_vm13, %v770_v33, %v786_v9  ;;  %vm781_vm0 = vcmp.ge.f32.partialorder %v773_v0, 0.0  ;;  %vm780_vm5 = vcmp.ge.f32.partialorder %v772_v1, 0.0 }
 0x21d   : > { %v2619_v35 = vsel %vm2605_vm14, %v795_v17, -1e+30  ;;  %v802_v50 = vsel %vm2613_vm15, %v794_v34, -1e+30  ;;  %vm2624_vm7 = vcmp.gt.s32.totalorder %v558_v12, 0  ;;  %v797_v32 = vsel %vm781_vm0, %v773_v0, %v789_v16 }
 0x21e   : > { %812 = vmax.xlane.f32.xlu1 %v801_v60  ;;  %810 = vmax.xlane.f32.xlu0 %v800_v23  ;;  %vm2628_vm9 = vcmp.gt.s32.totalorder %v557_v11, 0  ;;  %v796_v37 = vsel %vm780_vm5, %v772_v1, %v788_v31  ;;  %v805_v33 = vsel %vm2624_vm7, %v797_v32, -1e+30 }
 0x21f   : > { %v804_v38 = vsel %vm2628_vm9, %v796_v37, -1e+30 }
 0x222   : > { %816 = vmax.xlane.f32.xlu1 %v2619_v35  ;;  %814 = vmax.xlane.f32.xlu0 %v802_v50 }
 0x226   : > { %820 = vmax.xlane.f32.xlu1 %v805_v33  ;;  %818 = vmax.xlane.f32.xlu0 %v804_v38 }
 0x2a7   : > { %v809_v41 = vpop.xlane.xlu1 %808  ;;  %v807_v61 = vpop.xlane.xlu0 %806 }
 0x2a8   : > { %v823_v42 = vsub.f32 %v799_v39, %v809_v41  ;;  %v822_v9 = vsub.f32 %v798_v40, %v807_v61  ;;  %v2097_v39 = vpack.i.bf16 %v2438_v49, %v2425_v45  ;;  %v2102_v40 = vpack.i.bf16 %v2454_v53, %v2452_v52 }
 0x2aa   : > { %v832_v12 = vmul.f32 1.442695, %v823_v42  ;;  %v830_v17 = vmul.f32 1.442695, %v822_v9 }
 0x2ab   : > { %v811_v0 = vpop.xlane.xlu0 %810  ;;  %v813_v32 = vpop.xlane.xlu1 %812 }
 0x2ac   : > { %2132 = vpow2.f32 %v832_v12  ;;  %v824_v11 = vsub.f32 %v800_v23, %v811_v0  ;;  %v2092_v23 = vpack.i.bf16 %v2423_v44, %v2421_v43  ;;  %v825_v41 = vsub.f32 %v801_v60, %v813_v32 }
 0x2ad   : > { %2134 = vpow2.f32 %v830_v17 }
 0x2ae   : > { %v834_v16 = vmul.f32 1.442695, %v824_v11  ;;  %v836_v45 = vmul.f32 1.442695, %v825_v41  ;;  %v1748_v11 = vld [vmem:[%s2373_s14 + $0x1] ss:$0 sm:$0xff] }
 0x2af   : > { %v815_v37 = vpop.xlane.xlu0 %814  ;;  %v817_v61 = vpop.xlane.xlu1 %816 }
 0x2b0   : > { %2136 = vpow2.f32 %v834_v16  ;;  %v826_v42 = vsub.f32 %v802_v50, %v815_v37  ;;  %v827_v16 = vsub.f32 %v2619_v35, %v817_v61 }
 0x2b1   : > { %2138 = vpow2.f32 %v836_v45 }
 0x2b2   : > { %v838_v49 = vmul.f32 1.442695, %v826_v42 }
 0x2b3   : > { %v819_v9 = vpop.xlane.xlu0 %818  ;;  %v821_v17 = vpop.xlane.xlu1 %820 }
 0x2b4   : > { %v828_v12 = vsub.f32 %v804_v38, %v819_v9  ;;  %2140 = vpow2.f32 %v838_v49  ;;  %v829_v52 = vsub.f32 %v805_v33, %v821_v17  ;;  %v2107_v33 = vpack.i.bf16 %v2469_v59, %v2457_v54 }
 0x2b5   : > { %v2112_v38 = vpack.i.bf16 %v2496_v8, %v2494_v7  ;;  %v2117_v54 = vpack.i.bf16 %v2519_v21, %v2517_v20  ;;  %v2122_v59 = vpack.i.bf16 %v2535_v26, %v2533_v25  ;;  %v2127_v7 = vpack.i.bf16 %v2545_v29, %v2543_v28 }
 0x2b6   : > { %v2636_v1 = vpop.eup %2132  ;;  %v842_v53 = vmul.f32 1.442695, %v828_v12  ;;  %v844_v0 = vmul.f32 1.442695, %v829_v52 }
 0x2b7   : > { %v2638_v31 = vpop.eup %2134  ;;  %848 = vadd.xlane.f32.xlu1 %v2636_v1 }
 0x2b8   : > { %846 = vadd.xlane.f32.xlu0 %v2638_v31  ;;  %2142 = vpow2.f32 %v842_v53 }
 0x2b9   : > { %2144 = vpow2.f32 %v844_v0 }
 0x2ba   : > { %v2642_v34 = vpop.eup %2136 }
 0x2bb   : > { %v2139_v43 = vpop.eup %2138 }
 0x2bc   : > { %850 = vadd.xlane.f32.xlu0 %v2642_v34 }
 0x2be   : > { %v2654_v44 = vpop.eup %2140 }
 0x2c2   : > { %v2657_v60 = vpop.eup %2142 }
 0x2c3   : > { %v2660_v50 = vpop.eup %2144 }
 0x2c8   : > { %2098 = vrot.lane.b32.xlu1 %v2097_v39, %s2271_s27  ;;  %v840_v39 = vmul.f32 1.442695, %v827_v16 }
 0x2ca   : > { %2146 = vpow2.f32 %v840_v39 }
 0x2cc   : > { %2103 = vrot.lane.b32.xlu1 %v2102_v40, %s2271_s27 }
 0x2d2   : > { %2093 = vrot.lane.b32.xlu0 %v2092_v23, %s2271_s27 }
 0x2d4   : > { %v2672_v40 = vpop.eup %2146 }
 0x2f0   : > { %852 = vadd.xlane.f32.xlu1 %v2139_v43 }
 0x2f1   : > { %854 = vadd.xlane.f32.xlu0 %v2654_v44 }
 0x2f5   : > { %858 = vadd.xlane.f32.xlu0 %v2657_v60 }
 0x2f9   : > { %860 = vadd.xlane.f32.xlu0 %v2660_v50 }
 0x301   : > { %2108 = vrot.lane.b32.xlu1 %v2107_v33, %s2271_s27 }
 0x30f   : > { %2113 = vrot.lane.b32.xlu0 %v2112_v38, %s2271_s27 }
 0x313   : > { %1024 = vrot.lane.b32.xlu0 %v1748_v11, %s2272_s29 }
 0x325   : > { %856 = vadd.xlane.f32.xlu1 %v2672_v40 }
 0x336   : > { %2118 = vrot.lane.b32.xlu1 %v2117_v54, %s2271_s27 }
 0x33a   : > { %2123 = vrot.lane.b32.xlu1 %v2122_v59, %s2271_s27 }
 0x33e   : > { %2128 = vrot.lane.b32.xlu1 %v2127_v7, %s2271_s27 }
 0x344   : > { %v849_v8 = vpop.xlane.xlu1 %848 }
 0x345   : > { %v863_v35 = vmax.f32 %v849_v8, 1e-30  ;;  %v847_v23 = vpop.xlane.xlu0 %846 }
 0x346   : > { %v862_v32 = vmax.f32 %v847_v23, 1e-30 }
 0x347   : > { %2148 = vrcp.f32 %v863_v35  ;;  %v2921_v35 = vmov 0.0|0.0  }
 0x348   : > { %2150 = vrcp.f32 %v862_v32  ;;  %v2099_v26 = vpop.permute.xlu1 %2098 }
 0x349   : > { %v851_v61 = vpop.xlane.xlu0 %850  ;;  %v2100_v8 = vunpack.i.l.bf16 %v2099_v26 }
 0x34a   : > { %v864_v28 = vmax.f32 %v851_v61, 1e-30 }
 0x34c   : > { %v2104_v42 = vpop.permute.xlu1 %2103  ;;  %2152 = vrcp.f32 %v864_v28 }
 0x34d   : > { %v2094_v29 = vpop.permute.xlu0 %2093  ;;  %v2105_v32 = vunpack.i.l.bf16 %v2104_v42 }
 0x34e   : > { %v2096_v0 = vunpack.i.h.bf16 %v2094_v29 }
 0x351   : > { %v2149_v37 = vpop.eup %2148 }
 0x352   : > { %v2151_v20 = vpop.eup %2150  ;;  %v879_v21 = vmul.f32 %v2149_v37, %v2636_v1  ;;  %v2095_v1 = vunpack.i.l.bf16 %v2094_v29 }
 0x353   : > { %v878_v41 = vmul.f32 %v2151_v20, %v2638_v31 }
 0x354   : > { %v2014_v16 = vpack.c.bf16 %v2096_v0, %v2095_v1 }
 0x355   : > { %v886_v25 = vpack.c.bf16 %v879_v21, %v878_v41 }
 0x356   : > { %v2153_v52 = vpop.eup %2152 }
 0x357   : > { %1914 = vmatprep.mubr.bf16.mxu1 %v886_v25  ;;  %v880_v31 = vmul.f32 %v2153_v52, %v2642_v34 }
 0x37d   : > { %v853_v9 = vpop.xlane.xlu1 %852 }
 0x37e   : > { %v865_v45 = vmax.f32 %v853_v9, 1e-30  ;;  %v855_v49 = vpop.xlane.xlu0 %854 }
 0x37f   : > { %v866_v61 = vmax.f32 %v855_v49, 1e-30 }
 0x380   : > { %2154 = vrcp.f32 %v865_v45 }
 0x382   : > { %v859_v12 = vpop.xlane.xlu0 %858 }
 0x386   : > { %v861_v17 = vpop.xlane.xlu0 %860 }
 0x387   : > { %v869_v25 = vmax.f32 %v861_v17, 1e-30 }
 0x389   : > { %2156 = vrcp.f32 %v869_v25 }
 0x38a   : > { %v2155_v53 = vpop.eup %2154  ;;  %v2114_v33 = vpop.permute.xlu0 %2113  ;;  %2158 = vrcp.f32 %v866_v61 }
 0x38b   : > { %v881_v38 = vmul.f32 %v2155_v53, %v2139_v43  ;;  %v2101_v43 = vunpack.i.h.bf16 %v2099_v26  ;;  %v2115_v41 = vunpack.i.l.bf16 %v2114_v33 }
 0x38d   : > { %v887_v11 = vpack.c.bf16 %v881_v38, %v880_v31 }
 0x38e   : > { %v1025_v39 = vpop.permute.xlu0 %1024 }
 0x38f   : > { %1915 = vmatmul.mubr.bf16.vlgmr.msra.gmra.mrb[0].mxu1 %v887_v11  ;;  %v1028_v54 = vmul.f32 %v1025_v39, %v2475_v63  ;;  %v1027_v59 = vmul.f32 %v1025_v39, %v2463_v57  ;;  %v1029_v7 = vmul.f32 %v1025_v39, %v2460_v55  ;;  %v1030_v34 = vmul.f32 %v1025_v39, %v2473_v62 }
 0x390   : > { %2016 = vmatpush3.bf16.xpose.msk.msra.mxu1 %vm2434_vm2, %v2014_v16  ;;  %v1032_v57 = vmul.f32 %v1025_v39, %v2479_v2  ;;  %v2018_v63 = vpack.c.bf16 %v2101_v43, %v2100_v8  ;;  %v1031_v23 = vmul.f32 %v1025_v39, %v2481_v3  ;;  %v1034_v55 = vmul.f32 %v1025_v39, %v2503_v13  ;;  %v2109_v3 = vpop.permute.xlu1 %2108 }
 0x391   : > { %1045 = vrot.lane.b32.xlu0 %v1028_v54, %s2271_s27  ;;  %1043 = vrot.lane.b32.xlu1 %v1027_v59, %s2271_s27  ;;  %v2106_v62 = vunpack.i.h.bf16 %v2104_v42  ;;  %v1033_v37 = vmul.f32 %v1025_v39, %v2505_v14  ;;  %v2111_v20 = vunpack.i.h.bf16 %v2109_v3  ;;  %v2110_v21 = vunpack.i.l.bf16 %v2109_v3 }
 0x392   : > { %2017 = vmatprep.subr.bf16.mxu1 %v2921_v35  ;;  %v2116_v14 = vunpack.i.h.bf16 %v2114_v33  ;;  %v868_v42 = vmax.f32 %v859_v12, 1e-30 }
 0x393   : > { %v2022_v2 = vpack.c.bf16 %v2106_v62, %v2105_v32  ;;  %v2026_v13 = vpack.c.bf16 %v2111_v20, %v2110_v21  ;;  %v2157_v17 = vpop.eup %2156 }
 0x394   : > { %v2030_v26 = vpack.c.bf16 %v2116_v14, %v2115_v41  ;;  %2160 = vrcp.f32 %v868_v42  ;;  %v2159_v1 = vpop.eup %2158  ;;  %v885_v11 = vmul.f32 %v2157_v17, %v2660_v50  ;;  %v2922_v50 = vmov 0.0   ;;  %v2747_v41 = vld [vmem:[%s368_s28] ss:$0 sm:$0xff] }
 0x395   : > { %1047 = vrot.lane.b32.xlu1 %v1029_v7, %s2271_s27  ;;  %1049 = vrot.lane.b32.xlu0 %v1030_v34, %s2271_s27  ;;  %v882_v16 = vmul.f32 %v2159_v1, %v2654_v44 }
 0x398   : > { %2020 = vmatpush3.bf16.xpose.msk.msra.mxu1 %vm2434_vm2, %v2018_v63 }
 0x399   : > { %2021 = vmatprep.subr.bf16.mxu1 %v2921_v35  ;;  %1053 = vrot.lane.b32.xlu0 %v1032_v57, %s2271_s27 }
 0x39a   : > { %1051 = vrot.lane.b32.xlu1 %v1031_v23, %s2271_s27 }
 0x39d   : > { %1057 = vrot.lane.b32.xlu0 %v1034_v55, %s2271_s27 }
 0x39e   : > { %1055 = vrot.lane.b32.xlu1 %v1033_v37, %s2271_s27  ;;  %v2161_v33 = vpop.eup %2160 }
 0x39f   : > { %v884_v59 = vmul.f32 %v2161_v33, %v2657_v60 }
 0x3a0   : > { %2024 = vmatpush3.bf16.xpose.msk.msra.mxu1 %vm2434_vm2, %v2022_v2 }
 0x3a1   : > { %2025 = vmatprep.subr.bf16.mxu1 %v2921_v35  ;;  %v889_v34 = vpack.c.bf16 %v885_v11, %v884_v59 }
 0x3a8   : > { %2028 = vmatpush3.bf16.xpose.msk.msra.mxu1 %vm2434_vm2, %v2026_v13 }
 0x3a9   : > { %2029 = vmatprep.subr.bf16.mxu1 %v2921_v35 }
 0x3b0   : > { %2032 = vmatpush3.bf16.xpose.msk.msra.mxu1 %vm2434_vm2, %v2030_v26 }
 0x3b1   : > { %2033 = vmatprep.subr.bf16.mxu1 %v2921_v35 }
 0x3b2   : > { %v857_v28 = vpop.xlane.xlu1 %856 }
 0x3b3   : > { %v867_v29 = vmax.f32 %v857_v28, 1e-30 }
 0x3b5   : > { %2162 = vrcp.f32 %v867_v29 }
 0x3b6   : > { %v2119_v9 = vpop.permute.xlu1 %2118 }
 0x3b7   : > { %v2121_v45 = vunpack.i.h.bf16 %v2119_v9  ;;  %v2120_v52 = vunpack.i.l.bf16 %v2119_v9 }
 0x3b9   : > { %v2034_v53 = vpack.c.bf16 %v2121_v45, %v2120_v52 }
 0x3ba   : > { %v2124_v0 = vpop.permute.xlu1 %2123 }
 0x3bb   : > { %2036 = vmatpush3.bf16.xpose.msk.msra.mxu1 %vm2434_vm2, %v2034_v53  ;;  %v2126_v49 = vunpack.i.h.bf16 %v2124_v0  ;;  %v2125_v12 = vunpack.i.l.bf16 %v2124_v0 }
 0x3bc   : > { %2037 = vmatprep.subr.bf16.mxu1 %v2921_v35 }
 0x3bd   : > { %v2038_v38 = vpack.c.bf16 %v2126_v49, %v2125_v12 }
 0x3be   : > { %v2129_v54 = vpop.permute.xlu1 %2128 }
 0x3bf   : > { %v2163_v31 = vpop.eup %2162  ;;  %v2131_v43 = vunpack.i.h.bf16 %v2129_v54  ;;  %v2130_v8 = vunpack.i.l.bf16 %v2129_v54 }
 0x3c0   : > { %v883_v39 = vmul.f32 %v2163_v31, %v2672_v40  ;;  %v1017_v40 = vld [vmem:[%s2368_s7 + $0x1] sm:$0x1] }
 0x3c1   : > { %v2042_v44 = vpack.c.bf16 %v2131_v43, %v2130_v8 }
 0x3c2   : > { %v888_v7 = vpack.c.bf16 %v883_v39, %v882_v16 }
 0x3c3   : > { %2040 = vmatpush3.bf16.xpose.msk.msra.mxu1 %vm2434_vm2, %v2038_v38 }
 0x3c4   : > { %1918 = vmatprep.mubr.bf16.mxu1 %v888_v7  ;;  %2041 = vmatprep.subr.bf16.mxu1 %v2921_v35 }
 0x3c5   : > { %1919 = vmatmul.mubr.bf16.gmra.mrb[4].mxu1 %v889_v34 }
 0x3c6   : > { %1954 = vmatprep.mubr.msk.f32.mxu1 %vm2269_vm3, %v2922_v50 }
 0x3cb   : > { %2044 = vmatpush3.bf16.xpose.msk.msra.mxu1 %vm2434_vm2, %v2042_v44 }
 0x3d2   : > { %1955 = vmatmul.mubr.msk.f32.vlgmr.msra.gmra.mrb[8].mxu1 %vm616_vm1, %v1017_v40 }
 0x403   : > { %v1046_v60 = vpop.permute.xlu0 %1045  ;;  %v1044_v57 = vpop.permute.xlu1 %1043 }
 0x404   : > { %v1070_v63 = vsel %vm616_vm1, %v1046_v60, 0.0  ;;  %v1067_v23 = vsel %vm616_vm1, %v1044_v57, 0.0 }
 0x405   : > { %1071 = vadd.xlane.f32.xlu0 %v1070_v63  ;;  %1068 = vadd.xlane.f32.xlu1 %v1067_v23 }
 0x407   : > { %v1048_v35 = vpop.permute.xlu1 %1047  ;;  %v1050_v55 = vpop.permute.xlu0 %1049 }
 0x408   : > { %v1073_v62 = vsel %vm616_vm1, %v1048_v35, 0.0  ;;  %v1076_v48 = vsel %vm616_vm1, %v1050_v55, 0.0 }
 0x409   : > { %1074 = vadd.xlane.f32.xlu0 %v1073_v62 }
 0x40b   : > { %v1054_v32 = vpop.permute.xlu0 %1053 }
 0x40c   : > { %v1052_v37 = vpop.permute.xlu1 %1051  ;;  %v1082_v3 = vsel %vm616_vm1, %v1054_v32, 0.0 }
 0x40d   : > { %1077 = vadd.xlane.f32.xlu0 %v1076_v48  ;;  %v1079_v2 = vsel %vm616_vm1, %v1052_v37, 0.0 }
 0x40e   : > { %1080 = vadd.xlane.f32.xlu1 %v1079_v2 }
 0x40f   : > { %v1058_v20 = vpop.permute.xlu0 %1057 }
 0x410   : > { %v1056_v21 = vpop.permute.xlu1 %1055  ;;  %v1088_v14 = vsel %vm616_vm1, %v1058_v20, 0.0 }
 0x411   : > { %1083 = vadd.xlane.f32.xlu0 %v1082_v3  ;;  %v1085_v13 = vsel %vm616_vm1, %v1056_v21, 0.0 }
 0x412   : > { %1086 = vadd.xlane.f32.xlu1 %v1085_v13 }
 0x415   : > { %1089 = vadd.xlane.f32.xlu0 %v1088_v14 }
 0x462   : > { %v1916_v25 = vpop.f32.mrb[0].mxu1 }
 0x463   : > { %v939_v26 = vadd.f32 %v1916_v25, %v2747_v41  ;;  %v930_v61 = vpop.f32.mrb[1].mxu1 }
 0x464   : > { %v931_v42 = vadd.f32 %v2747_v41, %v930_v61  ;;  %v1917_v28 = vpop.f32.mrb[2].mxu1 }
 0x465   : > { %v971_v29 = vmin.f32 %v939_v26, 0.0  ;;  %v942_v9 = vadd.f32 %v1917_v28, %v2747_v41  ;;  %v933_v45 = vpop.f32.mrb[3].mxu1  ;;  %vm963_vm2 = vcmp.gt.f32.partialorder %v939_v26, 0.0 }
 0x466   : > { %v969_v52 = vmin.f32 %v931_v42, 0.0  ;;  %v934_v53 = vadd.f32 %v2747_v41, %v933_v45  ;;  %vm961_vm3 = vcmp.gt.f32.partialorder %v931_v42, 0.0 }
 0x467   : > { %v981_v0 = vmul.f32 1.442695, %v971_v29  ;;  %v972_v49 = vmin.f32 %v942_v9, 0.0  ;;  %vm964_vm10 = vcmp.gt.f32.partialorder %v942_v9, 0.0  ;;  %v2923_v29 = vsub.s32 0, %v2578_v36 }
 0x468   : > { %v977_v12 = vmul.f32 1.442695, %v969_v52  ;;  %v970_v17 = vmin.f32 %v934_v53, 0.0  ;;  %vm962_vm12 = vcmp.gt.f32.partialorder %v934_v53, 0.0 }
 0x469   : > { %2164 = vpow2.f32 %v981_v0  ;;  %v983_v1 = vmul.f32 1.442695, %v972_v49 }
 0x46a   : > { %2166 = vpow2.f32 %v977_v12  ;;  %v979_v33 = vmul.f32 1.442695, %v970_v17 }
 0x46b   : > { %2168 = vpow2.f32 %v983_v1 }
 0x46c   : > { %2170 = vpow2.f32 %v979_v33 }
 0x473   : > { %v2165_v31 = vpop.eup %2164 }
 0x474   : > { %v2167_v38 = vpop.eup %2166  ;;  %v1742_v11 = vadd.f32 -1.0, %v2165_v31 }
 0x475   : > { %v2169_v16 = vpop.eup %2168  ;;  %v1740_v39 = vadd.f32 -1.0, %v2167_v38 }
 0x476   : > { %v2171_v54 = vpop.eup %2170  ;;  %v1743_v59 = vadd.f32 -1.0, %v2169_v16  ;;  %v1003_v7 = vsel %vm963_vm2, %v939_v26, %v1742_v11 }
 0x477   : > { %v1741_v34 = vadd.f32 -1.0, %v2171_v54  ;;  %1011 = vst.msk [vmem:[%s2378_s0 + $0x10] sm:$0xff] %vm616_vm1, %v1003_v7  ;;  %v1001_v43 = vsel %vm961_vm3, %v931_v42, %v1740_v39 }
 0x478   : > { %1009 = vst.msk [vmem:[%s2378_s0] sm:$0xff] %vm616_vm1, %v1001_v43  ;;  %v1004_v8 = vsel %vm964_vm10, %v942_v9, %v1743_v59 }
 0x479   : > { %1012 = vst.msk [vmem:[%s2378_s0 + $0x18] sm:$0xff] %vm616_vm1, %v1004_v8  ;;  %v1002_v50 = vsel %vm962_vm12, %v934_v53, %v1741_v34 }
 0x47a   : > { %1010 = vst.msk [vmem:[%s2378_s0 + $0x8] sm:$0xff] %vm616_vm1, %v1002_v50 }
 0x492   : > { %v1072_v44 = vpop.xlane.xlu0 %1071  ;;  %v1069_v37 = vpop.xlane.xlu1 %1068 }
 0x496   : > { %v1075_v40 = vpop.xlane.xlu0 %1074 }
 0x498   : > { %v1920_v60 = vpop.f32.mrb[4].mxu1 }
 0x499   : > { %v2762_v57 = vadd.f32 %v1920_v60, %v2747_v41  ;;  %v946_v63 = vpop.f32.mrb[5].mxu1 }
 0x49a   : > { %v2765_v23 = vadd.f32 %v2747_v41, %v946_v63  ;;  %v1921_v35 = vpop.f32.mrb[6].mxu1  ;;  %v1078_v55 = vpop.xlane.xlu0 %1077 }
 0x49b   : > { %v975_v62 = vmin.f32 %v2762_v57, 0.0  ;;  %v2769_v48 = vadd.f32 %v1921_v35, %v2747_v41  ;;  %v949_v32 = vpop.f32.mrb[7].mxu1  ;;  %v1081_v42 = vpop.xlane.xlu1 %1080  ;;  %vm967_vm12 = vcmp.gt.f32.partialorder %v2762_v57, 0.0 }
 0x49c   : > { %v973_v2 = vmin.f32 %v2765_v23, 0.0  ;;  %v2773_v3 = vadd.f32 %v2747_v41, %v949_v32 }
 0x49d   : > { %v989_v20 = vmul.f32 1.442695, %v975_v62  ;;  %v976_v21 = vmin.f32 %v2769_v48, 0.0 }
 0x49e   : > { %v985_v13 = vmul.f32 1.442695, %v973_v2  ;;  %v974_v14 = vmin.f32 %v2773_v3, 0.0  ;;  %v1084_v61 = vpop.xlane.xlu0 %1083 }
 0x49f   : > { %2172 = vpow2.f32 %v989_v20  ;;  %v991_v25 = vmul.f32 1.442695, %v976_v21  ;;  %v1087_v53 = vpop.xlane.xlu1 %1086 }
 0x4a0   : > { %2174 = vpow2.f32 %v985_v13  ;;  %v987_v26 = vmul.f32 1.442695, %v974_v14 }
 0x4a1   : > { %2176 = vpow2.f32 %v991_v25 }
 0x4a2   : > { %2178 = vpow2.f32 %v987_v26  ;;  %v1090_v52 = vpop.xlane.xlu0 %1089 }
 0x4a5   : > { %v1224_v28 = vpop.f32.mrb[8].mxu1 }
 0x4a6   : > { %v1231_v9 = vrot.slane %v1224_v28, %v2923_v29  ;;  %v1956_v45 = vpop.f32.mrb[9].mxu1 }
 0x4a8   : > { %v1233_v0 = vadd.f32 %v1231_v9, %v1072_v44  ;;  %v1232_v49 = vadd.f32 %v1231_v9, %v1069_v37  ;;  %v1239_v17 = vadd.f32 %v1231_v9, %v1090_v52  ;;  %v1235_v1 = vadd.f32 %v1231_v9, %v1078_v55 }
 0x4a9   : > { %v2173_v12 = vpop.eup %2172  ;;  %v1234_v33 = vadd.f32 %v1231_v9, %v1075_v40  ;;  %v1238_v38 = vadd.f32 %v1231_v9, %v1087_v53  ;;  %v1237_v11 = vadd.f32 %v1231_v9, %v1084_v61  ;;  %v1236_v16 = vadd.f32 %v1231_v9, %v1081_v42 }
 0x4aa   : > { %v2175_v31 = vpop.eup %2174  ;;  %vm1241_vm13 = vcmp.ge.f32.partialorder %v1233_v0, 0.0  ;;  %v1746_v54 = vadd.f32 -1.0, %v2173_v12  ;;  %v1249_v59 = vmul.f32 0.2, %v1233_v0  ;;  %vm1240_vm0 = vcmp.ge.f32.partialorder %v1232_v49, 0.0 }
 0x4ab   : > { %v2177_v39 = vpop.eup %2176  ;;  %v1248_v36 = vmul.f32 0.2, %v1232_v49  ;;  %v1744_v34 = vadd.f32 -1.0, %v2175_v31  ;;  %vm1243_vm5 = vcmp.ge.f32.partialorder %v1235_v1, 0.0  ;;  %v1251_v43 = vmul.f32 0.2, %v1235_v1 }
 0x4ac   : > { %v2179_v7 = vpop.eup %2178  ;;  %vm1242_vm2 = vcmp.ge.f32.partialorder %v1234_v33, 0.0  ;;  %v1747_v8 = vadd.f32 -1.0, %v2177_v39  ;;  %v1257_v50 = vsel %vm1241_vm13, %v1233_v0, %v1249_v59  ;;  %v1250_v60 = vmul.f32 0.2, %v1234_v33 }
 0x4ad   : > { %v1256_v44 = vsel %vm1240_vm0, %v1232_v49, %v1248_v36  ;;  %v1745_v40 = vadd.f32 -1.0, %v2179_v7  ;;  %v1265_v63 = vsel %vm2585_vm4, %v1257_v50, -1e+30  ;;  %v1259_v55 = vsel %vm1243_vm5, %v1235_v1, %v1251_v43 }
 0x4ae   : > { %v1264_v35 = vsel %vm2589_vm6, %v1256_v44, -1e+30  ;;  %1274 = vmax.xlane.f32.xlu0 %v1265_v63  ;;  %v1258_v62 = vsel %vm1242_vm2, %v1234_v33, %v1250_v60  ;;  %vm1245_vm3 = vcmp.ge.f32.partialorder %v1237_v11, 0.0  ;;  %v1253_v32 = vmul.f32 0.2, %v1237_v11 }
 0x4af   : > { %1272 = vmax.xlane.f32.xlu1 %v1264_v35  ;;  %vm1244_vm10 = vcmp.ge.f32.partialorder %v1236_v16, 0.0  ;;  %vm965_vm13 = vcmp.gt.f32.partialorder %v2765_v23, 0.0  ;;  %v1252_v37 = vmul.f32 0.2, %v1236_v16  ;;  %vm968_vm0 = vcmp.gt.f32.partialorder %v2769_v48, 0.0 }
 0x4b0   : > { %vm966_vm4 = vcmp.gt.f32.partialorder %v2773_v3, 0.0  ;;  %v1255_v5 = vmul.f32 0.2, %v1239_v17  ;;  %v1005_v18 = vsel %vm965_vm13, %v2765_v23, %v1744_v34  ;;  %v1267_v2 = vsel %vm2593_vm8, %v1259_v55, -1e+30 }
 0x4b1   : > { %v1266_v20 = vsel %vm2597_vm11, %v1258_v62, -1e+30  ;;  %v1261_v21 = vsel %vm1245_vm3, %v1237_v11, %v1253_v32  ;;  %v1260_v13 = vsel %vm1244_vm10, %v1236_v16, %v1252_v37  ;;  %1013 = vst.msk [vmem:[%s2378_s0 + $0x20] sm:$0xff] %vm616_vm1, %v1005_v18  ;;  %v1254_v14 = vmul.f32 0.2, %v1238_v38 }
 0x4b2   : > { %1278 = vmax.xlane.f32.xlu0 %v1267_v2  ;;  %v1007_v25 = vsel %vm967_vm12, %v2762_v57, %v1746_v54  ;;  %v1006_v26 = vsel %vm966_vm4, %v2773_v3, %v1745_v40  ;;  %v1008_v23 = vsel %vm968_vm0, %v2769_v48, %v1747_v8  ;;  %vm1247_vm6 = vcmp.ge.f32.partialorder %v1239_v17, 0.0 }
 0x4b3   : > { %1276 = vmax.xlane.f32.xlu1 %v1266_v20  ;;  %vm1246_vm5 = vcmp.ge.f32.partialorder %v1238_v38, 0.0  ;;  %1015 = vst.msk [vmem:[%s2378_s0 + $0x30] sm:$0xff] %vm616_vm1, %v1007_v25  ;;  %1014 = vst.msk [vmem:[%s2378_s0 + $0x28] sm:$0xff] %vm616_vm1, %v1006_v26  ;;  %v1269_v19 = vsel %vm2605_vm14, %v1261_v21, -1e+30  ;;  %v1263_v57 = vsel %vm1247_vm6, %v1239_v17, %v1255_v5  ;;  %vm1536_vm3 = vcmask 130112  }
 0x4b4   : > { %1016 = vst.msk [vmem:[%s2378_s0 + $0x38] sm:$0xff] %vm616_vm1, %v1008_v23  ;;  %v1268_v56 = vsel %vm2613_vm15, %v1260_v13, -1e+30  ;;  %v1262_v3 = vsel %vm1246_vm5, %v1238_v38, %v1254_v14  ;;  %v1271_v48 = vsel %vm2624_vm7, %v1263_v57, -1e+30 }
 0x4b5   : > { %v1270_v61 = vsel %vm2628_vm9, %v1262_v3, -1e+30 }
 0x4b6   : > { %1282 = vmax.xlane.f32.xlu0 %v1269_v19 }
 0x4b7   : > { %1280 = vmax.xlane.f32.xlu1 %v1268_v56 }
 0x4ba   : > { %1286 = vmax.xlane.f32.xlu0 %v1271_v48 }
 0x4bb   : > { %1284 = vmax.xlane.f32.xlu1 %v1270_v61 }
 0x4cc   : > { %1364 = vrot.lane.b32.xlu1 %v2430_v47, %s2271_s27 }
 0x4d0   : > { %1368 = vrot.lane.b32.xlu1 %v2467_v58, %s2271_s27  ;;  %1366 = vrot.lane.b32.xlu0 %v2448_v51, %s2271_s27 }
 0x4d4   : > { %1370 = vrot.lane.b32.xlu1 %v2489_v6, %s2271_s27 }
 0x53b   : > { %v1275_v10 = vpop.xlane.xlu0 %1274 }
 0x53c   : > { %v1273_v24 = vpop.xlane.xlu1 %1272  ;;  %v1289_v4 = vsub.f32 %v1265_v63, %v1275_v10 }
 0x53d   : > { %v1288_v42 = vsub.f32 %v1264_v35, %v1273_v24 }
 0x53e   : > { %v1298_v46 = vmul.f32 1.442695, %v1289_v4 }
 0x53f   : > { %v1296_v28 = vmul.f32 1.442695, %v1288_v42  ;;  %v1279_v29 = vpop.xlane.xlu0 %1278 }
 0x540   : > { %v1277_v9 = vpop.xlane.xlu1 %1276  ;;  %2180 = vpow2.f32 %v1298_v46  ;;  %v1291_v45 = vsub.f32 %v1267_v2, %v1279_v29 }
 0x541   : > { %v1290_v47 = vsub.f32 %v1266_v20, %v1277_v9  ;;  %2182 = vpow2.f32 %v1296_v28 }
 0x542   : > { %v1302_v0 = vmul.f32 1.442695, %v1291_v45 }
 0x543   : > { %v1300_v52 = vmul.f32 1.442695, %v1290_v47  ;;  %v1283_v58 = vpop.xlane.xlu0 %1282 }
 0x544   : > { %v1281_v53 = vpop.xlane.xlu1 %1280  ;;  %v1293_v49 = vsub.f32 %v1269_v19, %v1283_v58 }
 0x545   : > { %v1292_v51 = vsub.f32 %v1268_v56, %v1281_v53  ;;  %2184 = vpow2.f32 %v1300_v52 }
 0x546   : > { %2186 = vpow2.f32 %v1302_v0  ;;  %v1306_v1 = vmul.f32 1.442695, %v1293_v49 }
 0x547   : > { %v1304_v6 = vmul.f32 1.442695, %v1292_v51  ;;  %v1287_v12 = vpop.xlane.xlu0 %1286 }
 0x548   : > { %v1285_v17 = vpop.xlane.xlu1 %1284  ;;  %v1295_v39 = vsub.f32 %v1271_v48, %v1287_v12 }
 0x549   : > { %2188 = vpow2.f32 %v1304_v6  ;;  %v1294_v33 = vsub.f32 %v1270_v61, %v1285_v17 }
 0x54a   : > { %v2181_v31 = vpop.eup %2180  ;;  %2190 = vpow2.f32 %v1306_v1  ;;  %v1310_v7 = vmul.f32 1.442695, %v1295_v39 }
 0x54b   : > { %v2183_v38 = vpop.eup %2182  ;;  %1314 = vadd.xlane.f32.xlu0 %v2181_v31  ;;  %v1367_v16 = vpop.permute.xlu0 %1366  ;;  %v1308_v54 = vmul.f32 1.442695, %v1294_v33 }
 0x54c   : > { %v1365_v11 = vpop.permute.xlu1 %1364  ;;  %1312 = vadd.xlane.f32.xlu1 %v2183_v38 }
 0x54d   : > { %1957 = vmatprep.subr.bf16.mxu0 %v1365_v11  ;;  %2192 = vpow2.f32 %v1308_v54 }
 0x54e   : > { %1958 = vmatpush3.bf16.msra.mxu0 %v1365_v11  ;;  %2194 = vpow2.f32 %v1310_v7 }
 0x54f   : > { %1959 = vmatprep.subr.bf16.mxu0 %v1367_v16  ;;  %v2819_v59 = vpop.eup %2184 }
 0x550   : > { %v1369_v36 = vpop.permute.xlu1 %1368  ;;  %1316 = vadd.xlane.f32.xlu0 %v2819_v59  ;;  %v2822_v34 = vpop.eup %2186 }
 0x552   : > { %1960 = vmatpush3.bf16.msra.mxu0 %v1367_v16 }
 0x553   : > { %1961 = vmatprep.subr.bf16.mxu0 %v1369_v36  ;;  %v2824_v43 = vpop.eup %2188 }
 0x554   : > { %v1371_v8 = vpop.permute.xlu1 %1370  ;;  %1318 = vadd.xlane.f32.xlu0 %v2822_v34  ;;  %1320 = vadd.xlane.f32.xlu1 %v2824_v43  ;;  %v2191_v50 = vpop.eup %2190 }
 0x556   : > { %1962 = vmatpush3.bf16.msra.mxu0 %v1369_v36 }
 0x557   : > { %1963 = vmatprep.subr.bf16.mxu0 %v1371_v8  ;;  %v2828_v44 = vpop.eup %2192 }
 0x558   : > { %1322 = vadd.xlane.f32.xlu0 %v2191_v50  ;;  %v2831_v60 = vpop.eup %2194 }
 0x55a   : > { %1964 = vmatpush3.bf16.msra.mxu0 %v1371_v8 }
 0x55c   : > { %1324 = vadd.xlane.f32.xlu0 %v2828_v44 }
 0x560   : > { %1326 = vadd.xlane.f32.xlu0 %v2831_v60 }
 0x565   : > { %1374 = vrot.lane.b32.xlu1 %v2528_v22, %s2271_s27 }
 0x569   : > { %1376 = vrot.lane.b32.xlu1 %v2541_v27, %s2271_s27 }
 0x56d   : > { %1378 = vrot.lane.b32.xlu1 %v2554_v30, %s2271_s27 }
 0x571   : > { %1388 = vrot.lane.b32.xlu1 %v2747_v41, %s2271_s27 }
 0x576   : > { %1372 = vrot.lane.b32.xlu0 %v2511_v15, %s2271_s27 }
 0x5d8   : > { %v1315_v40 = vpop.xlane.xlu0 %1314 }
 0x5d9   : > { %v1329_v63 = vmax.f32 %v1315_v40, 1e-30  ;;  %v1313_v35 = vpop.xlane.xlu1 %1312 }
 0x5da   : > { %v1328_v55 = vmax.f32 %v1313_v35, 1e-30 }
 0x5db   : > { %2196 = vrcp.f32 %v1329_v63 }
 0x5dc   : > { %2198 = vrcp.f32 %v1328_v55 }
 0x5dd   : > { %v1317_v62 = vpop.xlane.xlu0 %1316 }
 0x5de   : > { %v1330_v15 = vmax.f32 %v1317_v62, 1e-30 }
 0x5e1   : > { %v1319_v22 = vpop.xlane.xlu0 %1318  ;;  %v1321_v30 = vpop.xlane.xlu1 %1320 }
 0x5e2   : > { %v1331_v41 = vmax.f32 %v1319_v22, 1e-30  ;;  %v1332_v25 = vmax.f32 %v1321_v30, 1e-30 }
 0x5e4   : > { %2200 = vrcp.f32 %v1331_v41 }
 0x5e5   : > { %v2197_v32 = vpop.eup %2196  ;;  %v1323_v37 = vpop.xlane.xlu0 %1322 }
 0x5e6   : > { %v2199_v27 = vpop.eup %2198  ;;  %v1345_v5 = vmul.f32 %v2197_v32, %v2181_v31  ;;  %v1333_v21 = vmax.f32 %v1323_v37, 1e-30  ;;  %v1375_v14 = vpop.permute.xlu1 %1374 }
 0x5e7   : > { %v1344_v18 = vmul.f32 %v2199_v27, %v2183_v38 }
 0x5e8   : > { %2202 = vrcp.f32 %v1333_v21 }
 0x5e9   : > { %v1325_v2 = vpop.xlane.xlu0 %1324  ;;  %v1352_v20 = vpack.c.bf16 %v1345_v5, %v1344_v18  ;;  %2204 = vrcp.f32 %v1330_v15 }
 0x5ea   : > { %2206 = vrcp.f32 %v1332_v25  ;;  %v1377_v19 = vpop.permute.xlu1 %1376  ;;  %v1334_v56 = vmax.f32 %v1325_v2, 1e-30 }
 0x5eb   : > { %1973 = vmatprep.mubr.bf16.mxu0 %v1352_v20 }
 0x5ed   : > { %v1327_v13 = vpop.xlane.xlu0 %1326 }
 0x5ee   : > { %v1335_v23 = vmax.f32 %v1327_v13, 1e-30  ;;  %v2201_v57 = vpop.eup %2200  ;;  %v1379_v3 = vpop.permute.xlu1 %1378 }
 0x5ef   : > { %v1347_v24 = vmul.f32 %v2201_v57, %v2822_v34 }
 0x5f0   : > { %2208 = vrcp.f32 %v1335_v23 }
 0x5f1   : > { %v1373_v26 = vpop.permute.xlu0 %1372  ;;  %2210 = vrcp.f32 %v1334_v56 }
 0x5f2   : > { %1965 = vmatprep.subr.bf16.mxu0 %v1373_v26  ;;  %v2203_v48 = vpop.eup %2202  ;;  %v1389_v53 = vpop.permute.xlu1 %1388 }
 0x5f3   : > { %1966 = vmatpush3.bf16.msra.mxu0 %v1373_v26  ;;  %v2205_v61 = vpop.eup %2204  ;;  %v1349_v4 = vmul.f32 %v2203_v48, %v2191_v50 }
 0x5f4   : > { %1967 = vmatprep.subr.bf16.mxu0 %v1375_v14  ;;  %v2207_v10 = vpop.eup %2206  ;;  %v1346_v42 = vmul.f32 %v2205_v61, %v2819_v59 }
 0x5f5   : > { %v1348_v46 = vmul.f32 %v2207_v10, %v2824_v43 }
 0x5f6   : > { %v1353_v28 = vpack.c.bf16 %v1347_v24, %v1346_v42 }
 0x5f7   : > { %1968 = vmatpush3.bf16.msra.mxu0 %v1375_v14  ;;  %v1354_v9 = vpack.c.bf16 %v1349_v4, %v1348_v46 }
 0x5f8   : > { %1969 = vmatprep.subr.bf16.mxu0 %v1377_v19 }
 0x5fa   : > { %v2209_v29 = vpop.eup %2208 }
 0x5fb   : > { %1970 = vmatpush3.bf16.msra.mxu0 %v1377_v19  ;;  %v2211_v45 = vpop.eup %2210  ;;  %v1351_v47 = vmul.f32 %v2209_v29, %v2831_v60 }
 0x5fc   : > { %1971 = vmatprep.subr.bf16.mxu0 %v1379_v3  ;;  %v1350_v52 = vmul.f32 %v2211_v45, %v2828_v44 }
 0x5fe   : > { %v1355_v58 = vpack.c.bf16 %v1351_v47, %v1350_v52 }
 0x5ff   : > { %1972 = vmatpush3.bf16.msra.mxu0 %v1379_v3 }
 0x602   : > { %1974 = vmatmul.mubr.bf16.vlgmr.msra.gmra.mrb[4].mxu0 %v1353_v28 }
 0x603   : > { %1977 = vmatprep.mubr.bf16.mxu0 %v1354_v9 }
 0x60a   : > { %1978 = vmatmul.mubr.bf16.gmra.mrb[8].mxu0 %v1355_v58 }
 0x6d5   : > { %v1975_v0 = vpop.f32.mrb[4].mxu0 }
 0x6d6   : > { %v1425_v51 = vpop.f32.mrb[5].mxu0  ;;  %v1434_v49 = vadd.f32 %v1975_v0, %v1389_v53 }
 0x6d7   : > { %v1426_v6 = vadd.f32 %v1425_v51, %v1389_v53  ;;  %v1976_v12 = vpop.f32.mrb[6].mxu0 }
 0x6d8   : > { %v1437_v17 = vadd.f32 %v1976_v12, %v1389_v53  ;;  %v1428_v1 = vpop.f32.mrb[7].mxu0  ;;  %v1466_v33 = vmin.f32 %v1434_v49, 0.0  ;;  %vm1458_vm1 = vcmp.gt.f32.partialorder %v1434_v49, 0.0 }
 0x6d9   : > { %v1464_v31 = vmin.f32 %v1426_v6, 0.0  ;;  %v1429_v38 = vadd.f32 %v1428_v1, %v1389_v53  ;;  %vm1456_vm8 = vcmp.gt.f32.partialorder %v1426_v6, 0.0 }
 0x6da   : > { %v1467_v11 = vmin.f32 %v1437_v17, 0.0  ;;  %v1476_v16 = vmul.f32 1.442695, %v1466_v33  ;;  %vm1459_vm11 = vcmp.gt.f32.partialorder %v1437_v17, 0.0 }
 0x6db   : > { %v1472_v39 = vmul.f32 1.442695, %v1464_v31  ;;  %v1465_v54 = vmin.f32 %v1429_v38, 0.0  ;;  %vm1457_vm15 = vcmp.gt.f32.partialorder %v1429_v38, 0.0 }
 0x6dc   : > { %v1478_v59 = vmul.f32 1.442695, %v1467_v11  ;;  %2212 = vpow2.f32 %v1476_v16 }
 0x6dd   : > { %2214 = vpow2.f32 %v1472_v39  ;;  %v1474_v36 = vmul.f32 1.442695, %v1465_v54  ;;  %v1979_v7 = vpop.f32.mrb[8].mxu0 }
 0x6de   : > { %2216 = vpow2.f32 %v1478_v59  ;;  %v1450_v34 = vadd.f32 %v1979_v7, %v1389_v53  ;;  %v1441_v43 = vpop.f32.mrb[9].mxu0 }
 0x6df   : > { %v1442_v8 = vadd.f32 %v1441_v43, %v1389_v53  ;;  %v1980_v50 = vpop.f32.mrb[10].mxu0  ;;  %2218 = vpow2.f32 %v1474_v36 }
 0x6e0   : > { %v1470_v44 = vmin.f32 %v1450_v34, 0.0  ;;  %v1453_v60 = vadd.f32 %v1980_v50, %v1389_v53  ;;  %v1444_v40 = vpop.f32.mrb[11].mxu0  ;;  %vm1462_vm7 = vcmp.gt.f32.partialorder %v1450_v34, 0.0 }
 0x6e1   : > { %v1468_v63 = vmin.f32 %v1442_v8, 0.0  ;;  %v1445_v35 = vadd.f32 %v1444_v40, %v1389_v53  ;;  %vm1460_vm14 = vcmp.gt.f32.partialorder %v1442_v8, 0.0 }
 0x6e2   : > { %v1484_v55 = vmul.f32 1.442695, %v1470_v44  ;;  %v1471_v62 = vmin.f32 %v1453_v60, 0.0  ;;  %vm1463_vm2 = vcmp.gt.f32.partialorder %v1453_v60, 0.0 }
 0x6e3   : > { %v1480_v22 = vmul.f32 1.442695, %v1468_v63  ;;  %v1469_v32 = vmin.f32 %v1445_v35, 0.0  ;;  %vm1461_vm9 = vcmp.gt.f32.partialorder %v1445_v35, 0.0 }
 0x6e4   : > { %2220 = vpow2.f32 %v1484_v55  ;;  %v1486_v37 = vmul.f32 1.442695, %v1471_v62 }
 0x6e5   : > { %2222 = vpow2.f32 %v1480_v22  ;;  %v1482_v27 = vmul.f32 1.442695, %v1469_v32 }
 0x6e6   : > { %v2213_v5 = vpop.eup %2212 }
 0x6e7   : > { %v2215_v18 = vpop.eup %2214  ;;  %2224 = vpow2.f32 %v1482_v27  ;;  %v1768_v30 = vadd.f32 -1.0, %v2213_v5 }
 0x6e8   : > { %v2217_v2 = vpop.eup %2216  ;;  %v1766_v20 = vadd.f32 -1.0, %v2215_v18  ;;  %2226 = vpow2.f32 %v1486_v37 }
 0x6e9   : > { %v1498_v41 = vsel %vm1458_vm1, %v1434_v49, %v1768_v30  ;;  %v1769_v15 = vadd.f32 -1.0, %v2217_v2  ;;  %v2219_v13 = vpop.eup %2218 }
 0x6ea   : > { %1516 = vrot.lane.b32.xlu0 %v1498_v41, %s2272_s29  ;;  %v1496_v21 = vsel %vm1456_vm8, %v1426_v6, %v1766_v20  ;;  %v1767_v26 = vadd.f32 -1.0, %v2219_v13 }
 0x6eb   : > { %1512 = vrot.lane.b32.xlu1 %v1496_v21, %s2272_s29  ;;  %v1499_v25 = vsel %vm1459_vm11, %v1437_v17, %v1769_v15 }
 0x6ec   : > { %v1497_v3 = vsel %vm1457_vm15, %v1429_v38, %v1767_v26 }
 0x6ee   : > { %v2221_v14 = vpop.eup %2220 }
 0x6ef   : > { %v2223_v23 = vpop.eup %2222  ;;  %1518 = vrot.lane.b32.xlu1 %v1499_v25, %s2272_s29  ;;  %v1772_v48 = vadd.f32 -1.0, %v2221_v14 }
 0x6f0   : > { %v1770_v19 = vadd.f32 -1.0, %v2223_v23 }
 0x6f1   : > { %v2225_v56 = vpop.eup %2224  ;;  %v1502_v24 = vsel %vm1462_vm7, %v1450_v34, %v1772_v48 }
 0x6f2   : > { %v1500_v57 = vsel %vm1460_vm14, %v1442_v8, %v1770_v19  ;;  %v1771_v61 = vadd.f32 -1.0, %v2225_v56  ;;  %v2227_v10 = vpop.eup %2226 }
 0x6f3   : > { %1520 = vrot.lane.b32.xlu0 %v1500_v57, %s2272_s29  ;;  %1514 = vrot.lane.b32.xlu1 %v1497_v3, %s2272_s29  ;;  %v1773_v42 = vadd.f32 -1.0, %v2227_v10 }
 0x6f4   : > { %v1501_v4 = vsel %vm1461_vm9, %v1445_v35, %v1771_v61 }
 0x6f5   : > { %v1503_v46 = vsel %vm1463_vm2, %v1453_v60, %v1773_v42 }
 0x6f7   : > { %1524 = vrot.lane.b32.xlu0 %v1502_v24, %s2272_s29  ;;  %1522 = vrot.lane.b32.xlu1 %v1501_v4, %s2272_s29 }
 0x6fb   : > { %1526 = vrot.lane.b32.xlu1 %v1503_v46, %s2272_s29 }
 0x75c   : > { %v1517_v28 = vpop.permute.xlu0 %1516 }
 0x75d   : > { %1539 = vst.msk [vmem:[%s2378_s0 + $0x10] sm:$0xff] %vm1536_vm3, %v1517_v28  ;;  %v1513_v29 = vpop.permute.xlu1 %1512 }
 0x75e   : > { %1537 = vst.msk [vmem:[%s2378_s0] sm:$0xff] %vm1536_vm3, %v1513_v29 }
 0x761   : > { %v1519_v9 = vpop.permute.xlu1 %1518 }
 0x762   : > { %1540 = vst.msk [vmem:[%s2378_s0 + $0x18] sm:$0xff] %vm1536_vm3, %v1519_v9 }
 0x765   : > { %v1521_v45 = vpop.permute.xlu0 %1520  ;;  %v1515_v47 = vpop.permute.xlu1 %1514 }
 0x766   : > { %1541 = vst.msk [vmem:[%s2378_s0 + $0x20] sm:$0xff] %vm1536_vm3, %v1521_v45  ;;  %1538 = vst.msk [vmem:[%s2378_s0 + $0x8] sm:$0xff] %vm1536_vm3, %v1515_v47 }
 0x769   : > { %v1525_v52 = vpop.permute.xlu0 %1524  ;;  %v1523_v58 = vpop.permute.xlu1 %1522 }
 0x76a   : > { %1543 = vst.msk [vmem:[%s2378_s0 + $0x30] sm:$0xff] %vm1536_vm3, %v1525_v52  ;;  %1542 = vst.msk [vmem:[%s2378_s0 + $0x28] sm:$0xff] %vm1536_vm3, %v1523_v58 }
 0x76d   : > { %v1527_v53 = vpop.permute.xlu1 %1526 }
 0x76e   : > { %1544 = vst.msk [vmem:[%s2378_s0 + $0x38] sm:$0xff] %vm1536_vm3, %v1527_v53 }
 0x76f PF: > { %s16_s25 = sadd.s32 1, %s2266_s25   ;;  %s2924_s16 = sld [smem:[#allocation3_spill]] }
 0x770   : > { %p13_p9 = scmp.ge.s32.totalorder %s16_s25, 8   ;;  %s2925_s19 = sld [smem:[#allocation4_spill]] }
 0x771   : > { %s2926_s21 = smov %s2258_s23  ;;  %s2927_s22 = smov %s2262_s24 }
 0x772   :  { %15 = sbr.rel (!%p13_p9) target bundleno = 3 (0x3), region = 94 }
 0x775   : > { %s2928_s23 = smov %s2924_s16 }
 0x776   : > { %s2929_s24 = smov %s2925_s19 }

// kernel: han_forward.3
= control target key start
LH: loop header
LB: loop body
LE: loop exit
PB: predicated region body
PF: predicated region fallthrough
CT: control target
= control target key end

     0   :  { %vm83_vm0 = vcmask 130048   ;;  %s3667_s0 = inlined_call_operand.vmem [shape: f32[3,128,16], index: 0, kind: input, shape index: {}]   ;;  %s3668_s1 = inlined_call_operand.vmem [shape: f32[16,128], index: 1, kind: input, shape index: {}]   ;;  %s3669_s2 = inlined_call_operand.vmem [shape: f32[1,128], index: 2, kind: input, shape index: {}]   ;;  %s3670_s3 = inlined_call_operand.vmem [shape: f32[128,1], index: 3, kind: input, shape index: {}]   ;;  %s3671_s4 = inlined_call_operand.vmem [shape: f32[16,64], index: 4, kind: input, shape index: {}]   ;;  %s3672_s5 = inlined_call_operand.vmem [shape: f32[1,64], index: 5, kind: input, shape index: {}]   ;;  %s3673_s6 = inlined_call_operand.vmem [shape: f32[64,32], index: 6, kind: input, shape index: {}]   ;;  %s3674_s7 = inlined_call_operand.vmem [shape: f32[1,32], index: 7, kind: input, shape index: {}]   ;;  %s3675_s8 = inlined_call_operand.vmem [shape: f32[32,16], index: 8, kind: input, shape index: {}]   ;;  %s3676_s9 = inlined_call_operand.vmem [shape: f32[1,16], index: 9, kind: input, shape index: {}]   ;;  %s3677_s10 = inlined_call_operand.vmem [shape: f32[16,2], index: 10, kind: input, shape index: {}]   ;;  %s3678_s11 = inlined_call_operand.vmem [shape: f32[1,2], index: 11, kind: input, shape index: {}]   ;;  %s3679_s12 = inlined_call_operand.hbm [shape: f32[2,2], index: 12, kind: output, shape index: {}]  }
   0x1   :  { %v42_v0 = vld [vmem:[%s3668_s1] sm:$0xff]  ;;  %v43_v1 = vld [vmem:[%s3668_s1 + $0x8] sm:$0xff]  ;;  %v63_v5 = vld [vmem:[%s3667_s0 + $0x10] sm:$0xff] }
   0x2   :  { %v61_v2 = vld [vmem:[%s3667_s0] sm:$0xff]  ;;  %v2944_v3 = vpack.c.bf16 %v43_v1, %v42_v0  ;;  %v62_v4 = vld [vmem:[%s3667_s0 + $0x8] sm:$0xff]  ;;  %v64_v6 = vld [vmem:[%s3667_s0 + $0x18] sm:$0xff] }
   0x3   :  { %2232 = vmatprep.mubr.msk.f32.mxu0 %vm83_vm0, %v61_v2  ;;  %v65_v7 = vld [vmem:[%s3667_s0 + $0x20] sm:$0xff]  ;;  %v66_v8 = vld [vmem:[%s3667_s0 + $0x28] sm:$0xff]  ;;  %v67_v9 = vld [vmem:[%s3667_s0 + $0x30] sm:$0xff] }
   0x4   :  { %2546 = vmatprep.subr.bf16.mxu0 %v2944_v3  ;;  %v68_v10 = vld [vmem:[%s3667_s0 + $0x38] sm:$0xff]  ;;  %v69_v11 = vld [vmem:[%s3667_s0 + $0x40] sm:$0xff]  ;;  %v46_v13 = vld [vmem:[%s3670_s3 + $0x8] sm:$0xff] }
   0x5   :  { %2548 = vmatpush3.bf16.msra.mxu0 %v2944_v3  ;;  %v45_v12 = vld [vmem:[%s3670_s3] sm:$0xff]  ;;  %v47_v14 = vld [vmem:[%s3670_s3 + $0x10] sm:$0xff]  ;;  %v48_v15 = vld [vmem:[%s3670_s3 + $0x18] sm:$0xff] }
   0x6   :  { %2582 = vmatprep.subr.bf16.mxu0 %v2944_v3  ;;  %v2994_v16 = vpack.c.bf16 %v46_v13, %v45_v12  ;;  %v2996_v17 = vpack.c.bf16 %v48_v15, %v47_v14  ;;  %v49_v18 = vld [vmem:[%s3670_s3 + $0x20] sm:$0xff]  ;;  %v50_v19 = vld [vmem:[%s3670_s3 + $0x28] sm:$0xff] }
   0x8   :  { %2233 = vmatmul.mubr.msk.f32.vlgmr.msra.gmra.mrb[0].mxu0 %vm83_vm0, %v62_v4 }
   0x9   :  { %2584 = vmatpush3.bf16.msra.mxu0 %v2944_v3  ;;  %2235 = vmatprep.mubr.msk.f32.mxu0 %vm83_vm0, %v63_v5 }
   0xa   :  { %2618 = vmatprep.subr.bf16.mxu0 %v2944_v3 }
   0xc   :  { %2236 = vmatmul.mubr.msk.f32.gmra.mrb[2].mxu0 %vm83_vm0, %v64_v6 }
   0xd   :  { %2238 = vmatprep.mubr.msk.f32.mxu0 %vm83_vm0, %v65_v7 }
  0x10   :  { %2239 = vmatmul.mubr.msk.f32.gmra.mrb[4].mxu0 %vm83_vm0, %v66_v8 }
  0x11   :  { %2241 = vmatprep.mubr.msk.f32.mxu0 %vm83_vm0, %v67_v9 }
  0x14   :  { %2242 = vmatmul.mubr.msk.f32.gmra.mrb[6].mxu0 %vm83_vm0, %v68_v10 }
  0x15   :  { %17 = vsyncpa [#allocation3], 0  ;;  %2244 = vmatprep.mubr.msk.f32.mxu0 %vm83_vm0, %v69_v11  ;;  %v70_v20 = vld [vmem:[%s3667_s0 + $0x48] sm:$0xff]  ;;  %2550 = vmatprep.subr.bf16.mxu1 %v2994_v16  ;;  %v71_v21 = vld [vmem:[%s3667_s0 + $0x50] sm:$0xff]  ;;  %v3015_v22 = vpack.c.bf16 %v50_v19, %v49_v18  ;;  %vm438_vm1 = vcmask 7168   ;;  %vm2867_vm2 = vmmov 0  }
  0x16   :  { %2552 = vmatpush3.bf16.msra.mxu1 %v2994_v16  ;;  %v51_v23 = vld [vmem:[%s3670_s3 + $0x30] sm:$0xff]  ;;  %v52_v24 = vld [vmem:[%s3670_s3 + $0x38] sm:$0xff]  ;;  %v73_v26 = vld [vmem:[%s3667_s0 + $0x60] sm:$0xff]  ;;  %vm1609_vm3 = vcmask 523264   ;;  %vm1669_vm4 = vcmask 1041409   ;;  %vm1755_vm5 = vcmask 261120  }
  0x17   :  { %2554 = vmatprep.subr.bf16.mxu1 %v2996_v17  ;;  %v72_v25 = vld [vmem:[%s3667_s0 + $0x58] sm:$0xff]  ;;  %v3033_v27 = vpack.c.bf16 %v52_v24, %v51_v23  ;;  %v74_v28 = vld [vmem:[%s3667_s0 + $0x68] sm:$0xff]  ;;  %v75_v29 = vld [vmem:[%s3667_s0 + $0x70] sm:$0xff]  ;;  %vm1912_vm6 = vcmask 9216  }
  0x18   :  { %2245 = vmatmul.mubr.msk.f32.gmra.mrb[8].mxu0 %vm83_vm0, %v70_v20  ;;  %v76_v30 = vld [vmem:[%s3667_s0 + $0x78] sm:$0xff]  ;;  %v1956_v31 = vld [vmem:[%s3667_s0 + $0x80] sm:$0xff]  ;;  %v1957_v32 = vld [vmem:[%s3667_s0 + $0x88] sm:$0xff] }
  0x19   :  { %2247 = vmatprep.mubr.msk.f32.mxu0 %vm83_vm0, %v71_v21  ;;  %v1958_v33 = vld [vmem:[%s3667_s0 + $0x90] sm:$0xff]  ;;  %v1959_v34 = vld [vmem:[%s3667_s0 + $0x98] sm:$0xff]  ;;  %v1960_v35 = vld [vmem:[%s3667_s0 + $0xa0] sm:$0xff] }
  0x1a   :  { %2556 = vmatpush3.bf16.msra.mxu1 %v2996_v17  ;;  %v1961_v36 = vld [vmem:[%s3667_s0 + $0xa8] sm:$0xff]  ;;  %v1962_v37 = vld [vmem:[%s3667_s0 + $0xb0] sm:$0xff]  ;;  %v1963_v38 = vld [vmem:[%s3667_s0 + $0xb8] sm:$0xff] }
  0x1b   :  { %2558 = vmatprep.subr.bf16.mxu1 %v3015_v22  ;;  %v1964_v39 = vld [vmem:[%s3667_s0 + $0xc0] sm:$0xff]  ;;  %v1965_v40 = vld [vmem:[%s3667_s0 + $0xc8] sm:$0xff]  ;;  %v1966_v41 = vld [vmem:[%s3667_s0 + $0xd0] sm:$0xff] }
  0x1c   :  { %2248 = vmatmul.mubr.msk.f32.gmra.mrb[10].mxu0 %vm83_vm0, %v72_v25  ;;  %v1967_v42 = vld [vmem:[%s3667_s0 + $0xd8] sm:$0xff]  ;;  %v1968_v43 = vld [vmem:[%s3667_s0 + $0xe0] sm:$0xff]  ;;  %v1969_v44 = vld [vmem:[%s3667_s0 + $0xe8] sm:$0xff] }
  0x1d   :  { %2250 = vmatprep.mubr.msk.f32.mxu0 %vm83_vm0, %v73_v26  ;;  %v1970_v45 = vld [vmem:[%s3667_s0 + $0xf0] sm:$0xff]  ;;  %v1971_v46 = vld [vmem:[%s3667_s0 + $0xf8] sm:$0xff]  ;;  %v1988_v47 = vld [vmem:[%s3667_s0 + $0x100] sm:$0xff] }
  0x1e   :  { %2560 = vmatpush3.bf16.msra.mxu1 %v3015_v22  ;;  %v1989_v48 = vld [vmem:[%s3667_s0 + $0x108] sm:$0xff]  ;;  %v1990_v49 = vld [vmem:[%s3667_s0 + $0x110] sm:$0xff]  ;;  %v1991_v50 = vld [vmem:[%s3667_s0 + $0x118] sm:$0xff] }
  0x1f   :  { %2562 = vmatprep.subr.bf16.mxu1 %v3033_v27  ;;  %v1992_v51 = vld [vmem:[%s3667_s0 + $0x120] sm:$0xff]  ;;  %v1993_v52 = vld [vmem:[%s3667_s0 + $0x128] sm:$0xff]  ;;  %v1994_v53 = vld [vmem:[%s3667_s0 + $0x130] sm:$0xff] }
  0x20   :  { %2251 = vmatmul.mubr.msk.f32.gmra.mrb[12].mxu0 %vm83_vm0, %v74_v28  ;;  %v1995_v54 = vld [vmem:[%s3667_s0 + $0x138] sm:$0xff]  ;;  %v1996_v55 = vld [vmem:[%s3667_s0 + $0x140] sm:$0xff]  ;;  %v1997_v56 = vld [vmem:[%s3667_s0 + $0x148] sm:$0xff] }
  0x21   :  { %2253 = vmatprep.mubr.msk.f32.mxu0 %vm83_vm0, %v75_v29  ;;  %v1998_v57 = vld [vmem:[%s3667_s0 + $0x150] sm:$0xff]  ;;  %v53_v58 = vld [vmem:[%s3670_s3 + $0x40] sm:$0xff]  ;;  %v54_v59 = vld [vmem:[%s3670_s3 + $0x48] sm:$0xff] }
  0x22   :  { %2564 = vmatpush3.bf16.msra.mxu1 %v3033_v27  ;;  %v1999_v60 = vld [vmem:[%s3667_s0 + $0x158] sm:$0xff]  ;;  %v3170_v61 = vpack.c.bf16 %v54_v59, %v53_v58  ;;  %v2000_v62 = vld [vmem:[%s3667_s0 + $0x160] sm:$0xff]  ;;  %v55_v63 = vld [vmem:[%s3670_s3 + $0x50] sm:$0xff] }
  0x23   :  { %v56_v0 = vld [vmem:[%s3670_s3 + $0x58] sm:$0xff]  ;;  %v2001_v1 = vld [vmem:[%s3667_s0 + $0x168] sm:$0xff]  ;;  %v57_v4 = vld [vmem:[%s3670_s3 + $0x60] sm:$0xff] }
  0x24   :  { %2254 = vmatmul.mubr.msk.f32.gmra.mrb[14].mxu0 %vm83_vm0, %v76_v30  ;;  %2566 = vmatprep.subr.bf16.mxu1 %v3170_v61  ;;  %v3188_v2 = vpack.c.bf16 %v56_v0, %v55_v63  ;;  %v58_v5 = vld [vmem:[%s3670_s3 + $0x68] sm:$0xff]  ;;  %v2003_v6 = vld [vmem:[%s3667_s0 + $0x178] sm:$0xff]  ;;  %v59_v8 = vld [vmem:[%s3670_s3 + $0x70] sm:$0xff] }
  0x25   :  { %2316 = vmatprep.mubr.msk.f32.mxu0 %vm83_vm0, %v1956_v31  ;;  %v3206_v7 = vpack.c.bf16 %v58_v5, %v57_v4  ;;  %v60_v9 = vld [vmem:[%s3670_s3 + $0x78] sm:$0xff]  ;;  %v3225_v11 = vld [vmem:[%s3669_s2] ss:$0 sm:$0xff] }
  0x26   :  { %2568 = vmatpush3.bf16.msra.mxu1 %v3170_v61  ;;  %v3217_v10 = vpack.c.bf16 %v60_v9, %v59_v8 }
  0x27   :  { %2570 = vmatprep.subr.bf16.mxu1 %v3188_v2 }
  0x28   :  { %2317 = vmatmul.mubr.msk.f32.vlgmr.msra.gmra.mrb[16].mxu0 %vm83_vm0, %v1957_v32 }
  0x29   :  { %2620 = vmatpush3.bf16.msra.mxu0 %v2944_v3  ;;  %2319 = vmatprep.mubr.msk.f32.mxu0 %vm83_vm0, %v1958_v33  ;;  %v2002_v3 = vld [vmem:[%s3667_s0 + $0x170] sm:$0xff] }
  0x2a   :  { %2572 = vmatpush3.bf16.msra.mxu1 %v3188_v2 }
  0x2b   :  { %2574 = vmatprep.subr.bf16.mxu1 %v3206_v7 }
  0x2c   :  { %2320 = vmatmul.mubr.msk.f32.gmra.mrb[18].mxu0 %vm83_vm0, %v1959_v34 }
  0x2d   :  { %2322 = vmatprep.mubr.msk.f32.mxu0 %vm83_vm0, %v1960_v35 }
  0x2e   :  { %2576 = vmatpush3.bf16.msra.mxu1 %v3206_v7 }
  0x2f   :  { %2578 = vmatprep.subr.bf16.mxu1 %v3217_v10 }
  0x30   :  { %2323 = vmatmul.mubr.msk.f32.gmra.mrb[20].mxu0 %vm83_vm0, %v1961_v36 }
  0x31   :  { %2325 = vmatprep.mubr.msk.f32.mxu0 %vm83_vm0, %v1962_v37 }
  0x32   :  { %2580 = vmatpush3.bf16.msra.mxu1 %v3217_v10 }
  0x33   :  { %2586 = vmatprep.subr.bf16.mxu1 %v2994_v16 }
  0x34   :  { %2326 = vmatmul.mubr.msk.f32.gmra.mrb[22].mxu0 %vm83_vm0, %v1963_v38 }
  0x35   :  { %2328 = vmatprep.mubr.msk.f32.mxu0 %vm83_vm0, %v1964_v39 }
  0x38   :  { %2329 = vmatmul.mubr.msk.f32.gmra.mrb[24].mxu0 %vm83_vm0, %v1965_v40 }
  0x39   :  { %2331 = vmatprep.mubr.msk.f32.mxu0 %vm83_vm0, %v1966_v41 }
  0x3c   :  { %2332 = vmatmul.mubr.msk.f32.gmra.mrb[26].mxu0 %vm83_vm0, %v1967_v42 }
  0x3d   :  { %2334 = vmatprep.mubr.msk.f32.mxu0 %vm83_vm0, %v1968_v43 }
  0x40   :  { %2335 = vmatmul.mubr.msk.f32.gmra.mrb[28].mxu0 %vm83_vm0, %v1969_v44 }
  0x41   :  { %2337 = vmatprep.mubr.msk.f32.mxu0 %vm83_vm0, %v1970_v45 }
  0x44   :  { %2338 = vmatmul.mubr.msk.f32.gmra.mrb[30].mxu0 %vm83_vm0, %v1971_v46 }
  0x45   :  { %2400 = vmatprep.mubr.msk.f32.mxu0 %vm83_vm0, %v1988_v47 }
  0x48   :  { %2401 = vmatmul.mubr.msk.f32.vlgmr.msra.gmra.mrb[32].mxu0 %vm83_vm0, %v1989_v48 }
  0x49   :  { %2403 = vmatprep.mubr.msk.f32.mxu0 %vm83_vm0, %v1990_v49 }
  0x4c   :  { %2404 = vmatmul.mubr.msk.f32.gmra.mrb[34].mxu0 %vm83_vm0, %v1991_v50 }
  0x4d   :  { %2406 = vmatprep.mubr.msk.f32.mxu0 %vm83_vm0, %v1992_v51 }
  0x50   :  { %2407 = vmatmul.mubr.msk.f32.gmra.mrb[36].mxu0 %vm83_vm0, %v1993_v52 }
  0x51   :  { %2409 = vmatprep.mubr.msk.f32.mxu0 %vm83_vm0, %v1994_v53 }
  0x54   :  { %2410 = vmatmul.mubr.msk.f32.gmra.mrb[38].mxu0 %vm83_vm0, %v1995_v54 }
  0x55   :  { %2412 = vmatprep.mubr.msk.f32.mxu0 %vm83_vm0, %v1996_v55 }
  0x58   :  { %2413 = vmatmul.mubr.msk.f32.gmra.mrb[40].mxu0 %vm83_vm0, %v1997_v56 }
  0x59   :  { %2415 = vmatprep.mubr.msk.f32.mxu0 %vm83_vm0, %v1998_v57 }
  0x5c   :  { %2416 = vmatmul.mubr.msk.f32.gmra.mrb[42].mxu0 %vm83_vm0, %v1999_v60 }
  0x5d   :  { %2418 = vmatprep.mubr.msk.f32.mxu0 %vm83_vm0, %v2000_v62 }
  0x60   :  { %2419 = vmatmul.mubr.msk.f32.gmra.mrb[44].mxu0 %vm83_vm0, %v2001_v1 }
  0x61   :  { %2421 = vmatprep.mubr.msk.f32.mxu0 %vm83_vm0, %v2002_v3 }
  0x64   :  { %2422 = vmatmul.mubr.msk.f32.gmra.mrb[46].mxu0 %vm83_vm0, %v2003_v6 }
  0xdb   :  { %v2234_v12 = vpop.f32.mrb[0].mxu0 }
  0xdc   :  { %v204_v13 = vadd.f32 %v2234_v12, %v3225_v11  ;;  %v198_v14 = vpop.f32.mrb[1].mxu0 }
  0xdd   :  { %v199_v15 = vadd.f32 %v3225_v11, %v198_v14 }
  0xdf   :  { %2685 = vtanh.f32 %v199_v15  ;;  %v2237_v18 = vpop.f32.mrb[2].mxu0 }
  0xe0   :  { %2687 = vtanh.f32 %v204_v13  ;;  %v214_v19 = vadd.f32 %v2237_v18, %v3225_v11  ;;  %v208_v20 = vpop.f32.mrb[3].mxu0 }
  0xe1   :  { %v209_v21 = vadd.f32 %v3225_v11, %v208_v20 }
  0xe3   :  { %2689 = vtanh.f32 %v209_v21  ;;  %v2240_v23 = vpop.f32.mrb[4].mxu0 }
  0xe4   :  { %2691 = vtanh.f32 %v214_v19  ;;  %v224_v24 = vadd.f32 %v2240_v23, %v3225_v11  ;;  %v218_v25 = vpop.f32.mrb[5].mxu0 }
  0xe5   :  { %v219_v26 = vadd.f32 %v3225_v11, %v218_v25 }
  0xe7   :  { %2693 = vtanh.f32 %v219_v26  ;;  %v2243_v28 = vpop.f32.mrb[6].mxu0 }
  0xe8   :  { %2695 = vtanh.f32 %v224_v24  ;;  %v234_v29 = vadd.f32 %v2243_v28, %v3225_v11  ;;  %v228_v30 = vpop.f32.mrb[7].mxu0 }
  0xe9   :  { %v2686_v31 = vpop.eup %2685  ;;  %v229_v32 = vadd.f32 %v3225_v11, %v228_v30 }
  0xea   :  { %v2688_v33 = vpop.eup %2687  ;;  %2288 = vmatprep.mubr.f32.mxu1 %v2686_v31 }
  0xeb   :  { %2697 = vtanh.f32 %v229_v32  ;;  %v2246_v34 = vpop.f32.mrb[8].mxu0  ;;  %2289 = vmatmul.mubr.f32.vlgmr.msra.gmra.mrb[0].mxu1 %v2688_v33 }
  0xec   :  { %2699 = vtanh.f32 %v234_v29  ;;  %v244_v35 = vadd.f32 %v2246_v34, %v3225_v11  ;;  %v238_v36 = vpop.f32.mrb[9].mxu0  ;;  %2588 = vmatpush3.bf16.msra.mxu1 %v2994_v16 }
  0xed   :  { %v2690_v37 = vpop.eup %2689  ;;  %v239_v38 = vadd.f32 %v3225_v11, %v238_v36  ;;  %2590 = vmatprep.subr.bf16.mxu1 %v2996_v17 }
  0xee   :  { %v2692_v39 = vpop.eup %2691  ;;  %2291 = vmatprep.mubr.f32.mxu1 %v2690_v37 }
  0xef   :  { %2701 = vtanh.f32 %v239_v38  ;;  %v2249_v40 = vpop.f32.mrb[10].mxu0  ;;  %2292 = vmatmul.mubr.f32.gmra.mrb[2].mxu1 %v2692_v39 }
  0xf0   :  { %2703 = vtanh.f32 %v244_v35  ;;  %v254_v41 = vadd.f32 %v2249_v40, %v3225_v11  ;;  %v248_v42 = vpop.f32.mrb[11].mxu0  ;;  %2592 = vmatpush3.bf16.msra.mxu1 %v2996_v17 }
  0xf1   :  { %v2694_v43 = vpop.eup %2693  ;;  %v249_v44 = vadd.f32 %v3225_v11, %v248_v42  ;;  %2594 = vmatprep.subr.bf16.mxu1 %v3015_v22 }
  0xf2   :  { %v2696_v45 = vpop.eup %2695  ;;  %2294 = vmatprep.mubr.f32.mxu1 %v2694_v43 }
  0xf3   :  { %2705 = vtanh.f32 %v249_v44  ;;  %v2252_v46 = vpop.f32.mrb[12].mxu0  ;;  %2295 = vmatmul.mubr.f32.gmra.mrb[4].mxu1 %v2696_v45 }
  0xf4   :  { %2707 = vtanh.f32 %v254_v41  ;;  %v264_v47 = vadd.f32 %v2252_v46, %v3225_v11  ;;  %v258_v48 = vpop.f32.mrb[13].mxu0  ;;  %2596 = vmatpush3.bf16.msra.mxu1 %v3015_v22 }
  0xf5   :  { %v2698_v49 = vpop.eup %2697  ;;  %v259_v50 = vadd.f32 %v3225_v11, %v258_v48  ;;  %2598 = vmatprep.subr.bf16.mxu1 %v3033_v27 }
  0xf6   :  { %v2700_v51 = vpop.eup %2699  ;;  %2297 = vmatprep.mubr.f32.mxu1 %v2698_v49 }
  0xf7   :  { %2709 = vtanh.f32 %v259_v50  ;;  %v2255_v52 = vpop.f32.mrb[14].mxu0  ;;  %2298 = vmatmul.mubr.f32.gmra.mrb[6].mxu1 %v2700_v51 }
  0xf8   :  { %2711 = vtanh.f32 %v264_v47  ;;  %v274_v53 = vadd.f32 %v2255_v52, %v3225_v11  ;;  %v268_v54 = vpop.f32.mrb[15].mxu0  ;;  %2600 = vmatpush3.bf16.msra.mxu1 %v3033_v27 }
  0xf9   :  { %v2702_v55 = vpop.eup %2701  ;;  %v269_v56 = vadd.f32 %v3225_v11, %v268_v54  ;;  %2602 = vmatprep.subr.bf16.mxu1 %v3170_v61 }
  0xfa   :  { %v2704_v57 = vpop.eup %2703  ;;  %2300 = vmatprep.mubr.f32.mxu1 %v2702_v55 }
  0xfb   :  { %2713 = vtanh.f32 %v269_v56  ;;  %2301 = vmatmul.mubr.f32.gmra.mrb[8].mxu1 %v2704_v57  ;;  %v2318_v58 = vpop.f32.mrb[16].mxu0 }
  0xfc   :  { %2715 = vtanh.f32 %v274_v53  ;;  %v614_v59 = vadd.f32 %v2318_v58, %v3225_v11  ;;  %v608_v60 = vpop.f32.mrb[17].mxu0  ;;  %2604 = vmatpush3.bf16.msra.mxu1 %v3170_v61 }
  0xfd   :  { %v2706_v62 = vpop.eup %2705  ;;  %v609_v63 = vadd.f32 %v3225_v11, %v608_v60  ;;  %2606 = vmatprep.subr.bf16.mxu1 %v3188_v2 }
  0xfe   :  { %v2708_v0 = vpop.eup %2707  ;;  %2303 = vmatprep.mubr.f32.mxu1 %v2706_v62 }
  0xff   :  { %2717 = vtanh.f32 %v609_v63  ;;  %2304 = vmatmul.mubr.f32.gmra.mrb[10].mxu1 %v2708_v0  ;;  %v2321_v1 = vpop.f32.mrb[18].mxu0 }
 0x100   :  { %2719 = vtanh.f32 %v614_v59  ;;  %v624_v3 = vadd.f32 %v2321_v1, %v3225_v11  ;;  %v618_v4 = vpop.f32.mrb[19].mxu0  ;;  %2608 = vmatpush3.bf16.msra.mxu1 %v3188_v2 }
 0x101   :  { %v2710_v5 = vpop.eup %2709  ;;  %v619_v6 = vadd.f32 %v3225_v11, %v618_v4  ;;  %2610 = vmatprep.subr.bf16.mxu1 %v3206_v7 }
 0x102   :  { %v2712_v8 = vpop.eup %2711  ;;  %2306 = vmatprep.mubr.f32.mxu1 %v2710_v5 }
 0x103   :  { %2721 = vtanh.f32 %v619_v6  ;;  %2307 = vmatmul.mubr.f32.gmra.mrb[12].mxu1 %v2712_v8  ;;  %v2324_v9 = vpop.f32.mrb[20].mxu0 }
 0x104   :  { %2723 = vtanh.f32 %v624_v3  ;;  %v634_v12 = vadd.f32 %v2324_v9, %v3225_v11  ;;  %v628_v13 = vpop.f32.mrb[21].mxu0  ;;  %2612 = vmatpush3.bf16.msra.mxu1 %v3206_v7 }
 0x105   :  { %v2714_v14 = vpop.eup %2713  ;;  %v629_v15 = vadd.f32 %v3225_v11, %v628_v13  ;;  %2614 = vmatprep.subr.bf16.mxu1 %v3217_v10 }
 0x106   :  { %v2716_v18 = vpop.eup %2715  ;;  %2309 = vmatprep.mubr.f32.mxu1 %v2714_v14 }
 0x107   :  { %2725 = vtanh.f32 %v629_v15  ;;  %2310 = vmatmul.mubr.f32.gmra.mrb[14].mxu1 %v2716_v18  ;;  %v2327_v19 = vpop.f32.mrb[22].mxu0 }
 0x108   :  { %2727 = vtanh.f32 %v634_v12  ;;  %v644_v20 = vadd.f32 %v2327_v19, %v3225_v11  ;;  %v638_v21 = vpop.f32.mrb[23].mxu0  ;;  %2616 = vmatpush3.bf16.msra.mxu1 %v3217_v10 }
 0x109   :  { %v2718_v23 = vpop.eup %2717  ;;  %v639_v24 = vadd.f32 %v3225_v11, %v638_v21  ;;  %2622 = vmatprep.subr.bf16.mxu1 %v2994_v16 }
 0x10a   :  { %v2720_v25 = vpop.eup %2719  ;;  %2372 = vmatprep.mubr.f32.mxu1 %v2718_v23 }
 0x10b   :  { %2729 = vtanh.f32 %v639_v24  ;;  %v2330_v26 = vpop.f32.mrb[24].mxu0  ;;  %2373 = vmatmul.mubr.f32.vlgmr.msra.gmra.mrb[16].mxu1 %v2720_v25 }
 0x10c   :  { %2731 = vtanh.f32 %v644_v20  ;;  %v654_v28 = vadd.f32 %v2330_v26, %v3225_v11  ;;  %v648_v29 = vpop.f32.mrb[25].mxu0  ;;  %2624 = vmatpush3.bf16.msra.mxu1 %v2994_v16 }
 0x10d   :  { %v2722_v30 = vpop.eup %2721  ;;  %v649_v31 = vadd.f32 %v3225_v11, %v648_v29  ;;  %2626 = vmatprep.subr.bf16.mxu1 %v2996_v17 }
 0x10e   :  { %v2724_v32 = vpop.eup %2723  ;;  %2375 = vmatprep.mubr.f32.mxu1 %v2722_v30 }
 0x10f   :  { %2733 = vtanh.f32 %v649_v31  ;;  %v2333_v33 = vpop.f32.mrb[26].mxu0  ;;  %2376 = vmatmul.mubr.f32.gmra.mrb[18].mxu1 %v2724_v32 }
 0x110   :  { %2735 = vtanh.f32 %v654_v28  ;;  %v664_v34 = vadd.f32 %v2333_v33, %v3225_v11  ;;  %v658_v35 = vpop.f32.mrb[27].mxu0  ;;  %2628 = vmatpush3.bf16.msra.mxu1 %v2996_v17 }
 0x111   :  { %v2726_v36 = vpop.eup %2725  ;;  %v659_v37 = vadd.f32 %v3225_v11, %v658_v35  ;;  %2630 = vmatprep.subr.bf16.mxu1 %v3015_v22 }
 0x112   :  { %v2728_v16 = vpop.eup %2727  ;;  %2378 = vmatprep.mubr.f32.mxu1 %v2726_v36 }
 0x113   :  { %2737 = vtanh.f32 %v659_v37  ;;  %v2336_v38 = vpop.f32.mrb[28].mxu0  ;;  %2379 = vmatmul.mubr.f32.gmra.mrb[20].mxu1 %v2728_v16 }
 0x114   :  { %2739 = vtanh.f32 %v664_v34  ;;  %v674_v39 = vadd.f32 %v2336_v38, %v3225_v11  ;;  %v668_v40 = vpop.f32.mrb[29].mxu0  ;;  %2632 = vmatpush3.bf16.msra.mxu1 %v3015_v22 }
 0x115   :  { %v2730_v41 = vpop.eup %2729  ;;  %v669_v42 = vadd.f32 %v3225_v11, %v668_v40  ;;  %2634 = vmatprep.subr.bf16.mxu1 %v3033_v27 }
 0x116   :  { %v2732_v17 = vpop.eup %2731  ;;  %2381 = vmatprep.mubr.f32.mxu1 %v2730_v41  ;;  %v2865_v41 = vmov 0  }
 0x117   :  { %2741 = vtanh.f32 %v669_v42  ;;  %v2339_v43 = vpop.f32.mrb[30].mxu0  ;;  %2382 = vmatmul.mubr.f32.gmra.mrb[22].mxu1 %v2732_v17  ;;  %2684 = vset.pattern.permute.xlu1 %v2865_v41 }
 0x118   :  { %2743 = vtanh.f32 %v674_v39  ;;  %v684_v44 = vadd.f32 %v2339_v43, %v3225_v11  ;;  %v678_v45 = vpop.f32.mrb[31].mxu0  ;;  %2636 = vmatpush3.bf16.msra.mxu1 %v3033_v27  ;;  %2683 = vset.pattern.permute.xlu0 %v2865_v41 }
 0x119   :  { %v2734_v46 = vpop.eup %2733  ;;  %v679_v47 = vadd.f32 %v3225_v11, %v678_v45  ;;  %2638 = vmatprep.subr.bf16.mxu1 %v3170_v61 }
 0x11a   :  { %v2736_v22 = vpop.eup %2735  ;;  %2384 = vmatprep.mubr.f32.mxu1 %v2734_v46 }
 0x11b   :  { %2745 = vtanh.f32 %v679_v47  ;;  %2385 = vmatmul.mubr.f32.gmra.mrb[24].mxu1 %v2736_v22  ;;  %v2402_v48 = vpop.f32.mrb[32].mxu0 }
 0x11c   :  { %2747 = vtanh.f32 %v684_v44  ;;  %v1023_v49 = vadd.f32 %v2402_v48, %v3225_v11  ;;  %v1017_v50 = vpop.f32.mrb[33].mxu0  ;;  %2640 = vmatpush3.bf16.msra.mxu1 %v3170_v61 }
 0x11d   :  { %v2738_v51 = vpop.eup %2737  ;;  %v1018_v52 = vadd.f32 %v3225_v11, %v1017_v50  ;;  %2642 = vmatprep.subr.bf16.mxu1 %v3188_v2 }
 0x11e   :  { %v2740_v27 = vpop.eup %2739  ;;  %2387 = vmatprep.mubr.f32.mxu1 %v2738_v51 }
 0x11f   :  { %2749 = vtanh.f32 %v1018_v52  ;;  %2388 = vmatmul.mubr.f32.gmra.mrb[26].mxu1 %v2740_v27  ;;  %v2405_v53 = vpop.f32.mrb[34].mxu0 }
 0x120   :  { %2751 = vtanh.f32 %v1023_v49  ;;  %v1033_v54 = vadd.f32 %v2405_v53, %v3225_v11  ;;  %v1027_v55 = vpop.f32.mrb[35].mxu0  ;;  %2644 = vmatpush3.bf16.msra.mxu1 %v3188_v2 }
 0x121   :  { %v2742_v56 = vpop.eup %2741  ;;  %v1028_v57 = vadd.f32 %v3225_v11, %v1027_v55  ;;  %2646 = vmatprep.subr.bf16.mxu1 %v3206_v7 }
 0x122   :  { %v2744_v61 = vpop.eup %2743  ;;  %2390 = vmatprep.mubr.f32.mxu1 %v2742_v56 }
 0x123   :  { %2753 = vtanh.f32 %v1028_v57  ;;  %2391 = vmatmul.mubr.f32.gmra.mrb[28].mxu1 %v2744_v61  ;;  %v2408_v58 = vpop.f32.mrb[36].mxu0 }
 0x124   :  { %2755 = vtanh.f32 %v1033_v54  ;;  %v1043_v59 = vadd.f32 %v2408_v58, %v3225_v11  ;;  %v1037_v60 = vpop.f32.mrb[37].mxu0  ;;  %2648 = vmatpush3.bf16.msra.mxu1 %v3206_v7 }
 0x125   :  { %v2746_v62 = vpop.eup %2745  ;;  %v1038_v63 = vadd.f32 %v3225_v11, %v1037_v60  ;;  %2650 = vmatprep.subr.bf16.mxu1 %v3217_v10 }
 0x126   :  { %v2748_v2 = vpop.eup %2747  ;;  %2393 = vmatprep.mubr.f32.mxu1 %v2746_v62 }
 0x127   :  { %2757 = vtanh.f32 %v1038_v63  ;;  %2394 = vmatmul.mubr.f32.gmra.mrb[30].mxu1 %v2748_v2  ;;  %v2411_v0 = vpop.f32.mrb[38].mxu0 }
 0x128   :  { %2759 = vtanh.f32 %v1043_v59  ;;  %v1053_v1 = vadd.f32 %v2411_v0, %v3225_v11  ;;  %v1047_v3 = vpop.f32.mrb[39].mxu0  ;;  %2652 = vmatpush3.bf16.msra.mxu1 %v3217_v10 }
 0x129   :  { %v2750_v4 = vpop.eup %2749  ;;  %v1048_v5 = vadd.f32 %v3225_v11, %v1047_v3 }
 0x12a   :  { %v2752_v7 = vpop.eup %2751  ;;  %2456 = vmatprep.mubr.f32.mxu1 %v2750_v4 }
 0x12b   :  { %2761 = vtanh.f32 %v1048_v5  ;;  %v2414_v6 = vpop.f32.mrb[40].mxu0  ;;  %2457 = vmatmul.mubr.f32.vlgmr.msra.gmra.mrb[32].mxu1 %v2752_v7 }
 0x12c   :  { %2763 = vtanh.f32 %v1053_v1  ;;  %v1063_v8 = vadd.f32 %v2414_v6, %v3225_v11  ;;  %v1057_v9 = vpop.f32.mrb[41].mxu0 }
 0x12d   :  { %v2754_v12 = vpop.eup %2753  ;;  %v1058_v13 = vadd.f32 %v3225_v11, %v1057_v9  ;;  %v1407_v9 = vld [vmem:[%s3671_s4] sm:$0xff] }
 0x12e   :  { %v2756_v14 = vpop.eup %2755  ;;  %2459 = vmatprep.mubr.f32.mxu1 %v2754_v12  ;;  %v1408_v12 = vld [vmem:[%s3671_s4 + $0x8] sm:$0xff] }
 0x12f   :  { %2765 = vtanh.f32 %v1058_v13  ;;  %v2417_v15 = vpop.f32.mrb[42].mxu0  ;;  %2460 = vmatmul.mubr.f32.gmra.mrb[34].mxu1 %v2756_v14 }
 0x130   :  { %2767 = vtanh.f32 %v1063_v8  ;;  %v1073_v10 = vadd.f32 %v2417_v15, %v3225_v11  ;;  %v1067_v18 = vpop.f32.mrb[43].mxu0  ;;  %v2653_v15 = vpack.c.bf16 %v1408_v12, %v1407_v9 }
 0x131   :  { %v2758_v19 = vpop.eup %2757  ;;  %v1068_v20 = vadd.f32 %v3225_v11, %v1067_v18 }
 0x132   :  { %v2760_v21 = vpop.eup %2759  ;;  %2462 = vmatprep.mubr.f32.mxu1 %v2758_v19  ;;  %2654 = vmatprep.subr.bf16.mxu0 %v2653_v15 }
 0x133   :  { %2769 = vtanh.f32 %v1068_v20  ;;  %v2420_v23 = vpop.f32.mrb[44].mxu0  ;;  %2463 = vmatmul.mubr.f32.gmra.mrb[36].mxu1 %v2760_v21  ;;  %2656 = vmatpush3.bf16.msra.mxu0 %v2653_v15 }
 0x134   :  { %2771 = vtanh.f32 %v1073_v10  ;;  %v1083_v24 = vadd.f32 %v2420_v23, %v3225_v11  ;;  %v1077_v25 = vpop.f32.mrb[45].mxu0 }
 0x135   :  { %v2762_v26 = vpop.eup %2761  ;;  %v1078_v28 = vadd.f32 %v3225_v11, %v1077_v25 }
 0x136   :  { %v2764_v29 = vpop.eup %2763  ;;  %2465 = vmatprep.mubr.f32.mxu1 %v2762_v26 }
 0x137   :  { %2773 = vtanh.f32 %v1078_v28  ;;  %v2423_v30 = vpop.f32.mrb[46].mxu0  ;;  %2466 = vmatmul.mubr.f32.gmra.mrb[38].mxu1 %v2764_v29 }
 0x138   :  { %2775 = vtanh.f32 %v1083_v24  ;;  %v1093_v31 = vadd.f32 %v2423_v30, %v3225_v11  ;;  %v1087_v32 = vpop.f32.mrb[47].mxu0 }
 0x139   :  { %v2766_v33 = vpop.eup %2765  ;;  %v1088_v34 = vadd.f32 %v3225_v11, %v1087_v32 }
 0x13a   :  { %v2768_v35 = vpop.eup %2767  ;;  %2468 = vmatprep.mubr.f32.mxu1 %v2766_v33 }
 0x13b   :  { %2777 = vtanh.f32 %v1088_v34  ;;  %2469 = vmatmul.mubr.f32.gmra.mrb[40].mxu1 %v2768_v35 }
 0x13c   :  { %2779 = vtanh.f32 %v1093_v31 }
 0x13d   :  { %v2770_v36 = vpop.eup %2769 }
 0x13e   :  { %v2772_v37 = vpop.eup %2771  ;;  %2471 = vmatprep.mubr.f32.mxu1 %v2770_v36 }
 0x13f   :  { %2472 = vmatmul.mubr.f32.gmra.mrb[42].mxu1 %v2772_v37 }
 0x141   :  { %v2774_v16 = vpop.eup %2773 }
 0x142   :  { %v2776_v38 = vpop.eup %2775  ;;  %2474 = vmatprep.mubr.f32.mxu1 %v2774_v16 }
 0x143   :  { %2475 = vmatmul.mubr.f32.gmra.mrb[44].mxu1 %v2776_v38 }
 0x145   :  { %v2778_v39 = vpop.eup %2777 }
 0x146   :  { %v2780_v40 = vpop.eup %2779  ;;  %2477 = vmatprep.mubr.f32.mxu1 %v2778_v39 }
 0x147   :  { %2478 = vmatmul.mubr.f32.gmra.mrb[46].mxu1 %v2780_v40 }
 0x1be   :  { %v2290_v11 = vpop.f32.mrb[0].mxu1 }
 0x1bf   :  { %v440_v42 = vsel %vm438_vm1, %v2290_v11, 0.0  ;;  %v359_v17 = vpop.f32.mrb[1].mxu1 }
 0x1c0   :  { %v439_v43 = vsel %vm438_vm1, %v359_v17, 0.0 }
 0x1c1   :  { %v441_v44 = vadd.f32 %v440_v42, %v439_v43 }
 0x1c2   :  { %v2293_v45 = vpop.f32.mrb[2].mxu1 }
 0x1c3   :  { %v369_v46 = vpop.f32.mrb[3].mxu1  ;;  %v444_v48 = vsel %vm438_vm1, %v2293_v45, 0.0 }
 0x1c4   :  { %v442_v47 = vsel %vm438_vm1, %v369_v46, 0.0 }
 0x1c5   :  { %v443_v22 = vadd.f32 %v442_v47, %v441_v44 }
 0x1c6   :  { %v2296_v49 = vpop.f32.mrb[4].mxu1 }
 0x1c7   :  { %v379_v50 = vpop.f32.mrb[5].mxu1  ;;  %v445_v51 = vadd.f32 %v444_v48, %v443_v22  ;;  %v448_v53 = vsel %vm438_vm1, %v2296_v49, 0.0 }
 0x1c8   :  { %v446_v52 = vsel %vm438_vm1, %v379_v50, 0.0 }
 0x1c9   :  { %v447_v27 = vadd.f32 %v446_v52, %v445_v51 }
 0x1ca   :  { %v2299_v54 = vpop.f32.mrb[6].mxu1 }
 0x1cb   :  { %v389_v55 = vpop.f32.mrb[7].mxu1  ;;  %v449_v56 = vadd.f32 %v448_v53, %v447_v27  ;;  %v452_v58 = vsel %vm438_vm1, %v2299_v54, 0.0 }
 0x1cc   :  { %v450_v57 = vsel %vm438_vm1, %v389_v55, 0.0 }
 0x1cd   :  { %v451_v61 = vadd.f32 %v450_v57, %v449_v56 }
 0x1ce   :  { %v2302_v59 = vpop.f32.mrb[8].mxu1 }
 0x1cf   :  { %v399_v60 = vpop.f32.mrb[9].mxu1  ;;  %v453_v62 = vadd.f32 %v452_v58, %v451_v61  ;;  %v456_v0 = vsel %vm438_vm1, %v2302_v59, 0.0 }
 0x1d0   :  { %v454_v63 = vsel %vm438_vm1, %v399_v60, 0.0 }
 0x1d1   :  { %v455_v2 = vadd.f32 %v454_v63, %v453_v62 }
 0x1d2   :  { %v2305_v1 = vpop.f32.mrb[10].mxu1 }
 0x1d3   :  { %v409_v3 = vpop.f32.mrb[11].mxu1  ;;  %v457_v4 = vadd.f32 %v456_v0, %v455_v2  ;;  %v460_v6 = vsel %vm438_vm1, %v2305_v1, 0.0 }
 0x1d4   :  { %v458_v5 = vsel %vm438_vm1, %v409_v3, 0.0 }
 0x1d5   :  { %v459_v7 = vadd.f32 %v458_v5, %v457_v4 }
 0x1d6   :  { %v2308_v8 = vpop.f32.mrb[12].mxu1 }
 0x1d7   :  { %v419_v13 = vpop.f32.mrb[13].mxu1  ;;  %v461_v14 = vadd.f32 %v460_v6, %v459_v7  ;;  %v464_v19 = vsel %vm438_vm1, %v2308_v8, 0.0 }
 0x1d8   :  { %v462_v10 = vsel %vm438_vm1, %v419_v13, 0.0 }
 0x1d9   :  { %v463_v18 = vadd.f32 %v462_v10, %v461_v14 }
 0x1da   :  { %v2311_v20 = vpop.f32.mrb[14].mxu1 }
 0x1db   :  { %v429_v21 = vpop.f32.mrb[15].mxu1  ;;  %v465_v23 = vadd.f32 %v464_v19, %v463_v18  ;;  %v468_v26 = vsel %vm438_vm1, %v2311_v20, 0.0 }
 0x1dc   :  { %v466_v24 = vsel %vm438_vm1, %v429_v21, 0.0 }
 0x1dd   :  { %v467_v25 = vadd.f32 %v466_v24, %v465_v23 }
 0x1de   :  { %v2374_v28 = vpop.f32.mrb[16].mxu1 }
 0x1df   :  { %v469_v29 = vadd.f32 %v468_v26, %v467_v25  ;;  %v849_v30 = vsel %vm438_vm1, %v2374_v28, 0.0  ;;  %v769_v31 = vpop.f32.mrb[17].mxu1 }
 0x1e0   :  { %v848_v32 = vsel %vm438_vm1, %v769_v31, 0.0 }
 0x1e1   :  { %v850_v33 = vadd.f32 %v849_v30, %v848_v32  ;;  %v470_v56 = vrot.slane %v469_v29, 4 }
 0x1e2   :  { %v2377_v34 = vpop.f32.mrb[18].mxu1 }
 0x1e3   :  { %v779_v35 = vpop.f32.mrb[19].mxu1  ;;  %v853_v16 = vsel %vm438_vm1, %v2377_v34, 0.0  ;;  %v471_v63 = vadd.f32 %v470_v56, %v469_v29 }
 0x1e4   :  { %v851_v36 = vsel %vm438_vm1, %v779_v35, 0.0 }
 0x1e5   :  { %v852_v37 = vadd.f32 %v851_v36, %v850_v33  ;;  %v472_v7 = vrot.slane %v471_v63, 2 }
 0x1e6   :  { %v2380_v38 = vpop.f32.mrb[20].mxu1 }
 0x1e7   :  { %v789_v39 = vpop.f32.mrb[21].mxu1  ;;  %v854_v40 = vadd.f32 %v853_v16, %v852_v37  ;;  %v857_v42 = vsel %vm438_vm1, %v2380_v38, 0.0  ;;  %v473_v10 = vadd.f32 %v472_v7, %v471_v63 }
 0x1e8   :  { %v855_v41 = vsel %vm438_vm1, %v789_v39, 0.0 }
 0x1e9   :  { %v856_v11 = vadd.f32 %v855_v41, %v854_v40  ;;  %v474_v25 = vrot.slane %v473_v10, 1 }
 0x1ea   :  { %v2383_v17 = vpop.f32.mrb[22].mxu1 }
 0x1eb   :  { %v799_v43 = vpop.f32.mrb[23].mxu1  ;;  %v858_v44 = vadd.f32 %v857_v42, %v856_v11  ;;  %v861_v47 = vsel %vm438_vm1, %v2383_v17, 0.0  ;;  %v475_v35 = vadd.f32 %v474_v25, %v473_v10 }
 0x1ec   :  { %v859_v45 = vsel %vm438_vm1, %v799_v43, 0.0 }
 0x1ed   :  { %v860_v46 = vadd.f32 %v859_v45, %v858_v44  ;;  %v476_v42 = vmul.f32 0.0078125, %v475_v35 }
 0x1ee   :  { %v2386_v22 = vpop.f32.mrb[24].mxu1 }
 0x1ef   :  { %v809_v48 = vpop.f32.mrb[25].mxu1  ;;  %v862_v49 = vadd.f32 %v861_v47, %v860_v46  ;;  %v865_v52 = vsel %vm438_vm1, %v2386_v22, 0.0 }
 0x1f0   :  { %v863_v50 = vsel %vm438_vm1, %v809_v48, 0.0 }
 0x1f1   :  { %v864_v51 = vadd.f32 %v863_v50, %v862_v49 }
 0x1f2   :  { %v2389_v27 = vpop.f32.mrb[26].mxu1 }
 0x1f3   :  { %v819_v53 = vpop.f32.mrb[27].mxu1  ;;  %v866_v54 = vadd.f32 %v865_v52, %v864_v51  ;;  %v869_v61 = vsel %vm438_vm1, %v2389_v27, 0.0 }
 0x1f4   :  { %v867_v55 = vsel %vm438_vm1, %v819_v53, 0.0 }
 0x1f5   :  { %v868_v57 = vadd.f32 %v867_v55, %v866_v54 }
 0x1f6   :  { %v2392_v58 = vpop.f32.mrb[28].mxu1 }
 0x1f7   :  { %v829_v59 = vpop.f32.mrb[29].mxu1  ;;  %v870_v60 = vadd.f32 %v869_v61, %v868_v57  ;;  %v873_v0 = vsel %vm438_vm1, %v2392_v58, 0.0 }
 0x1f8   :  { %v871_v62 = vsel %vm438_vm1, %v829_v59, 0.0 }
 0x1f9   :  { %v872_v2 = vadd.f32 %v871_v62, %v870_v60 }
 0x1fa   :  { %v2395_v1 = vpop.f32.mrb[30].mxu1 }
 0x1fb   :  { %v839_v3 = vpop.f32.mrb[31].mxu1  ;;  %v874_v4 = vadd.f32 %v873_v0, %v872_v2  ;;  %v877_v8 = vsel %vm438_vm1, %v2395_v1, 0.0 }
 0x1fc   :  { %v875_v5 = vsel %vm438_vm1, %v839_v3, 0.0 }
 0x1fd   :  { %v876_v6 = vadd.f32 %v875_v5, %v874_v4 }
 0x1fe   :  { %v2458_v9 = vpop.f32.mrb[32].mxu1 }
 0x1ff   :  { %v878_v12 = vadd.f32 %v877_v8, %v876_v6  ;;  %v1258_v13 = vsel %vm438_vm1, %v2458_v9, 0.0  ;;  %v1178_v14 = vpop.f32.mrb[33].mxu1 }
 0x200   :  { %v1257_v15 = vsel %vm438_vm1, %v1178_v14, 0.0 }
 0x201   :  { %v879_v18 = vrot.slane %v878_v12, 4  ;;  %v1259_v19 = vadd.f32 %v1258_v13, %v1257_v15 }
 0x202   :  { %v2461_v20 = vpop.f32.mrb[34].mxu1 }
 0x203   :  { %v880_v21 = vadd.f32 %v879_v18, %v878_v12  ;;  %v1188_v23 = vpop.f32.mrb[35].mxu1  ;;  %v1262_v29 = vsel %vm438_vm1, %v2461_v20, 0.0 }
 0x204   :  { %v1260_v24 = vsel %vm438_vm1, %v1188_v23, 0.0 }
 0x205   :  { %v881_v26 = vrot.slane %v880_v21, 2  ;;  %v1261_v28 = vadd.f32 %v1260_v24, %v1259_v19 }
 0x206   :  { %v2464_v30 = vpop.f32.mrb[36].mxu1 }
 0x207   :  { %v882_v31 = vadd.f32 %v881_v26, %v880_v21  ;;  %v1198_v32 = vpop.f32.mrb[37].mxu1  ;;  %v1263_v33 = vadd.f32 %v1262_v29, %v1261_v28  ;;  %v1266_v16 = vsel %vm438_vm1, %v2464_v30, 0.0 }
 0x208   :  { %v1264_v34 = vsel %vm438_vm1, %v1198_v32, 0.0 }
 0x209   :  { %v883_v36 = vrot.slane %v882_v31, 1  ;;  %v1265_v37 = vadd.f32 %v1264_v34, %v1263_v33 }
 0x20a   :  { %v2467_v38 = vpop.f32.mrb[38].mxu1 }
 0x20b   :  { %v884_v39 = vadd.f32 %v883_v36, %v882_v31  ;;  %v1208_v40 = vpop.f32.mrb[39].mxu1  ;;  %v1267_v41 = vadd.f32 %v1266_v16, %v1265_v37  ;;  %v1270_v44 = vsel %vm438_vm1, %v2467_v38, 0.0  ;;  %v2793_v36 = vld [vmem:[%s3667_s0] sm:$0xff]  ;;  %v2794_v16 = vld [vmem:[%s3667_s0 + $0x8] sm:$0xff] }
 0x20c   :  { %v1268_v11 = vsel %vm438_vm1, %v1208_v40, 0.0 }
 0x20d   :  { %v885_v17 = vmul.f32 0.0078125, %v884_v39  ;;  %v1269_v43 = vadd.f32 %v1268_v11, %v1267_v41  ;;  %v2795_v39 = vld [vmem:[%s3667_s0 + $0x80] sm:$0xff]  ;;  %v2796_v41 = vld [vmem:[%s3667_s0 + $0x88] sm:$0xff] }
 0x20e   :  { %v2470_v45 = vpop.f32.mrb[40].mxu1 }
 0x20f   :  { %v1295_v46 = vmax.f32 %v476_v42, %v885_v17  ;;  %v1218_v47 = vpop.f32.mrb[41].mxu1  ;;  %v1271_v22 = vadd.f32 %v1270_v44, %v1269_v43  ;;  %v1274_v50 = vsel %vm438_vm1, %v2470_v45, 0.0  ;;  %v2798_v43 = vld [vmem:[%s3667_s0 + $0x90] sm:$0xff]  ;;  %v2799_v45 = vld [vmem:[%s3667_s0 + $0x100] sm:$0xff] }
 0x210   :  { %v1272_v48 = vsel %vm438_vm1, %v1218_v47, 0.0  ;;  %v2800_v47 = vld [vmem:[%s3667_s0 + $0x108] sm:$0xff] }
 0x211   :  { %v1273_v49 = vadd.f32 %v1272_v48, %v1271_v22  ;;  %v2801_v48 = vld [vmem:[%s3667_s0 + $0x98] sm:$0xff] }
 0x212   :  { %v2473_v51 = vpop.f32.mrb[42].mxu1 }
 0x213   :  { %v1228_v52 = vpop.f32.mrb[43].mxu1  ;;  %v1275_v27 = vadd.f32 %v1274_v50, %v1273_v49  ;;  %v1278_v55 = vsel %vm438_vm1, %v2473_v51, 0.0 }
 0x214   :  { %v1276_v53 = vsel %vm438_vm1, %v1228_v52, 0.0 }
 0x215   :  { %v1277_v54 = vadd.f32 %v1276_v53, %v1275_v27  ;;  %v2802_v27 = vld [vmem:[%s3667_s0 + $0xa0] sm:$0xff] }
 0x216   :  { %v2476_v56 = vpop.f32.mrb[44].mxu1 }
 0x217   :  { %v1238_v57 = vpop.f32.mrb[45].mxu1  ;;  %v1279_v61 = vadd.f32 %v1278_v55, %v1277_v54  ;;  %v1282_v60 = vsel %vm438_vm1, %v2476_v56, 0.0  ;;  %v2803_v54 = vld [vmem:[%s3667_s0 + $0x18] sm:$0xff] }
 0x218   :  { %v1280_v58 = vsel %vm438_vm1, %v1238_v57, 0.0 }
 0x219   :  { %v1281_v59 = vadd.f32 %v1280_v58, %v1279_v61  ;;  %v2804_v61 = vld [vmem:[%s3667_s0 + $0x110] sm:$0xff] }
 0x21a   :  { %v2479_v62 = vpop.f32.mrb[46].mxu1 }
 0x21b   :  { %v1248_v63 = vpop.f32.mrb[47].mxu1  ;;  %v1283_v2 = vadd.f32 %v1282_v60, %v1281_v59  ;;  %v1286_v3 = vsel %vm438_vm1, %v2479_v62, 0.0  ;;  %v2805_v59 = vld [vmem:[%s3667_s0 + $0x20] sm:$0xff] }
 0x21c   :  { %v1284_v0 = vsel %vm438_vm1, %v1248_v63, 0.0  ;;  %v2806_v63 = vld [vmem:[%s3667_s0 + $0xa8] sm:$0xff] }
 0x21d   :  { %v1285_v1 = vadd.f32 %v1284_v0, %v1283_v2 }
 0x21f   :  { %v1287_v4 = vadd.f32 %v1286_v3, %v1285_v1  ;;  %v2807_v3 = vld [vmem:[%s3667_s0 + $0xb0] sm:$0xff] }
 0x221   :  { %v1288_v5 = vrot.slane %v1287_v4, 4 }
 0x223   :  { %v1289_v7 = vadd.f32 %v1288_v5, %v1287_v4  ;;  %v2808_v5 = vld [vmem:[%s3667_s0 + $0x118] sm:$0xff] }
 0x225   :  { %v1290_v6 = vrot.slane %v1289_v7, 2 }
 0x227   :  { %v1291_v8 = vadd.f32 %v1290_v6, %v1289_v7  ;;  %v2809_v6 = vld [vmem:[%s3667_s0 + $0x28] sm:$0xff] }
 0x229   :  { %v1292_v9 = vrot.slane %v1291_v8, 1 }
 0x22b   :  { %v1293_v12 = vadd.f32 %v1292_v9, %v1291_v8  ;;  %v2810_v9 = vld [vmem:[%s3667_s0 + $0x120] sm:$0xff] }
 0x22d   :  { %v1294_v13 = vmul.f32 0.0078125, %v1293_v12 }
 0x22f   :  { %v1296_v14 = vmax.f32 %v1295_v46, %v1294_v13 }
 0x231   :  { %v1297_v15 = vsub.f32 %v476_v42, %v1296_v14  ;;  %v1300_v10 = vsub.f32 %v885_v17, %v1296_v14  ;;  %v1303_v18 = vsub.f32 %v1294_v13, %v1296_v14  ;;  %v2797_v42 = vld [vmem:[%s3667_s0 + $0x10] sm:$0xff] }
 0x232   :  { %v2811_v13 = vld [vmem:[%s3667_s0 + $0x30] sm:$0xff] }
 0x233   :  { %v1298_v19 = vmul.f32 1.442695, %v1297_v15  ;;  %v1301_v20 = vmul.f32 1.442695, %v1300_v10  ;;  %v1304_v21 = vmul.f32 1.442695, %v1303_v18 }
 0x234   :  { %v2812_v18 = vld [vmem:[%s3667_s0 + $0xb8] sm:$0xff] }
 0x235   :  { %2781 = vpow2.f32 %v1298_v19 }
 0x236   :  { %2783 = vpow2.f32 %v1301_v20 }
 0x237   :  { %2785 = vpow2.f32 %v1304_v21 }
 0x23f   :  { %v2782_v23 = vpop.eup %2781 }
 0x240   :  { %v2784_v24 = vpop.eup %2783 }
 0x241   :  { %v1306_v25 = vadd.f32 %v2784_v24, %v2782_v23  ;;  %v2786_v26 = vpop.eup %2785 }
 0x243   :  { %v1307_v28 = vadd.f32 %v2786_v26, %v1306_v25  ;;  %v2814_v25 = vld [vmem:[%s3667_s0 + $0x128] sm:$0xff] }
 0x245   :  { %2787 = vrcp.f32 %v1307_v28  ;;  %v2815_v28 = vld [vmem:[%s3667_s0 + $0x38] sm:$0xff] }
 0x24f   :  { %v2788_v29 = vpop.eup %2787 }
 0x250   :  { %v1369_v30 = vmul.f32 %v2788_v29, %v2786_v26  ;;  %v1309_v31 = vmul.f32 %v2788_v29, %v2782_v23  ;;  %v1331_v32 = vmul.f32 %v2788_v29, %v2784_v24  ;;  %v2813_v23 = vld [vmem:[%s3667_s0 + $0xc0] sm:$0xff] }
 0x252   :  { %1372 = vperm.xlu1 %2684, %v1369_v30   ;;  %1312 = vperm.xlu0 %2683, %v1309_v31   ;;  %v2816_v30 = vld [vmem:[%s3667_s0 + $0x130] sm:$0xff] }
 0x256   :  { %1334 = vperm.xlu0 %2683, %v1331_v32   ;;  %v2817_v32 = vld [vmem:[%s3667_s0 + $0x40] sm:$0xff] }
 0x2d1   :  { %v3360_v33 = vpop.permute.xlu0 %1312  ;;  %v3362_v34 = vpop.permute.xlu1 %1372 }
 0x2d2   :  { %v1315_v37 = vmul.f32 %v2793_v36, %v3360_v33  ;;  %v1316_v38 = vmul.f32 %v2794_v16, %v3360_v33  ;;  %v1317_v17 = vmul.f32 %v2797_v42, %v3360_v33  ;;  %v1375_v46 = vmul.f32 %v2799_v45, %v3362_v34 }
 0x2d3   :  { %v1376_v22 = vmul.f32 %v2800_v47, %v3362_v34  ;;  %v1318_v55 = vmul.f32 %v2803_v54, %v3360_v33  ;;  %v1377_v58 = vmul.f32 %v2804_v61, %v3362_v34  ;;  %v1319_v60 = vmul.f32 %v2805_v59, %v3360_v33  ;;  %v2825_v54 = vld [vmem:[%s3667_s0 + $0xe0] sm:$0xff]  ;;  %v2827_v61 = vld [vmem:[%s3667_s0 + $0x58] sm:$0xff]  ;;  %v2828_v59 = vld [vmem:[%s3667_s0 + $0x150] sm:$0xff] }
 0x2d4   :  { %v1378_v7 = vmul.f32 %v2808_v5, %v3362_v34  ;;  %v1320_v8 = vmul.f32 %v2809_v6, %v3360_v33  ;;  %v1379_v12 = vmul.f32 %v2810_v9, %v3362_v34  ;;  %v1321_v14 = vmul.f32 %v2811_v13, %v3360_v33 }
 0x2d5   :  { %v3364_v35 = vpop.permute.xlu0 %1334  ;;  %v1380_v26 = vmul.f32 %v2814_v25, %v3362_v34  ;;  %v1322_v29 = vmul.f32 %v2815_v28, %v3360_v33  ;;  %v1381_v31 = vmul.f32 %v2816_v30, %v3362_v34  ;;  %v1323_v36 = vmul.f32 %v2817_v32, %v3360_v33 }
 0x2d6   :  { %v1337_v40 = vmul.f32 %v2795_v39, %v3364_v35  ;;  %v1338_v11 = vmul.f32 %v2796_v41, %v3364_v35  ;;  %v1339_v44 = vmul.f32 %v2798_v43, %v3364_v35  ;;  %v1340_v49 = vmul.f32 %v2801_v48, %v3364_v35 }
 0x2d7   :  { %v1341_v53 = vmul.f32 %v2802_v27, %v3364_v35  ;;  %v1342_v2 = vmul.f32 %v2806_v63, %v3364_v35  ;;  %v1343_v4 = vmul.f32 %v2807_v3, %v3364_v35  ;;  %v1344_v19 = vmul.f32 %v2812_v18, %v3364_v35 }
 0x2d8   :  { %v1353_v50 = vadd.f32 %v1337_v40, %v1315_v37  ;;  %v1354_v51 = vadd.f32 %v1338_v11, %v1316_v38  ;;  %v1355_v52 = vadd.f32 %v1339_v44, %v1317_v17  ;;  %v1356_v62 = vadd.f32 %v1340_v49, %v1318_v55  ;;  %v2818_v38 = vld [vmem:[%s3667_s0 + $0xc8] sm:$0xff]  ;;  %v2819_v11 = vld [vmem:[%s3667_s0 + $0xd0] sm:$0xff]  ;;  %v2820_v17 = vld [vmem:[%s3667_s0 + $0x138] sm:$0xff] }
 0x2d9   :  { %v1357_v1 = vadd.f32 %v1341_v53, %v1319_v60  ;;  %v1358_v10 = vadd.f32 %v1342_v2, %v1320_v8  ;;  %v1359_v21 = vadd.f32 %v1343_v4, %v1321_v14  ;;  %v1345_v24 = vmul.f32 %v2813_v23, %v3364_v35  ;;  %v2821_v44 = vld [vmem:[%s3667_s0 + $0x48] sm:$0xff]  ;;  %v2832_v8 = vld [vmem:[%s3667_s0 + $0x158] sm:$0xff]  ;;  %v2834_v14 = vld [vmem:[%s3667_s0 + $0x160] sm:$0xff] }
 0x2da   :  { %v1391_v56 = vadd.f32 %v1375_v46, %v1353_v50  ;;  %v1392_v57 = vadd.f32 %v1376_v22, %v1354_v51  ;;  %v1393_v0 = vadd.f32 %v1377_v58, %v1355_v52  ;;  %v1394_v15 = vadd.f32 %v1378_v7, %v1356_v62  ;;  %v2822_v46 = vld [vmem:[%s3667_s0 + $0x140] sm:$0xff]  ;;  %v2823_v22 = vld [vmem:[%s3667_s0 + $0x50] sm:$0xff]  ;;  %v2824_v51 = vld [vmem:[%s3667_s0 + $0xd8] sm:$0xff] }
 0x2db   :  { %v1395_v20 = vadd.f32 %v1379_v12, %v1357_v1  ;;  %v1396_v37 = vadd.f32 %v1380_v26, %v1358_v10  ;;  %v1360_v16 = vadd.f32 %v1344_v19, %v1322_v29  ;;  %v1346_v39 = vmul.f32 %v2818_v38, %v3364_v35  ;;  %v2829_v62 = vld [vmem:[%s3667_s0 + $0x60] sm:$0xff]  ;;  %v2830_v1 = vld [vmem:[%s3667_s0 + $0xe8] sm:$0xff]  ;;  %v2831_v7 = vld [vmem:[%s3667_s0 + $0xf0] sm:$0xff] }
 0x2dc   :  { %2484 = vmatprep.mubr.msk.f32.mxu0 %vm83_vm0, %v1391_v56  ;;  %v1397_v40 = vadd.f32 %v1381_v31, %v1359_v21  ;;  %v1361_v41 = vadd.f32 %v1345_v24, %v1323_v36  ;;  %v1347_v42 = vmul.f32 %v2819_v11, %v3364_v35  ;;  %v1382_v43 = vmul.f32 %v2820_v17, %v3362_v34  ;;  %v2826_v56 = vld [vmem:[%s3667_s0 + $0x148] sm:$0xff]  ;;  %v2835_v10 = vld [vmem:[%s3667_s0 + $0x70] sm:$0xff]  ;;  %v2836_v21 = vld [vmem:[%s3667_s0 + $0xf8] sm:$0xff] }
 0x2dd   :  { %2485 = vmatmul.mubr.msk.f32.vlgmr.msra.gmra.mrb[48].mxu0 %vm83_vm0, %v1392_v57  ;;  %v1324_v45 = vmul.f32 %v2821_v44, %v3360_v33  ;;  %v1383_v47 = vmul.f32 %v2822_v46, %v3362_v34  ;;  %v1325_v48 = vmul.f32 %v2823_v22, %v3360_v33  ;;  %v1348_v52 = vmul.f32 %v2824_v51, %v3364_v35  ;;  %v2833_v12 = vld [vmem:[%s3667_s0 + $0x68] sm:$0xff]  ;;  %v2838_v29 = vld [vmem:[%s3667_s0 + $0x78] sm:$0xff]  ;;  %v1746_v51 = vld [vmem:[%s3675_s8 + $0x10] sm:$0xff] }
 0x2de   :  { %2487 = vmatprep.mubr.msk.f32.mxu0 %vm83_vm0, %v1393_v0  ;;  %v1398_v49 = vadd.f32 %v1382_v43, %v1360_v16  ;;  %v1349_v55 = vmul.f32 %v2825_v54, %v3364_v35  ;;  %v1384_v57 = vmul.f32 %v2826_v56, %v3362_v34  ;;  %v1326_v58 = vmul.f32 %v2827_v61, %v3360_v33  ;;  %v2837_v26 = vld [vmem:[%s3667_s0 + $0x168] sm:$0xff]  ;;  %v2840_v16 = vld [vmem:[%s3667_s0 + $0x178] sm:$0xff]  ;;  %v1656_v43 = vld [vmem:[%s3673_s6 + $0x20] sm:$0xff] }
 0x2df   :  { %v1362_v50 = vadd.f32 %v1346_v39, %v1324_v45  ;;  %v1399_v27 = vadd.f32 %v1383_v47, %v1361_v41  ;;  %v1363_v53 = vadd.f32 %v1347_v42, %v1325_v48  ;;  %v1385_v60 = vmul.f32 %v2828_v59, %v3362_v34  ;;  %v1652_v39 = vld [vmem:[%s3673_s6] sm:$0xff]  ;;  %v1654_v41 = vld [vmem:[%s3673_s6 + $0x10] sm:$0xff]  ;;  %v1655_v42 = vld [vmem:[%s3673_s6 + $0x18] sm:$0xff] }
 0x2e0   :  { %v1327_v63 = vmul.f32 %v2829_v62, %v3360_v33  ;;  %v1364_v0 = vadd.f32 %v1348_v52, %v1326_v58  ;;  %v1350_v3 = vmul.f32 %v2830_v1, %v3364_v35  ;;  %v1351_v6 = vmul.f32 %v2831_v7, %v3364_v35  ;;  %v1657_v44 = vld [vmem:[%s3673_s6 + $0x28] sm:$0xff]  ;;  %v1658_v45 = vld [vmem:[%s3673_s6 + $0x30] sm:$0xff]  ;;  %v1659_v47 = vld [vmem:[%s3673_s6 + $0x38] sm:$0xff] }
 0x2e1   :  { %2488 = vmatmul.mubr.msk.f32.gmra.mrb[50].mxu0 %vm83_vm0, %v1394_v15  ;;  %v1400_v2 = vadd.f32 %v1384_v57, %v1362_v50  ;;  %v1401_v4 = vadd.f32 %v1385_v60, %v1363_v53  ;;  %v1386_v9 = vmul.f32 %v2832_v8, %v3362_v34  ;;  %v1328_v13 = vmul.f32 %v2833_v12, %v3360_v33  ;;  %v1745_v50 = vld [vmem:[%s3675_s8 + $0x8] sm:$0xff]  ;;  %v2020_v54 = vld [vmem:[%s3672_s5] ss:$0 sm:$0xff] }
 0x2e2   :  { %2490 = vmatprep.mubr.msk.f32.mxu0 %vm83_vm0, %v1395_v20  ;;  %v1365_v5 = vadd.f32 %v1349_v55, %v1327_v63  ;;  %v1387_v15 = vmul.f32 %v2834_v14, %v3362_v34  ;;  %v1329_v18 = vmul.f32 %v2835_v10, %v3360_v33  ;;  %v1352_v23 = vmul.f32 %v2836_v21, %v3364_v35  ;;  %v2839_v35 = vld [vmem:[%s3667_s0 + $0x170] sm:$0xff] }
 0x2e3   :  { %v1402_v19 = vadd.f32 %v1386_v9, %v1364_v0  ;;  %v1366_v20 = vadd.f32 %v1350_v3, %v1328_v13  ;;  %v1388_v28 = vmul.f32 %v2837_v26, %v3362_v34  ;;  %v1330_v30 = vmul.f32 %v2838_v29, %v3360_v33 }
 0x2e4   :  { %v1403_v24 = vadd.f32 %v1387_v15, %v1365_v5  ;;  %v1367_v25 = vadd.f32 %v1351_v6, %v1329_v18  ;;  %v1389_v31 = vmul.f32 %v2839_v35, %v3362_v34  ;;  %v1390_v38 = vmul.f32 %v2840_v16, %v3362_v34 }
 0x2e5   :  { %2491 = vmatmul.mubr.msk.f32.gmra.mrb[52].mxu0 %vm83_vm0, %v1396_v37  ;;  %v1404_v32 = vadd.f32 %v1388_v28, %v1366_v20  ;;  %v1368_v36 = vadd.f32 %v1352_v23, %v1330_v30  ;;  %v2866_v11 = vmov 0.0|0.0   ;;  %v2661_v17 = vpack.c.bf16 %v1655_v42, %v1654_v41 }
 0x2e6   :  { %2493 = vmatprep.mubr.msk.f32.mxu0 %vm83_vm0, %v1397_v40  ;;  %v1405_v37 = vadd.f32 %v1389_v31, %v1367_v25  ;;  %v1653_v40 = vld [vmem:[%s3673_s6 + $0x8] sm:$0xff]  ;;  %2657 = vmatprep.subr.bf16.mxu1 %v2866_v11  ;;  %v2664_v46 = vpack.c.bf16 %v1657_v44, %v1656_v43  ;;  %v2868_v22 = vmov 0.0   ;;  %v2667_v48 = vpack.c.bf16 %v1659_v47, %v1658_v45 }
 0x2e7   :  { %v1406_v33 = vadd.f32 %v1390_v38, %v1368_v36  ;;  %v2658_v34 = vpack.c.bf16 %v1653_v40, %v1652_v39  ;;  %2669 = vmatprep.subr.bf16.mxu0 %v2866_v11  ;;  %2524 = vmatprep.mubr.msk.f32.mxu1 %vm2867_vm2, %v2868_v22 }
 0x2e9   :  { %2494 = vmatmul.mubr.msk.f32.gmra.mrb[54].mxu0 %vm83_vm0, %v1398_v49  ;;  %2659 = vmatpush3.bf16.msra.mxu1 %v2658_v34  ;;  %v1744_v49 = vld [vmem:[%s3675_s8] sm:$0xff] }
 0x2ea   :  { %2496 = vmatprep.mubr.msk.f32.mxu0 %vm83_vm0, %v1399_v27  ;;  %2660 = vmatprep.subr.bf16.mxu1 %v2866_v11  ;;  %v2670_v52 = vpack.c.bf16 %v1745_v50, %v1744_v49  ;;  %v1747_v27 = vld [vmem:[%s3675_s8 + $0x18] sm:$0xff] }
 0x2eb   :  { %v2673_v53 = vpack.c.bf16 %v1747_v27, %v1746_v51 }
 0x2ec   :  { %2671 = vmatpush3.bf16.msra.mxu0 %v2670_v52 }
 0x2ed   :  { %2497 = vmatmul.mubr.msk.f32.gmra.mrb[56].mxu0 %vm83_vm0, %v1400_v2  ;;  %2662 = vmatpush3.bf16.msra.mxu1 %v2661_v17 }
 0x2ee   :  { %2499 = vmatprep.mubr.msk.f32.mxu0 %vm83_vm0, %v1401_v4  ;;  %2663 = vmatprep.subr.bf16.mxu1 %v2866_v11 }
 0x2ef   :  { %2672 = vmatprep.subr.bf16.mxu0 %v2866_v11 }
 0x2f0   :  { %2674 = vmatpush3.bf16.msra.mxu0 %v2673_v53 }
 0x2f1   :  { %2500 = vmatmul.mubr.msk.f32.gmra.mrb[58].mxu0 %vm83_vm0, %v1402_v19  ;;  %2665 = vmatpush3.bf16.msra.mxu1 %v2664_v46 }
 0x2f2   :  { %2502 = vmatprep.mubr.msk.f32.mxu0 %vm83_vm0, %v1403_v24  ;;  %2666 = vmatprep.subr.bf16.mxu1 %v2866_v11 }
 0x2f5   :  { %2503 = vmatmul.mubr.msk.f32.gmra.mrb[60].mxu0 %vm83_vm0, %v1404_v32  ;;  %2668 = vmatpush3.bf16.msra.mxu1 %v2667_v48 }
 0x2f6   :  { %2505 = vmatprep.mubr.msk.f32.mxu0 %vm83_vm0, %v1405_v37  ;;  %2675 = vmatprep.subr.bf16.mxu1 %v2866_v11 }
 0x2f9   :  { %2506 = vmatmul.mubr.msk.f32.gmra.mrb[62].mxu0 %vm83_vm0, %v1406_v33 }
 0x2fa   :  { %2535 = vmatprep.mubr.msk.f32.mxu0 %vm2867_vm2, %v2868_v22 }
 0x3b0   :  { %v2486_v55 = vpop.f32.mrb[48].mxu0 }
 0x3b1   :  { %v1536_v56 = vadd.f32 %v2486_v55, %v2020_v54  ;;  %v1530_v57 = vpop.f32.mrb[49].mxu0 }
 0x3b2   :  { %v1531_v61 = vadd.f32 %v2020_v54, %v1530_v57 }
 0x3b3   :  { %v1611_v58 = vsel %vm1609_vm3, %v1536_v56, 0.0 }
 0x3b4   :  { %v1610_v59 = vsel %vm1609_vm3, %v1531_v61, 0.0  ;;  %v2489_v60 = vpop.f32.mrb[50].mxu0 }
 0x3b5   :  { %v1612_v62 = vadd.f32 %v1611_v58, %v1610_v59  ;;  %v1540_v63 = vpop.f32.mrb[51].mxu0  ;;  %v1546_v2 = vadd.f32 %v2489_v60, %v2020_v54 }
 0x3b6   :  { %v1541_v0 = vadd.f32 %v2020_v54, %v1540_v63 }
 0x3b7   :  { %v1615_v7 = vsel %vm1609_vm3, %v1546_v2, 0.0 }
 0x3b8   :  { %v1613_v1 = vsel %vm1609_vm3, %v1541_v0, 0.0  ;;  %v2492_v3 = vpop.f32.mrb[52].mxu0 }
 0x3b9   :  { %v1614_v4 = vadd.f32 %v1613_v1, %v1612_v62  ;;  %v1550_v5 = vpop.f32.mrb[53].mxu0  ;;  %v1556_v6 = vadd.f32 %v2492_v3, %v2020_v54  ;;  %v2037_v3 = vld [vmem:[%s3674_s7] ss:$0 sm:$0xff] }
 0x3ba   :  { %v1551_v8 = vadd.f32 %v2020_v54, %v1550_v5 }
 0x3bb   :  { %v1616_v9 = vadd.f32 %v1615_v7, %v1614_v4  ;;  %v1619_v10 = vsel %vm1609_vm3, %v1556_v6, 0.0 }
 0x3bc   :  { %v1617_v12 = vsel %vm1609_vm3, %v1551_v8, 0.0  ;;  %v2495_v13 = vpop.f32.mrb[54].mxu0  ;;  %v1830_v8 = vld [vmem:[%s3677_s10] sm:$0xff] }
 0x3bd   :  { %v1618_v14 = vadd.f32 %v1617_v12, %v1616_v9  ;;  %v1560_v15 = vpop.f32.mrb[55].mxu0  ;;  %v1566_v18 = vadd.f32 %v2495_v13, %v2020_v54  ;;  %v1831_v9 = vld [vmem:[%s3677_s10 + $0x8] sm:$0xff] }
 0x3be   :  { %v1561_v19 = vadd.f32 %v2020_v54, %v1560_v15  ;;  %v2676_v12 = vpack.c.bf16 %v1831_v9, %v1830_v8 }
 0x3bf   :  { %v1620_v20 = vadd.f32 %v1619_v10, %v1618_v14  ;;  %v1623_v28 = vsel %vm1609_vm3, %v1566_v18, 0.0  ;;  %v2041_v18 = vld [vmem:[%s3678_s11] ss:$0 sm:$0xff] }
 0x3c0   :  { %v1621_v21 = vsel %vm1609_vm3, %v1561_v19, 0.0  ;;  %v2498_v23 = vpop.f32.mrb[56].mxu0 }
 0x3c1   :  { %v1622_v24 = vadd.f32 %v1621_v21, %v1620_v20  ;;  %v1576_v25 = vadd.f32 %v2498_v23, %v2020_v54  ;;  %v1570_v26 = vpop.f32.mrb[57].mxu0 }
 0x3c2   :  { %v1571_v29 = vadd.f32 %v2020_v54, %v1570_v26 }
 0x3c3   :  { %v1624_v30 = vadd.f32 %v1623_v28, %v1622_v24  ;;  %v1632_v35 = vsel %vm1609_vm3, %v1576_v25, 0.0 }
 0x3c4   :  { %v1631_v31 = vsel %vm1609_vm3, %v1571_v29, 0.0  ;;  %v2501_v32 = vpop.f32.mrb[58].mxu0 }
 0x3c5   :  { %v1633_v36 = vadd.f32 %v1632_v35, %v1631_v31  ;;  %v1580_v37 = vpop.f32.mrb[59].mxu0  ;;  %v1586_v16 = vadd.f32 %v2501_v32, %v2020_v54  ;;  %v1625_v17 = vrot.slane %v1624_v30, 4 }
 0x3c6   :  { %v1581_v38 = vadd.f32 %v2020_v54, %v1580_v37 }
 0x3c7   :  { %v1636_v11 = vsel %vm1609_vm3, %v1586_v16, 0.0  ;;  %v1626_v51 = vadd.f32 %v1625_v17, %v1624_v30 }
 0x3c8   :  { %v1634_v33 = vsel %vm1609_vm3, %v1581_v38, 0.0  ;;  %v2504_v39 = vpop.f32.mrb[60].mxu0 }
 0x3c9   :  { %v1635_v40 = vadd.f32 %v1634_v33, %v1633_v36  ;;  %v1590_v41 = vpop.f32.mrb[61].mxu0  ;;  %v1596_v34 = vadd.f32 %v2504_v39, %v2020_v54  ;;  %v1627_v56 = vrot.slane %v1626_v51, 2 }
 0x3ca   :  { %v1591_v42 = vadd.f32 %v2020_v54, %v1590_v41 }
 0x3cb   :  { %v1637_v43 = vadd.f32 %v1636_v11, %v1635_v40  ;;  %v1640_v48 = vsel %vm1609_vm3, %v1596_v34, 0.0  ;;  %v1628_v58 = vadd.f32 %v1627_v56, %v1626_v51 }
 0x3cc   :  { %v1638_v44 = vsel %vm1609_vm3, %v1591_v42, 0.0  ;;  %v2507_v45 = vpop.f32.mrb[62].mxu0 }
 0x3cd   :  { %v1639_v46 = vadd.f32 %v1638_v44, %v1637_v43  ;;  %v1600_v47 = vpop.f32.mrb[63].mxu0  ;;  %v1606_v49 = vadd.f32 %v2507_v45, %v2020_v54  ;;  %v1629_v62 = vrot.slane %v1628_v58, 1 }
 0x3ce   :  { %v1601_v50 = vadd.f32 %v2020_v54, %v1600_v47 }
 0x3cf   :  { %v1641_v52 = vadd.f32 %v1640_v48, %v1639_v46  ;;  %v1644_v55 = vsel %vm1609_vm3, %v1606_v49, 0.0  ;;  %v1630_v0 = vadd.f32 %v1629_v62, %v1628_v58 }
 0x3d0   :  { %v1642_v27 = vsel %vm1609_vm3, %v1601_v50, 0.0 }
 0x3d1   :  { %v1643_v53 = vadd.f32 %v1642_v27, %v1641_v52 }
 0x3d3   :  { %v1645_v57 = vadd.f32 %v1644_v55, %v1643_v53 }
 0x3d5   :  { %v1646_v61 = vrot.slane %v1645_v57, 4 }
 0x3d7   :  { %v1647_v59 = vadd.f32 %v1646_v61, %v1645_v57 }
 0x3d9   :  { %v1648_v60 = vrot.slane %v1647_v59, 2 }
 0x3db   :  { %v1649_v63 = vadd.f32 %v1648_v60, %v1647_v59 }
 0x3dd   :  { %v1650_v2 = vrot.slane %v1649_v63, 1 }
 0x3df   :  { %v1651_v1 = vadd.f32 %v1650_v2, %v1649_v63 }
 0x3e1   :  { %v1670_v54 = vsel %vm1669_vm4, %v1651_v1, %v1630_v0 }
 0x3e2   :  { %2525 = vmatmul.mubr.msk.f32.vlgmr.msra.gmra.mrb[48].mxu1 %vm1609_vm3, %v1670_v54 }
 0x3e3   :  { %2542 = vmatprep.mubr.msk.f32.mxu1 %vm2867_vm2, %v2868_v22  ;;  %2677 = vmatpush3.bf16.msra.mxu1 %v2676_v12  ;;  %v2039_v22 = vld [vmem:[%s3676_s9] ss:$0 sm:$0xff]  ;;  %s2869_s9 = smov [#allocation2]  }
 0x3e4   :  { %s1931_s10 = sshll.u32 %s2869_s9, 4  ;;  %s1932_s10 = int_to_ptr.vmem [resolvable:$true] %s1931_s10 }
 0x3e5   :  { %s2841_s11 = scalar_lea.vmem %s1932_s10, 32  ;;  %p2846_p1 = scmp.lt.s32.totalorder %s1932_s10, %s1932_s10 }
 0x3e6   :  { %p2842_p0 = scmp.ne.s32.totalorder %s1932_s10, %s2841_s11  ;;  %p2847_p2 = scmp.lt.s32.totalorder %s2841_s11, %s2841_s11 }
 0x3e8   :  { %p2848_p3 = por %p2847_p2, %p2846_p1 }
 0x3ea   :  { %p2849_p4 = pnand %p2848_p3, %p2842_p0 }
 0x4b5   :  { %v1739_v4 = vpop.f32.mrb[48].mxu1 }
 0x4b6   :  { %v1740_v5 = vadd.f32 %v2037_v3, %v1739_v4  ;;  %v2526_v7 = vpop.f32.mrb[49].mxu1 }
 0x4b8   :  { %v1743_v6 = vmax.f32 %v1740_v5, 0.0 }
 0x4ba   :  { %2536 = vmatmul.mubr.msk.f32.vlgmr.msra.gmra.mrb[64].mxu0 %vm1755_vm5, %v1743_v6 }
 0x58d   :  { %v1825_v13 = vpop.f32.mrb[64].mxu0 }
 0x58e   :  { %v1826_v14 = vadd.f32 %v2039_v22, %v1825_v13  ;;  %v2537_v15 = vpop.f32.mrb[65].mxu0 }
 0x590   :  { %v1829_v10 = vmax.f32 %v1826_v14, 0.0 }
 0x592   :  { %2543 = vmatmul.mubr.msk.f32.vlgmr.msra.gmra.mrb[50].mxu1 %vm83_vm0, %v1829_v10 }
 0x665   :  { %v1908_v19 = vpop.f32.mrb[50].mxu1 }
 0x666   :  { %v1909_v20 = vadd.f32 %v2041_v18, %v1908_v19  ;;  %v2544_v21 = vpop.f32.mrb[51].mxu1 }
 0x668   :  { %v1913_v23 = vsel %vm1912_vm6, %v1909_v20, -inf }
 0x669   :  { %1914 = vmax.xlane.f32.xlu1 %v1913_v23 }
 0x6f6   :  { %v1915_v24 = vpop.xlane.xlu1 %1914 }
 0x6f7   :  { %v1916_v25 = vsub.f32 %v1909_v20, %v1915_v24 }
 0x6f9   :  { %v1917_v26 = vmul.f32 1.442695, %v1916_v25 }
 0x6fb   :  { %2789 = vpow2.f32 %v1917_v26 }
 0x705   :  { %v2790_v28 = vpop.eup %2789 }
 0x706   :  { %v1919_v29 = vsel %vm1912_vm6, %v2790_v28, 0.0 }
 0x707   :  { %1920 = vadd.xlane.f32.xlu0 %v1919_v29 }
 0x794   :  { %v1921_v30 = vpop.xlane.xlu0 %1920 }
 0x795   :  { %2791 = vrcp.f32 %v1921_v30 }
 0x79f   :  { %v2792_v35 = vpop.eup %2791 }
 0x7a0   :  { %v1923_v31 = vmul.f32 %v2792_v35, %v2790_v28 }
 0x7a2   :  { %1924 = vst.msk [vmem:[#allocation2] sm:$0x3] %vm1912_vm6, %v1923_v31 }
 0x7a3   :  { %2852 = shalt.err (!%p2849_p4)
}
 0x7a4   :  { %s2853_s2 = scalar_lea.hbm %s3679_s12, 32 }
 0x7a5   :  { %p2854_p5 = scmp.ne.s32.totalorder %s3679_s12, %s2853_s2  ;;  %p2857_p6 = scmp.lt.u32.totalorder %s2853_s2, %s3679_s12 }
 0x7a7   :  { %p2859_p7 = pnand %p2857_p6, %p2854_p5 }
 0x7a9   :  { %2862 = shalt.err (!%p2859_p7)
}
 0x7aa   :  { %1934 = dma.vmem_to_hbm [thread:$0]  %s1932_s10, 32, %s3679_s12, [#allocation3]  }
 0x7ab   :  { %2863 = dma.done.wait [#allocation3], 32  }
 0x7ac   :  { %2864 = vsyncadd [#allocation3], 4294967264 }
 0x7ad   :  { %1938 = vsyncpa [#allocation3], 1 }

</bundles_post_ra>
